<compile_context>
chip_gen: v6e
topology: v6e:2x2x1
jax: 0.10.0
libtpu: 0.0.40
codegen_flags: <defaults>
</compile_context>

<pallas_src>
import numpy as np
import jax
import jax.numpy as jnp
from jax.experimental import pallas as pl
from jax.experimental.pallas import tpu as pltpu

X_DIM = 768          # node feature dim (projection target is hard-coded to 768 and the
                     # residual emb_n + old_x forces x_dim == 768)
GED = 128            # graph_emb_dim (small test value; args default is 512)
NUM_LAYERS = 3
BN_EPS = 1e-5
LOG_SHIFT = float(np.log(2.0))   # ShiftSoftplus shift=2

# ---- static layout of the packed parameter slabs -------------------------------------
# 128-lane weight slab (bf16): [ w1_0 | w1_1 | w1_2 | w2_0 | w2_1 | w2_2 | dense_w ]
W1_OFFS = (0, X_DIM, X_DIM + GED)
W1_ROWS = (X_DIM, GED, GED)
W2_OFF0 = X_DIM + 2 * GED
DENSE_OFF = W2_OFF0 + NUM_LAYERS * GED
W128_ROWS = DENSE_OFF + NUM_LAYERS * GED
# 768-lane weight slab (bf16): [ additional_head_w | projection_w ]
AH_OFF = 0
PROJ_OFF = 2 * X_DIM
W768_ROWS = 2 * X_DIM + GED
# 128-lane bias/affine slab (f32): b1(3) | b2(3) | bn_scale(3) | bn_shift(3) | dense_b | pad
B1_ROW = 0
B2_ROW = NUM_LAYERS
BN_SCALE_ROW = 2 * NUM_LAYERS
BN_SHIFT_ROW = 3 * NUM_LAYERS
DENSE_B_ROW = 4 * NUM_LAYERS
B128_ROWS = 16
# 768-lane bias slab (f32): row0 = additional_head bias, row1 = projection bias


def gin_kernel(x_ref, adj_ref, pool_ref, w128_ref, w768_ref, b128_ref, b768_ref,
               embn_ref, embg_ref):
    f32 = jnp.float32
    bf16 = jnp.bfloat16

    x_flat = x_ref[...]                       # f32 [N, 2*X_DIM]
    old_x = x_flat[:, :X_DIM]                 # residual term x[:, 0, :]
    adj = adj_ref[...]                        # bf16 [N, N]

    # additional_head: Linear(2*x_dim, x_dim) -> ReLU  (bf16 MXU, f32 accumulation)
    ah_w = w768_ref[AH_OFF:AH_OFF + 2 * X_DIM, :]
    x = jnp.dot(x_flat.astype(bf16), ah_w, preferred_element_type=f32)
    x = jnp.maximum(x + b768_ref[0:1, :], 0.0)

    xs = []
    for i in range(NUM_LAYERS):
        # GINConv (eps=0): nn(x + sum_{j->i} x_j); scatter-sum as dense A @ x
        h = x + jnp.dot(adj, x.astype(bf16), preferred_element_type=f32)
        w1 = w128_ref[W1_OFFS[i]:W1_OFFS[i] + W1_ROWS[i], :]
        h = jnp.dot(h.astype(bf16), w1, preferred_element_type=f32)
        h = jnp.maximum(h + b128_ref[B1_ROW + i:B1_ROW + i + 1, :], 0.0)
        w2 = w128_ref[W2_OFF0 + i * GED:W2_OFF0 + (i + 1) * GED, :]
        h = jnp.dot(h.astype(bf16), w2, preferred_element_type=f32)
        h = h + b128_ref[B2_ROW + i:B2_ROW + i + 1, :]
        # F.relu then eval-mode BatchNorm1d as a host-precomputed affine (scale, shift)
        h = jnp.maximum(h, 0.0)
        h = (h * b128_ref[BN_SCALE_ROW + i:BN_SCALE_ROW + i + 1, :]
             + b128_ref[BN_SHIFT_ROW + i:BN_SHIFT_ROW + i + 1, :])
        x = h
        xs.append(h)

    # dense_layer(torch.cat(xs, 1)) without materializing the concat:
    # node_emb = sum_l xs[l] @ dense_w[l*GED:(l+1)*GED, :] + dense_b
    node_emb = b128_ref[DENSE_B_ROW:DENSE_B_ROW + 1, :]
    for l in range(NUM_LAYERS):
        dw = w128_ref[DENSE_OFF + l * GED:DENSE_OFF + (l + 1) * GED, :]
        node_emb = node_emb + jnp.dot(xs[l].astype(bf16), dw,
                                      preferred_element_type=f32)

    # ShiftSoftplus: softplus(beta=1, threshold=20) - log(2)
    act = jnp.where(node_emb > 20.0,
                    node_emb,
                    jnp.log1p(jnp.exp(jnp.minimum(node_emb, 20.0)))) - LOG_SHIFT

    # projection_layer -> per-node embeddings (before residual)
    proj_w = w768_ref[PROJ_OFF:PROJ_OFF + GED, :]
    emb_n = jnp.dot(act.astype(bf16), proj_w, preferred_element_type=f32) + b768_ref[1:2, :]

    # global_mean_pool as pool-matrix matmul (pool holds exact 1/|graph| weights; kept f32)
    embg_ref[...] = jnp.dot(pool_ref[...], emb_n, preferred_element_type=f32)
    # residual with old_x = x[:, 0, :]
    embn_ref[...] = emb_n + old_x


def xavier_uniform(key, fan_in, fan_out):
    limit = float(np.sqrt(6.0 / (fan_in + fan_out)))
    return jax.random.uniform(key, (fan_in, fan_out), jnp.float32, -limit, limit)


def make_params(key):
    keys = jax.random.split(key, 2 + 2 * NUM_LAYERS + 2)
    ki = iter(keys)
    params = {}
    params["ah_w"] = xavier_uniform(next(ki), 2 * X_DIM, X_DIM)
    params["ah_b"] = jnp.zeros((1, X_DIM), jnp.float32)
    layers = []
    for i in range(NUM_LAYERS):
        in_dim = X_DIM if i == 0 else GED
        w1 = xavier_uniform(next(ki), in_dim, GED)
        b1 = jnp.zeros((1, GED), jnp.float32)
        w2 = xavier_uniform(next(ki), GED, GED)
        b2 = jnp.zeros((1, GED), jnp.float32)
        gamma = jnp.ones((1, GED), jnp.float32)     # BatchNorm1d defaults (eval mode)
        beta = jnp.zeros((1, GED), jnp.float32)
        rmean = jnp.zeros((1, GED), jnp.float32)
        rvar = jnp.ones((1, GED), jnp.float32)
        layers.append((w1, b1, w2, b2, gamma, beta, rmean, rvar))
    params["layers"] = layers
    params["dense_w"] = xavier_uniform(next(ki), NUM_LAYERS * GED, GED)
    params["dense_b"] = jnp.zeros((1, GED), jnp.float32)
    params["proj_w"] = xavier_uniform(next(ki), GED, 768)
    params["proj_b"] = jnp.zeros((1, 768), jnp.float32)
    return params


def pack_params(params):
    """Pack all weights/biases into 4 slabs (2 bf16 weight slabs, 2 f32 bias slabs)."""
    layers = params["layers"]

    w128_parts = [lp[0] for lp in layers] + [lp[2] for lp in layers] + [params["dense_w"]]
    w128 = jnp.concatenate(w128_parts, axis=0).astype(jnp.bfloat16)
    assert w128.shape == (W128_ROWS, GED)

    w768 = jnp.concatenate([params["ah_w"], params["proj_w"]], axis=0).astype(jnp.bfloat16)
    assert w768.shape == (W768_ROWS, X_DIM)

    b128 = jnp.zeros((B128_ROWS, GED), jnp.float32)
    for i, (w1, b1, w2, b2, gamma, beta, mean, var) in enumerate(layers):
        # eval-mode BN folded to a single affine applied after relu (works for any sign of gamma)
        scale = gamma * jax.lax.rsqrt(var + BN_EPS)
        shift = beta - mean * scale
        b128 = b128.at[B1_ROW + i].set(b1[0])
        b128 = b128.at[B2_ROW + i].set(b2[0])
        b128 = b128.at[BN_SCALE_ROW + i].set(scale[0])
        b128 = b128.at[BN_SHIFT_ROW + i].set(shift[0])
    b128 = b128.at[DENSE_B_ROW].set(params["dense_b"][0])

    b768 = jnp.concatenate([params["ah_b"], params["proj_b"]], axis=0)  # [2, 768] f32
    return w128, w768, b128, b768


def gin_forward(x, edge_index_np, batch_np, params):
    """x: [N, 2, X_DIM] float32, edge_index_np: np.int [2, E], batch_np: np.int [N]."""
    N = x.shape[0]
    num_graphs = int(batch_np.max()) + 1
    N_pad = int(-(-N // 8) * 8)                     # sublane-friendly node padding

    x_flat = jnp.asarray(x).reshape(N, 2 * X_DIM)   # first X_DIM lanes == x[:, 0, :]
    if N_pad != N:
        x_flat = jnp.pad(x_flat, ((0, N_pad - N), (0, 0)))

    # dense adjacency A[dst, src] (sum aggregation); small integer counts -> exact in bf16
    adj_np = np.zeros((N_pad, N_pad), np.float32)
    np.add.at(adj_np,
              (edge_index_np[1].astype(np.int64), edge_index_np[0].astype(np.int64)), 1.0)
    adj = jnp.asarray(adj_np, dtype=jnp.bfloat16)

    # mean-pool matrix P[b, i] = 1/|graph b| if batch[i] == b (padded columns are zero)
    counts = np.bincount(batch_np, minlength=num_graphs).astype(np.float32)
    pool_np = np.zeros((num_graphs, N_pad), np.float32)
    pool_np[batch_np, np.arange(N)] = 1.0 / counts[batch_np]
    pool = jnp.asarray(pool_np)

    w128, w768, b128, b768 = pack_params(params)

    inputs = (x_flat, adj, pool, w128, w768, b128, b768)
    vmem = pl.BlockSpec(memory_space=pltpu.MemorySpace.VMEM)
    emb_n_pad, emb_g = pl.pallas_call(
        gin_kernel,
        out_shape=(jax.ShapeDtypeStruct((N_pad, X_DIM), jnp.float32),
                   jax.ShapeDtypeStruct((num_graphs, X_DIM), jnp.float32)),
        in_specs=[vmem] * len(inputs),
        out_specs=(vmem, vmem),
        # 48 MiB: fits v7x's 64 MiB physical VMEM, generous headroom for the ~3 MiB of
        # packed weights + activations at these shapes.
        compiler_params=pltpu.CompilerParams(vmem_limit_bytes=48 * 1024 * 1024),
    )(*inputs)

    emb_n = emb_n_pad[:N]

    # --- graph_flatten (ragged -> padded + mask): pure glue, plain JAX/numpy ---
    max_len = int(counts.max())
    sort_idx = np.argsort(batch_np, kind="stable")
    sorted_batch = batch_np[sort_idx]
    starts = np.zeros(num_graphs, np.int64)
    starts[1:] = np.cumsum(counts.astype(np.int64))[:-1]
    pos = np.arange(N) - starts[sorted_batch]
    idx_np = np.zeros((num_graphs, max_len), np.int32)
    valid_np = np.zeros((num_graphs, max_len), bool)
    idx_np[sorted_batch, pos] = sort_idx
    valid_np[sorted_batch, pos] = True
    idx = jnp.asarray(idx_np)
    valid = jnp.asarray(valid_np)

    padded = jnp.where(valid[..., None], emb_n[idx], 0.0)        # [B, max_len, 768]
    # reference semantics: mask = 1 where the (padded) row does not sum to exactly zero
    mask = (jnp.sum(padded, axis=-1) != 0).astype(jnp.int32)     # [B, max_len]

    return emb_g[:, None, :], padded, mask


if __name__ == "__main__":
    key = jax.random.PRNGKey(0)
    k_x, k_p = jax.random.split(key)

    N = 16                                              # total nodes
    batch_np = np.array([0] * 9 + [1] * 7, np.int32)    # 2 graphs, ragged sizes

    # deterministic ring edges inside each graph (both directions)
    edges = []
    for g in np.unique(batch_np):
        nodes = np.where(batch_np == g)[0]
        for a, b in zip(nodes, np.roll(nodes, -1)):
            edges.append((a, b))
            edges.append((b, a))
    edge_index_np = np.array(edges, np.int32).T          # [2, E]

    x = jax.random.normal(k_x, (N, 2, X_DIM), jnp.float32)
    params = make_params(k_p)

    emb_g, emb_n, mask = gin_forward(x, edge_index_np, batch_np, params)
    jax.block_until_ready((emb_g, emb_n, mask))

    assert emb_g.shape == (2, 1, 768)
    assert emb_n.shape == (2, 9, 768)
    assert mask.shape == (2, 9)
    print("KERNEL_OK")
</pallas_src>

<mosaic_0001>
module attributes {stable_mosaic.version = 11 : i64} {
  func.func @gin_kernel(%arg0: memref<16x1536xf32, #tpu.memory_space<vmem>>, %arg1: memref<16x16xbf16, #tpu.memory_space<vmem>>, %arg2: memref<2x16xf32, #tpu.memory_space<vmem>>, %arg3: memref<1792x128xbf16, #tpu.memory_space<vmem>>, %arg4: memref<1664x768xbf16, #tpu.memory_space<vmem>>, %arg5: memref<16x128xf32, #tpu.memory_space<vmem>>, %arg6: memref<2x768xf32, #tpu.memory_space<vmem>>, %arg7: memref<16x768xf32, #tpu.memory_space<vmem>>, %arg8: memref<2x768xf32, #tpu.memory_space<vmem>>) attributes {dimension_semantics = [], scalar_prefetch = 0 : i64, scratch_operands = 0 : i64, tpu.core_type = #tpu.core_type<tc>} {
    %c0 = arith.constant 0 : index
    %c0_0 = arith.constant 0 : index
    %0 = vector.load %arg0[%c0, %c0_0] : memref<16x1536xf32, #tpu.memory_space<vmem>>, vector<16x1536xf32>
    %1 = vector.extract_strided_slice %0 {offsets = [0, 0], sizes = [16, 768], strides = [1, 1]} : vector<16x1536xf32> to vector<16x768xf32>
    %c0_1 = arith.constant 0 : index
    %c0_2 = arith.constant 0 : index
    %2 = vector.load %arg1[%c0_1, %c0_2] : memref<16x16xbf16, #tpu.memory_space<vmem>>, vector<16x16xbf16>
    %c0_3 = arith.constant 0 : index
    %c0_4 = arith.constant 0 : index
    %3 = vector.load %arg4[%c0_3, %c0_4] : memref<1664x768xbf16, #tpu.memory_space<vmem>>, vector<1536x768xbf16>
    %4 = arith.truncf %0 : vector<16x1536xf32> to vector<16x1536xbf16>
    %cst = arith.constant dense<0.000000e+00> : vector<16x768xf32>
    %5 = tpu.matmul %4, %3, %cst {dimension_numbers = #tpu.dot_dimension_numbers<[1], [0], [0], [1], [0, 0, 1, 1], [], []>} : vector<16x1536xbf16>, vector<1536x768xbf16>, vector<16x768xf32> -> vector<16x768xf32>
    %c0_5 = arith.constant 0 : index
    %c0_6 = arith.constant 0 : index
    %6 = vector.load %arg6[%c0_5, %c0_6] : memref<2x768xf32, #tpu.memory_space<vmem>>, vector<1x768xf32>
    %7 = vector.broadcast %6 : vector<1x768xf32> to vector<16x768xf32>
    %8 = arith.addf %5, %7 : vector<16x768xf32>
    %cst_7 = arith.constant 0.000000e+00 : f32
    %9 = vector.broadcast %cst_7 : f32 to vector<16x768xf32>
    %10 = arith.maximumf %8, %9 : vector<16x768xf32>
    %11 = arith.truncf %10 : vector<16x768xf32> to vector<16x768xbf16>
    %cst_8 = arith.constant dense<0.000000e+00> : vector<16x768xf32>
    %12 = tpu.matmul %2, %11, %cst_8 {dimension_numbers = #tpu.dot_dimension_numbers<[1], [0], [0], [1], [0, 0, 1, 1], [], []>} : vector<16x16xbf16>, vector<16x768xbf16>, vector<16x768xf32> -> vector<16x768xf32>
    %13 = arith.addf %10, %12 : vector<16x768xf32>
    %c0_9 = arith.constant 0 : index
    %c0_10 = arith.constant 0 : index
    %14 = vector.load %arg3[%c0_9, %c0_10] : memref<1792x128xbf16, #tpu.memory_space<vmem>>, vector<768x128xbf16>
    %15 = arith.truncf %13 : vector<16x768xf32> to vector<16x768xbf16>
    %cst_11 = arith.constant dense<0.000000e+00> : vector<16x128xf32>
    %16 = tpu.matmul %15, %14, %cst_11 {dimension_numbers = #tpu.dot_dimension_numbers<[1], [0], [0], [1], [0, 0, 1, 1], [], []>} : vector<16x768xbf16>, vector<768x128xbf16>, vector<16x128xf32> -> vector<16x128xf32>
    %c0_12 = arith.constant 0 : index
    %c0_13 = arith.constant 0 : index
    %17 = vector.load %arg5[%c0_12, %c0_13] : memref<16x128xf32, #tpu.memory_space<vmem>>, vector<1x128xf32>
    %18 = vector.broadcast %17 : vector<1x128xf32> to vector<16x128xf32>
    %19 = arith.addf %16, %18 : vector<16x128xf32>
    %cst_14 = arith.constant 0.000000e+00 : f32
    %20 = vector.broadcast %cst_14 : f32 to vector<16x128xf32>
    %21 = arith.maximumf %19, %20 : vector<16x128xf32>
    %c1024 = arith.constant 1024 : index
    %c0_15 = arith.constant 0 : index
    %22 = vector.load %arg3[%c1024, %c0_15] : memref<1792x128xbf16, #tpu.memory_space<vmem>>, vector<128x128xbf16>
    %23 = arith.truncf %21 : vector<16x128xf32> to vector<16x128xbf16>
    %cst_16 = arith.constant dense<0.000000e+00> : vector<16x128xf32>
    %24 = tpu.matmul %23, %22, %cst_16 {dimension_numbers = #tpu.dot_dimension_numbers<[1], [0], [0], [1], [0, 0, 1, 1], [], []>} : vector<16x128xbf16>, vector<128x128xbf16>, vector<16x128xf32> -> vector<16x128xf32>
    %c3 = arith.constant 3 : index
    %c0_17 = arith.constant 0 : index
    %25 = vector.load %arg5[%c3, %c0_17] : memref<16x128xf32, #tpu.memory_space<vmem>>, vector<1x128xf32>
    %26 = vector.broadcast %25 : vector<1x128xf32> to vector<16x128xf32>
    %27 = arith.addf %24, %26 : vector<16x128xf32>
    %cst_18 = arith.constant 0.000000e+00 : f32
    %28 = vector.broadcast %cst_18 : f32 to vector<16x128xf32>
    %29 = arith.maximumf %27, %28 : vector<16x128xf32>
    %c6 = arith.constant 6 : index
    %c0_19 = arith.constant 0 : index
    %30 = vector.load %arg5[%c6, %c0_19] : memref<16x128xf32, #tpu.memory_space<vmem>>, vector<1x128xf32>
    %31 = vector.broadcast %30 : vector<1x128xf32> to vector<16x128xf32>
    %32 = arith.mulf %29, %31 : vector<16x128xf32>
    %c9 = arith.constant 9 : index
    %c0_20 = arith.constant 0 : index
    %33 = vector.load %arg5[%c9, %c0_20] : memref<16x128xf32, #tpu.memory_space<vmem>>, vector<1x128xf32>
    %34 = vector.broadcast %33 : vector<1x128xf32> to vector<16x128xf32>
    %35 = arith.addf %32, %34 : vector<16x128xf32>
    %36 = arith.truncf %35 : vector<16x128xf32> to vector<16x128xbf16>
    %cst_21 = arith.constant dense<0.000000e+00> : vector<16x128xf32>
    %37 = tpu.matmul %2, %36, %cst_21 {dimension_numbers = #tpu.dot_dimension_numbers<[1], [0], [0], [1], [0, 0, 1, 1], [], []>} : vector<16x16xbf16>, vector<16x128xbf16>, vector<16x128xf32> -> vector<16x128xf32>
    %38 = arith.addf %35, %37 : vector<16x128xf32>
    %c768 = arith.constant 768 : index
    %c0_22 = arith.constant 0 : index
    %39 = vector.load %arg3[%c768, %c0_22] : memref<1792x128xbf16, #tpu.memory_space<vmem>>, vector<128x128xbf16>
    %40 = arith.truncf %38 : vector<16x128xf32> to vector<16x128xbf16>
    %cst_23 = arith.constant dense<0.000000e+00> : vector<16x128xf32>
    %41 = tpu.matmul %40, %39, %cst_23 {dimension_numbers = #tpu.dot_dimension_numbers<[1], [0], [0], [1], [0, 0, 1, 1], [], []>} : vector<16x128xbf16>, vector<128x128xbf16>, vector<16x128xf32> -> vector<16x128xf32>
    %c1 = arith.constant 1 : index
    %c0_24 = arith.constant 0 : index
    %42 = vector.load %arg5[%c1, %c0_24] : memref<16x128xf32, #tpu.memory_space<vmem>>, vector<1x128xf32>
    %43 = vector.broadcast %42 : vector<1x128xf32> to vector<16x128xf32>
    %44 = arith.addf %41, %43 : vector<16x128xf32>
    %cst_25 = arith.constant 0.000000e+00 : f32
    %45 = vector.broadcast %cst_25 : f32 to vector<16x128xf32>
    %46 = arith.maximumf %44, %45 : vector<16x128xf32>
    %c1152 = arith.constant 1152 : index
    %c0_26 = arith.constant 0 : index
    %47 = vector.load %arg3[%c1152, %c0_26] : memref<1792x128xbf16, #tpu.memory_space<vmem>>, vector<128x128xbf16>
    %48 = arith.truncf %46 : vector<16x128xf32> to vector<16x128xbf16>
    %cst_27 = arith.constant dense<0.000000e+00> : vector<16x128xf32>
    %49 = tpu.matmul %48, %47, %cst_27 {dimension_numbers = #tpu.dot_dimension_numbers<[1], [0], [0], [1], [0, 0, 1, 1], [], []>} : vector<16x128xbf16>, vector<128x128xbf16>, vector<16x128xf32> -> vector<16x128xf32>
    %c4 = arith.constant 4 : index
    %c0_28 = arith.constant 0 : index
    %50 = vector.load %arg5[%c4, %c0_28] : memref<16x128xf32, #tpu.memory_space<vmem>>, vector<1x128xf32>
    %51 = vector.broadcast %50 : vector<1x128xf32> to vector<16x128xf32>
    %52 = arith.addf %49, %51 : vector<16x128xf32>
    %cst_29 = arith.constant 0.000000e+00 : f32
    %53 = vector.broadcast %cst_29 : f32 to vector<16x128xf32>
    %54 = arith.maximumf %52, %53 : vector<16x128xf32>
    %c7 = arith.constant 7 : index
    %c0_30 = arith.constant 0 : index
    %55 = vector.load %arg5[%c7, %c0_30] : memref<16x128xf32, #tpu.memory_space<vmem>>, vector<1x128xf32>
    %56 = vector.broadcast %55 : vector<1x128xf32> to vector<16x128xf32>
    %57 = arith.mulf %54, %56 : vector<16x128xf32>
    %c10 = arith.constant 10 : index
    %c0_31 = arith.constant 0 : index
    %58 = vector.load %arg5[%c10, %c0_31] : memref<16x128xf32, #tpu.memory_space<vmem>>, vector<1x128xf32>
    %59 = vector.broadcast %58 : vector<1x128xf32> to vector<16x128xf32>
    %60 = arith.addf %57, %59 : vector<16x128xf32>
    %61 = arith.truncf %60 : vector<16x128xf32> to vector<16x128xbf16>
    %cst_32 = arith.constant dense<0.000000e+00> : vector<16x128xf32>
    %62 = tpu.matmul %2, %61, %cst_32 {dimension_numbers = #tpu.dot_dimension_numbers<[1], [0], [0], [1], [0, 0, 1, 1], [], []>} : vector<16x16xbf16>, vector<16x128xbf16>, vector<16x128xf32> -> vector<16x128xf32>
    %63 = arith.addf %60, %62 : vector<16x128xf32>
    %c896 = arith.constant 896 : index
    %c0_33 = arith.constant 0 : index
    %64 = vector.load %arg3[%c896, %c0_33] : memref<1792x128xbf16, #tpu.memory_space<vmem>>, vector<128x128xbf16>
    %65 = arith.truncf %63 : vector<16x128xf32> to vector<16x128xbf16>
    %cst_34 = arith.constant dense<0.000000e+00> : vector<16x128xf32>
    %66 = tpu.matmul %65, %64, %cst_34 {dimension_numbers = #tpu.dot_dimension_numbers<[1], [0], [0], [1], [0, 0, 1, 1], [], []>} : vector<16x128xbf16>, vector<128x128xbf16>, vector<16x128xf32> -> vector<16x128xf32>
    %c2 = arith.constant 2 : index
    %c0_35 = arith.constant 0 : index
    %67 = vector.load %arg5[%c2, %c0_35] : memref<16x128xf32, #tpu.memory_space<vmem>>, vector<1x128xf32>
    %68 = vector.broadcast %67 : vector<1x128xf32> to vector<16x128xf32>
    %69 = arith.addf %66, %68 : vector<16x128xf32>
    %cst_36 = arith.constant 0.000000e+00 : f32
    %70 = vector.broadcast %cst_36 : f32 to vector<16x128xf32>
    %71 = arith.maximumf %69, %70 : vector<16x128xf32>
    %c1280 = arith.constant 1280 : index
    %c0_37 = arith.constant 0 : index
    %72 = vector.load %arg3[%c1280, %c0_37] : memref<1792x128xbf16, #tpu.memory_space<vmem>>, vector<128x128xbf16>
    %73 = arith.truncf %71 : vector<16x128xf32> to vector<16x128xbf16>
    %cst_38 = arith.constant dense<0.000000e+00> : vector<16x128xf32>
    %74 = tpu.matmul %73, %72, %cst_38 {dimension_numbers = #tpu.dot_dimension_numbers<[1], [0], [0], [1], [0, 0, 1, 1], [], []>} : vector<16x128xbf16>, vector<128x128xbf16>, vector<16x128xf32> -> vector<16x128xf32>
    %c5 = arith.constant 5 : index
    %c0_39 = arith.constant 0 : index
    %75 = vector.load %arg5[%c5, %c0_39] : memref<16x128xf32, #tpu.memory_space<vmem>>, vector<1x128xf32>
    %76 = vector.broadcast %75 : vector<1x128xf32> to vector<16x128xf32>
    %77 = arith.addf %74, %76 : vector<16x128xf32>
    %cst_40 = arith.constant 0.000000e+00 : f32
    %78 = vector.broadcast %cst_40 : f32 to vector<16x128xf32>
    %79 = arith.maximumf %77, %78 : vector<16x128xf32>
    %c8 = arith.constant 8 : index
    %c0_41 = arith.constant 0 : index
    %80 = vector.load %arg5[%c8, %c0_41] : memref<16x128xf32, #tpu.memory_space<vmem>>, vector<1x128xf32>
    %81 = vector.broadcast %80 : vector<1x128xf32> to vector<16x128xf32>
    %82 = arith.mulf %79, %81 : vector<16x128xf32>
    %c11 = arith.constant 11 : index
    %c0_42 = arith.constant 0 : index
    %83 = vector.load %arg5[%c11, %c0_42] : memref<16x128xf32, #tpu.memory_space<vmem>>, vector<1x128xf32>
    %84 = vector.broadcast %83 : vector<1x128xf32> to vector<16x128xf32>
    %85 = arith.addf %82, %84 : vector<16x128xf32>
    %c12 = arith.constant 12 : index
    %c0_43 = arith.constant 0 : index
    %86 = vector.load %arg5[%c12, %c0_43] : memref<16x128xf32, #tpu.memory_space<vmem>>, vector<1x128xf32>
    %c1408 = arith.constant 1408 : index
    %c0_44 = arith.constant 0 : index
    %87 = vector.load %arg3[%c1408, %c0_44] : memref<1792x128xbf16, #tpu.memory_space<vmem>>, vector<128x128xbf16>
    %88 = arith.truncf %35 : vector<16x128xf32> to vector<16x128xbf16>
    %cst_45 = arith.constant dense<0.000000e+00> : vector<16x128xf32>
    %89 = tpu.matmul %88, %87, %cst_45 {dimension_numbers = #tpu.dot_dimension_numbers<[1], [0], [0], [1], [0, 0, 1, 1], [], []>} : vector<16x128xbf16>, vector<128x128xbf16>, vector<16x128xf32> -> vector<16x128xf32>
    %90 = vector.broadcast %86 : vector<1x128xf32> to vector<16x128xf32>
    %91 = arith.addf %90, %89 : vector<16x128xf32>
    %c1536 = arith.constant 1536 : index
    %c0_46 = arith.constant 0 : index
    %92 = vector.load %arg3[%c1536, %c0_46] : memref<1792x128xbf16, #tpu.memory_space<vmem>>, vector<128x128xbf16>
    %93 = arith.truncf %60 : vector<16x128xf32> to vector<16x128xbf16>
    %cst_47 = arith.constant dense<0.000000e+00> : vector<16x128xf32>
    %94 = tpu.matmul %93, %92, %cst_47 {dimension_numbers = #tpu.dot_dimension_numbers<[1], [0], [0], [1], [0, 0, 1, 1], [], []>} : vector<16x128xbf16>, vector<128x128xbf16>, vector<16x128xf32> -> vector<16x128xf32>
    %95 = arith.addf %91, %94 : vector<16x128xf32>
    %c1664 = arith.constant 1664 : index
    %c0_48 = arith.constant 0 : index
    %96 = vector.load %arg3[%c1664, %c0_48] : memref<1792x128xbf16, #tpu.memory_space<vmem>>, vector<128x128xbf16>
    %97 = arith.truncf %85 : vector<16x128xf32> to vector<16x128xbf16>
    %cst_49 = arith.constant dense<0.000000e+00> : vector<16x128xf32>
    %98 = tpu.matmul %97, %96, %cst_49 {dimension_numbers = #tpu.dot_dimension_numbers<[1], [0], [0], [1], [0, 0, 1, 1], [], []>} : vector<16x128xbf16>, vector<128x128xbf16>, vector<16x128xf32> -> vector<16x128xf32>
    %99 = arith.addf %95, %98 : vector<16x128xf32>
    %cst_50 = arith.constant 2.000000e+01 : f32
    %100 = vector.broadcast %cst_50 : f32 to vector<16x128xf32>
    %101 = arith.cmpf ogt, %99, %100 : vector<16x128xf32>
    %cst_51 = arith.constant 2.000000e+01 : f32
    %102 = vector.broadcast %cst_51 : f32 to vector<16x128xf32>
    %103 = arith.minimumf %99, %102 : vector<16x128xf32>
    %104 = math.exp %103 : vector<16x128xf32>
    %105 = math.log1p %104 : vector<16x128xf32>
    %106 = arith.select %101, %99, %105 : vector<16x128xi1>, vector<16x128xf32>
    %cst_52 = arith.constant 0.693147182 : f32
    %107 = vector.broadcast %cst_52 : f32 to vector<16x128xf32>
    %108 = arith.subf %106, %107 : vector<16x128xf32>
    %c1536_53 = arith.constant 1536 : index
    %c0_54 = arith.constant 0 : index
    %109 = vector.load %arg4[%c1536_53, %c0_54] : memref<1664x768xbf16, #tpu.memory_space<vmem>>, vector<128x768xbf16>
    %110 = arith.truncf %108 : vector<16x128xf32> to vector<16x128xbf16>
    %cst_55 = arith.constant dense<0.000000e+00> : vector<16x768xf32>
    %111 = tpu.matmul %110, %109, %cst_55 {dimension_numbers = #tpu.dot_dimension_numbers<[1], [0], [0], [1], [0, 0, 1, 1], [], []>} : vector<16x128xbf16>, vector<128x768xbf16>, vector<16x768xf32> -> vector<16x768xf32>
    %c1_56 = arith.constant 1 : index
    %c0_57 = arith.constant 0 : index
    %112 = vector.load %arg6[%c1_56, %c0_57] : memref<2x768xf32, #tpu.memory_space<vmem>>, vector<1x768xf32>
    %113 = vector.broadcast %112 : vector<1x768xf32> to vector<16x768xf32>
    %114 = arith.addf %111, %113 : vector<16x768xf32>
    %c0_58 = arith.constant 0 : index
    %c0_59 = arith.constant 0 : index
    %115 = vector.load %arg2[%c0_58, %c0_59] : memref<2x16xf32, #tpu.memory_space<vmem>>, vector<2x16xf32>
    %cst_60 = arith.constant dense<0.000000e+00> : vector<2x768xf32>
    %116 = tpu.matmul %115, %114, %cst_60 {dimension_numbers = #tpu.dot_dimension_numbers<[1], [0], [0], [1], [0, 0, 1, 1], [], []>} : vector<2x16xf32>, vector<16x768xf32>, vector<2x768xf32> -> vector<2x768xf32>
    %c0_61 = arith.constant 0 : index
    %c0_62 = arith.constant 0 : index
    %117 = vector.load %arg8[%c0_61, %c0_62] : memref<2x768xf32, #tpu.memory_space<vmem>>, vector<2x768xf32>
    tpu.vector_store %arg8[%c0_61, %c0_62], %116 {strides = array<i32>} : memref<2x768xf32, #tpu.memory_space<vmem>>, vector<2x768xf32>,
    %118 = arith.addf %114, %1 : vector<16x768xf32>
    %c0_63 = arith.constant 0 : index
    %c0_64 = arith.constant 0 : index
    %119 = vector.load %arg7[%c0_63, %c0_64] : memref<16x768xf32, #tpu.memory_space<vmem>>, vector<16x768xf32>
    tpu.vector_store %arg7[%c0_63, %c0_64], %118 {strides = array<i32>} : memref<16x768xf32, #tpu.memory_space<vmem>>, vector<16x768xf32>,
    return
  }
}

</mosaic_0001>

<bundles_post_ra>
// kernel: tpu_custom_call.1
= control target key start
LH: loop header
LB: loop body
LE: loop exit
PB: predicated region body
PF: predicated region fallthrough
CT: control target
= control target key end

     0   :  { %14 = vsyncpa [#allocation3], 0  ;;  %s9773_s0 = inlined_call_operand.hbm [shape: f32[16,1536], index: 0, kind: input, shape index: {}]   ;;  %s9774_s1 = inlined_call_operand.hbm [shape: bf16[16,16], index: 1, kind: input, shape index: {}]   ;;  %s9775_s2 = inlined_call_operand.hbm [shape: f32[2,16], index: 2, kind: input, shape index: {}]   ;;  %s9776_s3 = inlined_call_operand.hbm [shape: bf16[1792,128], index: 3, kind: input, shape index: {}]   ;;  %s9777_s4 = inlined_call_operand.hbm [shape: bf16[1664,768], index: 4, kind: input, shape index: {}]   ;;  %s9778_s5 = inlined_call_operand.hbm [shape: f32[16,128], index: 5, kind: input, shape index: {}]   ;;  %s9779_s6 = inlined_call_operand.hbm [shape: f32[2,768], index: 6, kind: input, shape index: {}]   ;;  %s9780_s7 = inlined_call_operand.hbm [shape: f32[16,768], index: 7, kind: output, shape index: {0}]   ;;  %s9781_s8 = inlined_call_operand.hbm [shape: f32[2,768], index: 8, kind: output, shape index: {1}]  }
   0x1   :  { %15 = vsyncpa [#allocation6], 0 }
   0x2   :  { %16 = vsyncpa [#allocation9], 0 }
   0x3   :  { %17 = vsyncpa [#allocation12], 0 }
   0x4   :  { %18 = vsyncpa [#allocation4], 0 }
   0x5   :  { %19 = vsyncpa [#allocation16], 0  ;;  %s9282_s27 = smov [#allocation5]  }
   0x6   :  { %s37_s28 = sshll.u32 %s9282_s27, 4  ;;  %s38_s28 = int_to_ptr.vmem [resolvable:$true] %s37_s28 }
   0x7   :  { %s9098_s29 = scalar_lea.vmem %s38_s28, 128  ;;  %p9103_p1 = scmp.lt.s32.totalorder %s38_s28, %s38_s28 }
   0x8   :  { %p9099_p0 = scmp.ne.s32.totalorder %s38_s28, %s9098_s29  ;;  %p9104_p2 = scmp.lt.s32.totalorder %s9098_s29, %s9098_s29 }
   0xa   :  { %p9105_p3 = por %p9104_p2, %p9103_p1 }
   0xc   :  { %p9106_p4 = pnand %p9105_p3, %p9099_p0 }
   0xe   :  { %9109 = shalt.err (!%p9106_p4)
}
   0xf   :  { %s9283_s30 = smov 64   ;;  %s9284_s9 = smov 4  }
  0x10   :  { %43 = dma.hbm_to_vmem [thread:$0]  %s9774_s1, 128, %s38_s28, [#allocation6], %s9283_s30, %s9283_s30, %s9284_s9  }
  0x11   :  { %s9285_s12 = smov [#allocation8]   ;;  %s9286_s14 = smov [#allocation11]  }
  0x12   :  { %s59_s13 = sshll.u32 %s9285_s12, 4  ;;  %s83_s15 = sshll.u32 %s9286_s14, 4  ;;  %s60_s13 = int_to_ptr.vmem [resolvable:$true] %s59_s13  ;;  %s84_s15 = int_to_ptr.vmem [resolvable:$true] %s83_s15 }
  0x13   :  { %s9118_s16 = scalar_lea.vmem %s60_s13, 14336  ;;  %p9123_p6 = scmp.lt.s32.totalorder %s60_s13, %s60_s13 }
  0x14   :  { %p9119_p5 = scmp.ne.s32.totalorder %s60_s13, %s9118_s16  ;;  %p9124_p7 = scmp.lt.s32.totalorder %s9118_s16, %s9118_s16 }
  0x16   :  { %p9125_p8 = por %p9124_p7, %p9123_p6 }
  0x18   :  { %p9126_p9 = pnand %p9125_p8, %p9119_p5 }
  0x1a   :  { %9129 = shalt.err (!%p9126_p9)
}
  0x1b   :  { %65 = dma.hbm_to_vmem [thread:$0]  %s9776_s3, 14336, %s60_s13, [#allocation9], %s9283_s30, %s9283_s30, %s9284_s9  }
  0x1c   :  { %s9138_s19 = scalar_lea.vmem %s84_s15, 256  ;;  %p9143_p11 = scmp.lt.s32.totalorder %s84_s15, %s84_s15 }
  0x1d   :  { %p9139_p10 = scmp.ne.s32.totalorder %s84_s15, %s9138_s19  ;;  %p9144_p12 = scmp.lt.s32.totalorder %s9138_s19, %s9138_s19 }
  0x1f   :  { %p9145_p13 = por %p9144_p12, %p9143_p11 }
  0x21   :  { %p9146_p0 = pnand %p9145_p13, %p9139_p10 }
  0x23   :  { %9149 = shalt.err (!%p9146_p0)
}
  0x24   :  { %s9287_s1 = smov 128   ;;  %s9288_s20 = smov 8  }
  0x25   :  { %89 = dma.hbm_to_vmem [thread:$0]  %s9778_s5, 256, %s84_s15, [#allocation12], %s9287_s1, %s9287_s1, %s9288_s20  }
  0x26   :  { %s9289_s23 = smov [#allocation2]  }
  0x27   :  { %s25_s24 = sshll.u32 %s9289_s23, 4  ;;  %s26_s24 = int_to_ptr.vmem [resolvable:$true] %s25_s24 }
  0x28   :  { %s9158_s25 = scalar_lea.vmem %s26_s24, 3072  ;;  %p9163_p2 = scmp.lt.s32.totalorder %s26_s24, %s26_s24 }
  0x29   :  { %p9159_p1 = scmp.ne.s32.totalorder %s26_s24, %s9158_s25  ;;  %p9164_p3 = scmp.lt.s32.totalorder %s9158_s25, %s9158_s25 }
  0x2b   :  { %p9165_p4 = por %p9164_p3, %p9163_p2 }
  0x2d   :  { %p9166_p5 = pnand %p9165_p4, %p9159_p1 }
  0x2f   :  { %9169 = shalt.err (!%p9166_p5)
}
  0x30   :  { %s9290_s3 = smov 1536   ;;  %s9291_s26 = smov 96  }
  0x31   :  { %31 = dma.hbm_to_vmem [thread:$0]  %s9773_s0, 3072, %s26_s24, [#allocation3], %s9290_s3, %s9290_s3, %s9291_s26  }
  0x32   :  { %s9292_s29 = smov [#allocation7]   ;;  %s9293_s9 = smov [#allocation10]  }
  0x33   :  { %s50_s30 = sshll.u32 %s9292_s29, 4  ;;  %s71_s5 = sshll.u32 %s9293_s9, 4  ;;  %s51_s30 = int_to_ptr.vmem [resolvable:$true] %s50_s30  ;;  %s72_s5 = int_to_ptr.vmem [resolvable:$true] %s71_s5 }
  0x34   :  { %s9178_s10 = scalar_lea.vmem %s51_s30, 32  ;;  %p9183_p7 = scmp.lt.s32.totalorder %s51_s30, %s51_s30 }
  0x35   :  { %p9179_p6 = scmp.ne.s32.totalorder %s51_s30, %s9178_s10  ;;  %p9184_p8 = scmp.lt.s32.totalorder %s9178_s10, %s9178_s10 }
  0x37   :  { %p9185_p9 = por %p9184_p8, %p9183_p7 }
  0x39   :  { %p9186_p10 = pnand %p9185_p9, %p9179_p6 }
  0x3b   :  { %9189 = shalt.err (!%p9186_p10)
}
  0x3c   :  { %53 = dma.hbm_to_vmem [thread:$0]  %s9775_s2, 32, %s51_s30, [#allocation6]  }
  0x3d   :  { %s9198_s13 = scalar_lea.vmem %s72_s5, 79872  ;;  %p9203_p12 = scmp.lt.s32.totalorder %s72_s5, %s72_s5 }
  0x3e   :  { %p9199_p11 = scmp.ne.s32.totalorder %s72_s5, %s9198_s13  ;;  %p9204_p13 = scmp.lt.s32.totalorder %s9198_s13, %s9198_s13 }
  0x40   :  { %p9205_p0 = por %p9204_p13, %p9203_p12 }
  0x42   :  { %p9206_p1 = pnand %p9205_p0, %p9199_p11 }
  0x44   :  { %9209 = shalt.err (!%p9206_p1)
}
  0x45   :  { %s9294_s0 = smov 384   ;;  %s9295_s14 = smov 24  }
  0x46   :  { %77 = dma.hbm_to_vmem [thread:$0]  %s9777_s4, 79872, %s72_s5, [#allocation9], %s9294_s0, %s9294_s0, %s9295_s14  }
  0x47   :  { %s9296_s17 = smov [#allocation13]  }
  0x48   :  { %s96_s18 = sshll.u32 %s9296_s17, 4  ;;  %s97_s18 = int_to_ptr.vmem [resolvable:$true] %s96_s18 }
  0x49   :  { %s9218_s19 = scalar_lea.vmem %s97_s18, 192  ;;  %p9223_p3 = scmp.lt.s32.totalorder %s97_s18, %s97_s18 }
  0x4a   :  { %p9219_p2 = scmp.ne.s32.totalorder %s97_s18, %s9218_s19  ;;  %p9224_p4 = scmp.lt.s32.totalorder %s9218_s19, %s9218_s19 }
  0x4c   :  { %p9225_p5 = por %p9224_p4, %p9223_p3 }
  0x4e   :  { %p9226_p6 = pnand %p9225_p5, %p9219_p2 }
  0x50   :  { %9229 = shalt.err (!%p9226_p6)
}
  0x51   :  { %99 = dma.hbm_to_vmem [thread:$0]  %s9779_s6, 192, %s97_s18, [#allocation12]  }
  0x52   :  { %9270 = dma.done.wait [#allocation3], 3072  }
  0x53   :  { %9271 = vsyncadd [#allocation3], 4294964224 }
  0x54   :  { %9272 = dma.done.wait [#allocation6], 160  }
  0x55   :  { %9273 = vsyncadd [#allocation6], 4294967136 }
  0x56   :  { %9274 = dma.done.wait [#allocation9], 94208  }
  0x57   :  { %9275 = vsyncadd [#allocation9], 4294873088 }
  0x58   :  { %9276 = dma.done.wait [#allocation12], 448  }
  0x59   :  { %9277 = vsyncadd [#allocation12], 4294966848  ;;  %v8021_v0 = vld [vmem:[#allocation10 + $0x154] ss:$24 sps:$4 sm:$0xff]   ;;  %v8025_v2 = vld [vmem:[#allocation10 + $0x150] ss:$24 sps:$4 sm:$0xff]  }
  0x5a   :  { %v8023_v1 = vld [vmem:[#allocation10 + $0x454] ss:$24 sps:$4 sm:$0xff]   ;;  %3648 = vmatprep.subr.bf16.mxu0 %v8021_v0  ;;  %v8026_v3 = vld [vmem:[#allocation10 + $0x450] ss:$24 sps:$4 sm:$0xff]   ;;  %v8027_v4 = vld [vmem:[#allocation10 + $0x124] ss:$24 sps:$4 sm:$0xff]  }
  0x5b   :  { %3691 = vmatprep.subr.bf16.mxu1 %v8023_v1  ;;  %3649 = vmatpush1.bf16.msra.mxu0 %v8025_v2  ;;  %v8029_v5 = vld [vmem:[#allocation10 + $0x424] ss:$24 sps:$4 sm:$0xff]   ;;  %v8031_v6 = vld [vmem:[#allocation10 + $0x120] ss:$24 sps:$4 sm:$0xff]   ;;  %v8033_v8 = vld [vmem:[#allocation10 + $0xf4] ss:$24 sps:$4 sm:$0xff]  }
  0x5c   :  { %3692 = vmatpush1.bf16.msra.mxu1 %v8026_v3  ;;  %3650 = vmatprep.subr.bf16.mxu0 %v8027_v4  ;;  %v8032_v7 = vld [vmem:[#allocation10 + $0x420] ss:$24 sps:$4 sm:$0xff]   ;;  %v8035_v9 = vld [vmem:[#allocation10 + $0x3f4] ss:$24 sps:$4 sm:$0xff]   ;;  %v8037_v10 = vld [vmem:[#allocation10 + $0xf0] ss:$24 sps:$4 sm:$0xff]  }
  0x5d   :  { %3693 = vmatprep.subr.bf16.mxu1 %v8029_v5  ;;  %v8038_v11 = vld [vmem:[#allocation10 + $0x3f0] ss:$24 sps:$4 sm:$0xff]   ;;  %v8039_v12 = vld [vmem:[#allocation10 + $0xc4] ss:$24 sps:$4 sm:$0xff]   ;;  %v8043_v14 = vld [vmem:[#allocation10 + $0xc0] ss:$24 sps:$4 sm:$0xff]  }
  0x5e   :  { %v8041_v13 = vld [vmem:[#allocation10 + $0x3c4] ss:$24 sps:$4 sm:$0xff]   ;;  %v8044_v15 = vld [vmem:[#allocation10 + $0x3c0] ss:$24 sps:$4 sm:$0xff]   ;;  %v8045_v16 = vld [vmem:[#allocation10 + $0x94] ss:$24 sps:$4 sm:$0xff]  }
  0x5f   :  { %3651 = vmatpush1.bf16.msra.mxu0 %v8031_v6  ;;  %v8047_v17 = vld [vmem:[#allocation10 + $0x394] ss:$24 sps:$4 sm:$0xff]   ;;  %v8049_v18 = vld [vmem:[#allocation10 + $0x90] ss:$24 sps:$4 sm:$0xff]   ;;  %v8051_v20 = vld [vmem:[#allocation10 + $0x64] ss:$24 sps:$4 sm:$0xff]  }
  0x60   :  { %3694 = vmatpush1.bf16.msra.mxu1 %v8032_v7  ;;  %3652 = vmatprep.subr.bf16.mxu0 %v8033_v8  ;;  %v8050_v19 = vld [vmem:[#allocation10 + $0x390] ss:$24 sps:$4 sm:$0xff]   ;;  %v8053_v21 = vld [vmem:[#allocation10 + $0x364] ss:$24 sps:$4 sm:$0xff]   ;;  %v8055_v22 = vld [vmem:[#allocation10 + $0x60] ss:$24 sps:$4 sm:$0xff]  }
  0x61   :  { %3695 = vmatprep.subr.bf16.mxu1 %v8035_v9  ;;  %v8056_v23 = vld [vmem:[#allocation10 + $0x360] ss:$24 sps:$4 sm:$0xff]   ;;  %v8057_v24 = vld [vmem:[#allocation10 + $0x34] ss:$24 sps:$4 sm:$0xff]   ;;  %v8061_v26 = vld [vmem:[#allocation10 + $0x30] ss:$24 sps:$4 sm:$0xff]  }
  0x62   :  { %v8059_v25 = vld [vmem:[#allocation10 + $0x334] ss:$24 sps:$4 sm:$0xff]   ;;  %v8062_v27 = vld [vmem:[#allocation10 + $0x330] ss:$24 sps:$4 sm:$0xff]   ;;  %v8063_v28 = vld [vmem:[#allocation10 + $0x4] ss:$24 sps:$4 sm:$0xff]  }
  0x63   :  { %3653 = vmatpush1.bf16.msra.mxu0 %v8037_v10  ;;  %v8065_v29 = vld [vmem:[#allocation10 + $0x304] ss:$24 sps:$4 sm:$0xff]   ;;  %v8067_v30 = vld [vmem:[#allocation10] ss:$24 sps:$4 sm:$0xff]   ;;  %v8069_v32 = vld [vmem:[#allocation10 + $0x2d4] ss:$24 sps:$4 sm:$0xff]  }
  0x64   :  { %3696 = vmatpush1.bf16.msra.mxu1 %v8038_v11  ;;  %3654 = vmatprep.subr.bf16.mxu0 %v8039_v12  ;;  %v8068_v31 = vld [vmem:[#allocation10 + $0x300] ss:$24 sps:$4 sm:$0xff]   ;;  %v8071_v33 = vld [vmem:[#allocation10 + $0x5d4] ss:$24 sps:$4 sm:$0xff]   ;;  %v8073_v34 = vld [vmem:[#allocation10 + $0x2d0] ss:$24 sps:$4 sm:$0xff]  }
  0x65   :  { %3697 = vmatprep.subr.bf16.mxu1 %v8041_v13  ;;  %v8074_v35 = vld [vmem:[#allocation10 + $0x5d0] ss:$24 sps:$4 sm:$0xff]   ;;  %v8075_v36 = vld [vmem:[#allocation10 + $0x2a4] ss:$24 sps:$4 sm:$0xff]   ;;  %v8079_v38 = vld [vmem:[#allocation10 + $0x2a0] ss:$24 sps:$4 sm:$0xff]  }
  0x66   :  { %v8077_v37 = vld [vmem:[#allocation10 + $0x5a4] ss:$24 sps:$4 sm:$0xff]   ;;  %v8080_v39 = vld [vmem:[#allocation10 + $0x5a0] ss:$24 sps:$4 sm:$0xff]   ;;  %v8081_v40 = vld [vmem:[#allocation10 + $0x274] ss:$24 sps:$4 sm:$0xff]  }
  0x67   :  { %3655 = vmatpush1.bf16.msra.mxu0 %v8043_v14  ;;  %v8083_v41 = vld [vmem:[#allocation10 + $0x574] ss:$24 sps:$4 sm:$0xff]   ;;  %v8085_v42 = vld [vmem:[#allocation10 + $0x270] ss:$24 sps:$4 sm:$0xff]   ;;  %v8087_v44 = vld [vmem:[#allocation10 + $0x244] ss:$24 sps:$4 sm:$0xff]  }
  0x68   :  { %3698 = vmatpush1.bf16.msra.mxu1 %v8044_v15  ;;  %3656 = vmatprep.subr.bf16.mxu0 %v8045_v16  ;;  %v8086_v43 = vld [vmem:[#allocation10 + $0x570] ss:$24 sps:$4 sm:$0xff]   ;;  %v8089_v45 = vld [vmem:[#allocation10 + $0x544] ss:$24 sps:$4 sm:$0xff]   ;;  %v8091_v50 = vld [vmem:[#allocation10 + $0x240] ss:$24 sps:$4 sm:$0xff]  }
  0x69   :  { %3699 = vmatprep.subr.bf16.mxu1 %v8047_v17  ;;  %v123_v46 = vld [vmem:[#allocation2 + $0x8] sm:$0xff]  ;;  %v125_v48 = vld [vmem:[#allocation2 + $0x18] sm:$0xff]  ;;  %v122_v6 = vld [vmem:[#allocation2] sm:$0xff]  ;;  %vm4445_vm0 = vcmask 130048   ;;  %vm9299_vm1 = vmmov 0   ;;  %s9300_s4 = smov [#allocation14]  }
  0x6a   :  { %v135_v47 = vld [vmem:[#allocation2 + $0x68] sm:$0xff]  ;;  %v137_v49 = vld [vmem:[#allocation2 + $0x78] sm:$0xff]  ;;  %v134_v7 = vld [vmem:[#allocation2 + $0x60] sm:$0xff]  ;;  %s6894_s6 = sshll.u32 %s9300_s4, 4  ;;  %s6895_s6 = int_to_ptr.vmem [resolvable:$true] %s6894_s6 }
  0x6b   :  { %3657 = vmatpush1.bf16.msra.mxu0 %v8049_v18  ;;  %v8092_v51 = vld [vmem:[#allocation10 + $0x540] ss:$24 sps:$4 sm:$0xff]   ;;  %v8093_v52 = vld [vmem:[#allocation10 + $0x214] ss:$24 sps:$4 sm:$0xff]   ;;  %v9371_v53 = vpack.c.bf16 %v135_v47, %v123_v46  ;;  %v9373_v54 = vpack.c.bf16 %v137_v49, %v125_v48  ;;  %v8097_v56 = vld [vmem:[#allocation10 + $0x210] ss:$24 sps:$4 sm:$0xff]   ;;  %v9377_v12 = vpack.c.bf16 %v134_v7, %v122_v6  ;;  %p9235_p8 = scmp.lt.s32.totalorder %s6895_s6, %s6895_s6 }
  0x6c   :  { %3700 = vmatpush1.bf16.msra.mxu1 %v8050_v19  ;;  %3658 = vmatprep.subr.bf16.mxu0 %v8051_v20  ;;  %v8095_v55 = vld [vmem:[#allocation10 + $0x514] ss:$24 sps:$4 sm:$0xff]   ;;  %v8098_v57 = vld [vmem:[#allocation10 + $0x510] ss:$24 sps:$4 sm:$0xff]   ;;  %v8099_v58 = vld [vmem:[#allocation10 + $0x1e4] ss:$24 sps:$4 sm:$0xff]  }
  0x6d   :  { %3701 = vmatprep.subr.bf16.mxu1 %v8053_v21  ;;  %3680 = vmatprep.mubr.bf16.mxu0 %v9371_v53  ;;  %v8101_v59 = vld [vmem:[#allocation10 + $0x4e4] ss:$24 sps:$4 sm:$0xff]   ;;  %v8103_v60 = vld [vmem:[#allocation10 + $0x1e0] ss:$24 sps:$4 sm:$0xff]   ;;  %v8105_v62 = vld [vmem:[#allocation10 + $0x1b4] ss:$24 sps:$4 sm:$0xff]  }
  0x6e   :  { %3723 = vmatprep.mubr.bf16.mxu1 %v9373_v54  ;;  %v8104_v61 = vld [vmem:[#allocation10 + $0x4e0] ss:$24 sps:$4 sm:$0xff]   ;;  %v8107_v63 = vld [vmem:[#allocation10 + $0x4b4] ss:$24 sps:$4 sm:$0xff]   ;;  %v8109_v0 = vld [vmem:[#allocation10 + $0x1b0] ss:$24 sps:$4 sm:$0xff]  }
  0x6f   :  { %3659 = vmatpush1.bf16.msra.mxu0 %v8055_v22  ;;  %v8110_v1 = vld [vmem:[#allocation10 + $0x4b0] ss:$24 sps:$4 sm:$0xff]   ;;  %v8111_v2 = vld [vmem:[#allocation10 + $0x184] ss:$24 sps:$4 sm:$0xff]   ;;  %v8115_v4 = vld [vmem:[#allocation10 + $0x180] ss:$24 sps:$4 sm:$0xff]  }
  0x70   :  { %3702 = vmatpush1.bf16.msra.mxu1 %v8056_v23  ;;  %3660 = vmatprep.subr.bf16.mxu0 %v8057_v24  ;;  %v8113_v3 = vld [vmem:[#allocation10 + $0x484] ss:$24 sps:$4 sm:$0xff]   ;;  %v8116_v5 = vld [vmem:[#allocation10 + $0x480] ss:$24 sps:$4 sm:$0xff]   ;;  %v8119_v10 = vld [vmem:[#allocation10 + $0x754] ss:$24 sps:$4 sm:$0xff]  }
  0x71   :  { %3703 = vmatprep.subr.bf16.mxu1 %v8059_v25  ;;  %v124_v8 = vld [vmem:[#allocation2 + $0x10] sm:$0xff]  ;;  %v8123_v18 = vld [vmem:[#allocation10 + $0x720] ss:$24 sps:$4 sm:$0xff]   ;;  %v141_v46 = vld [vmem:[#allocation2 + $0x98] sm:$0xff]  ;;  %s9230_s20 = scalar_lea.vmem %s6895_s6, 1536 }
  0x72   :  { %v136_v9 = vld [vmem:[#allocation2 + $0x70] sm:$0xff]  ;;  %v8126_v19 = vld [vmem:[#allocation10 + $0xa20] ss:$24 sps:$4 sm:$0xff]   ;;  %p9231_p7 = scmp.ne.s32.totalorder %s6895_s6, %s9230_s20  ;;  %p9236_p9 = scmp.lt.s32.totalorder %s9230_s20, %s9230_s20 }
  0x73   :  { %3661 = vmatpush1.bf16.msra.mxu0 %v8061_v26  ;;  %v8122_v11 = vld [vmem:[#allocation10 + $0xa54] ss:$24 sps:$4 sm:$0xff]   ;;  %v9379_v13 = vpack.c.bf16 %v136_v9, %v124_v8  ;;  %v8117_v14 = vld [vmem:[#allocation10 + $0x750] ss:$24 sps:$4 sm:$0xff]   ;;  %v8125_v16 = vld [vmem:[#allocation10 + $0x724] ss:$24 sps:$4 sm:$0xff]  }
  0x74   :  { %3704 = vmatpush1.bf16.msra.mxu1 %v8062_v27  ;;  %3662 = vmatprep.subr.bf16.mxu0 %v8063_v28  ;;  %v8120_v15 = vld [vmem:[#allocation10 + $0xa50] ss:$24 sps:$4 sm:$0xff]   ;;  %v8128_v17 = vld [vmem:[#allocation10 + $0xa24] ss:$24 sps:$4 sm:$0xff]   ;;  %v8131_v20 = vld [vmem:[#allocation10 + $0x6f4] ss:$24 sps:$4 sm:$0xff]   ;;  %p9237_p10 = por %p9236_p9, %p9235_p8 }
  0x75   :  { %3705 = vmatprep.subr.bf16.mxu1 %v8065_v29  ;;  %v8134_v21 = vld [vmem:[#allocation10 + $0x9f4] ss:$24 sps:$4 sm:$0xff]   ;;  %v8129_v22 = vld [vmem:[#allocation10 + $0x6f0] ss:$24 sps:$4 sm:$0xff]   ;;  %v8137_v24 = vld [vmem:[#allocation10 + $0x6c4] ss:$24 sps:$4 sm:$0xff]  }
  0x76   :  { %v8132_v23 = vld [vmem:[#allocation10 + $0x9f0] ss:$24 sps:$4 sm:$0xff]   ;;  %v8140_v25 = vld [vmem:[#allocation10 + $0x9c4] ss:$24 sps:$4 sm:$0xff]   ;;  %v8135_v26 = vld [vmem:[#allocation10 + $0x6c0] ss:$24 sps:$4 sm:$0xff]   ;;  %p9238_p11 = pnand %p9237_p10, %p9231_p7 }
  0x77   :  { %3663 = vmatpush1.bf16.msra.mxu0 %v8067_v30  ;;  %v8138_v27 = vld [vmem:[#allocation10 + $0x9c0] ss:$24 sps:$4 sm:$0xff]   ;;  %v8143_v28 = vld [vmem:[#allocation10 + $0x694] ss:$24 sps:$4 sm:$0xff]   ;;  %v8141_v30 = vld [vmem:[#allocation10 + $0x690] ss:$24 sps:$4 sm:$0xff]  }
  0x78   :  { %3706 = vmatpush1.bf16.msra.mxu1 %v8068_v31  ;;  %3664 = vmatprep.subr.bf16.mxu0 %v8069_v32  ;;  %v8146_v29 = vld [vmem:[#allocation10 + $0x994] ss:$24 sps:$4 sm:$0xff]   ;;  %v8144_v31 = vld [vmem:[#allocation10 + $0x990] ss:$24 sps:$4 sm:$0xff]   ;;  %v8149_v32 = vld [vmem:[#allocation10 + $0x664] ss:$24 sps:$4 sm:$0xff]  }
  0x79   :  { %3707 = vmatprep.subr.bf16.mxu1 %v8071_v33  ;;  %v8152_v33 = vld [vmem:[#allocation10 + $0x964] ss:$24 sps:$4 sm:$0xff]   ;;  %v8159_v48 = vld [vmem:[#allocation10 + $0x600] ss:$24 sps:$4 sm:$0xff]   ;;  %v8189_v6 = vld [vmem:[#allocation10 + $0x810] ss:$24 sps:$4 sm:$0xff]  }
  0x7a   :  { %v8162_v49 = vld [vmem:[#allocation10 + $0x900] ss:$24 sps:$4 sm:$0xff]   ;;  %v8192_v7 = vld [vmem:[#allocation10 + $0xb10] ss:$24 sps:$4 sm:$0xff]   ;;  %v8197_v8 = vld [vmem:[#allocation10 + $0x7e4] ss:$24 sps:$4 sm:$0xff]  }
  0x7b   :  { %3665 = vmatpush2.bf16.msra.mxu0 %v8073_v34  ;;  %v8147_v34 = vld [vmem:[#allocation10 + $0x660] ss:$24 sps:$4 sm:$0xff]   ;;  %v8200_v9 = vld [vmem:[#allocation10 + $0xae4] ss:$24 sps:$4 sm:$0xff]  }
  0x7c   :  { %3708 = vmatpush2.bf16.msra.mxu1 %v8074_v35  ;;  %3666 = vmatprep.subr.bf16.mxu0 %v8075_v36  ;;  %v8150_v35 = vld [vmem:[#allocation10 + $0x960] ss:$24 sps:$4 sm:$0xff]   ;;  %v8155_v36 = vld [vmem:[#allocation10 + $0x634] ss:$24 sps:$4 sm:$0xff]  }
  0x7d   :  { %3709 = vmatprep.subr.bf16.mxu1 %v8077_v37  ;;  %v8158_v37 = vld [vmem:[#allocation10 + $0x934] ss:$24 sps:$4 sm:$0xff]  }
  0x7f   :  { %3667 = vmatpush2.bf16.msra.mxu0 %v8079_v38  ;;  %v8153_v38 = vld [vmem:[#allocation10 + $0x630] ss:$24 sps:$4 sm:$0xff]  }
  0x80   :  { %3710 = vmatpush2.bf16.msra.mxu1 %v8080_v39  ;;  %3668 = vmatprep.subr.bf16.mxu0 %v8081_v40  ;;  %v8156_v39 = vld [vmem:[#allocation10 + $0x930] ss:$24 sps:$4 sm:$0xff]   ;;  %v127_v40 = vld [vmem:[#allocation2 + $0x28] sm:$0xff] }
  0x81   :  { %3711 = vmatprep.subr.bf16.mxu1 %v8083_v41  ;;  %v139_v41 = vld [vmem:[#allocation2 + $0x88] sm:$0xff] }
  0x83   :  { %3669 = vmatpush2.bf16.msra.mxu0 %v8085_v42  ;;  %v129_v42 = vld [vmem:[#allocation2 + $0x38] sm:$0xff] }
  0x84   :  { %3712 = vmatpush2.bf16.msra.mxu1 %v8086_v43  ;;  %3670 = vmatprep.subr.bf16.mxu0 %v8087_v44  ;;  %v8161_v43 = vld [vmem:[#allocation10 + $0x604] ss:$24 sps:$4 sm:$0xff]   ;;  %v9385_v47 = vpack.c.bf16 %v141_v46, %v129_v42  ;;  %v145_v42 = vld [vmem:[#allocation2 + $0xb8] sm:$0xff] }
  0x85   :  { %3713 = vmatprep.subr.bf16.mxu1 %v8089_v45  ;;  %v8164_v44 = vld [vmem:[#allocation10 + $0x904] ss:$24 sps:$4 sm:$0xff]   ;;  %v9383_v45 = vpack.c.bf16 %v139_v41, %v127_v40  ;;  %v133_v41 = vld [vmem:[#allocation2 + $0x58] sm:$0xff] }
  0x86   :  { %v9397_v46 = vpack.c.bf16 %v145_v42, %v133_v41  ;;  %v8303_v41 = vld [vmem:[#allocation10 + $0xd80] ss:$24 sps:$4 sm:$0xff]  }
  0x87   :  { %3671 = vmatpush2.bf16.msra.mxu0 %v8091_v50  ;;  %v8167_v50 = vld [vmem:[#allocation10 + $0x8d4] ss:$24 sps:$4 sm:$0xff]   ;;  %v8306_v42 = vld [vmem:[#allocation10 + $0x1080] ss:$24 sps:$4 sm:$0xff]  }
  0x88   :  { %3714 = vmatpush2.bf16.msra.mxu1 %v8092_v51  ;;  %3672 = vmatprep.subr.bf16.mxu0 %v8093_v52  ;;  %v8170_v51 = vld [vmem:[#allocation10 + $0xbd4] ss:$24 sps:$4 sm:$0xff]   ;;  %v8165_v52 = vld [vmem:[#allocation10 + $0x8d0] ss:$24 sps:$4 sm:$0xff]  }
  0x89   :  { %3715 = vmatprep.subr.bf16.mxu1 %v8095_v55  ;;  %v8168_v55 = vld [vmem:[#allocation10 + $0xbd0] ss:$24 sps:$4 sm:$0xff]  }
  0x8b   :  { %3673 = vmatpush2.bf16.msra.mxu0 %v8097_v56  ;;  %v8173_v56 = vld [vmem:[#allocation10 + $0x8a4] ss:$24 sps:$4 sm:$0xff]  }
  0x8c   :  { %3716 = vmatpush2.bf16.msra.mxu1 %v8098_v57  ;;  %3674 = vmatprep.subr.bf16.mxu0 %v8099_v58  ;;  %v8176_v57 = vld [vmem:[#allocation10 + $0xba4] ss:$24 sps:$4 sm:$0xff]   ;;  %v8171_v58 = vld [vmem:[#allocation10 + $0x8a0] ss:$24 sps:$4 sm:$0xff]  }
  0x8d   :  { %3717 = vmatprep.subr.bf16.mxu1 %v8101_v59  ;;  %v8174_v59 = vld [vmem:[#allocation10 + $0xba0] ss:$24 sps:$4 sm:$0xff]  }
  0x8f   :  { %3675 = vmatpush2.bf16.msra.mxu0 %v8103_v60  ;;  %v8179_v60 = vld [vmem:[#allocation10 + $0x874] ss:$24 sps:$4 sm:$0xff]  }
  0x90   :  { %3718 = vmatpush2.bf16.msra.mxu1 %v8104_v61  ;;  %3676 = vmatprep.subr.bf16.mxu0 %v8105_v62  ;;  %v8182_v61 = vld [vmem:[#allocation10 + $0xb74] ss:$24 sps:$4 sm:$0xff]   ;;  %v8177_v62 = vld [vmem:[#allocation10 + $0x870] ss:$24 sps:$4 sm:$0xff]  }
  0x91   :  { %3719 = vmatprep.subr.bf16.mxu1 %v8107_v63  ;;  %v8180_v63 = vld [vmem:[#allocation10 + $0xb70] ss:$24 sps:$4 sm:$0xff]  }
  0x93   :  { %3677 = vmatpush2.bf16.msra.mxu0 %v8109_v0  ;;  %v8185_v0 = vld [vmem:[#allocation10 + $0x844] ss:$24 sps:$4 sm:$0xff]  }
  0x94   :  { %3720 = vmatpush2.bf16.msra.mxu1 %v8110_v1  ;;  %3678 = vmatprep.subr.bf16.mxu0 %v8111_v2  ;;  %v8188_v1 = vld [vmem:[#allocation10 + $0xb44] ss:$24 sps:$4 sm:$0xff]   ;;  %v8183_v2 = vld [vmem:[#allocation10 + $0x840] ss:$24 sps:$4 sm:$0xff]  }
  0x95   :  { %3721 = vmatprep.subr.bf16.mxu1 %v8113_v3  ;;  %v8186_v3 = vld [vmem:[#allocation10 + $0xb40] ss:$24 sps:$4 sm:$0xff]  }
  0x97   :  { %3679 = vmatpush2.bf16.msra.mxu0 %v8115_v4  ;;  %v8191_v4 = vld [vmem:[#allocation10 + $0x814] ss:$24 sps:$4 sm:$0xff]  }
  0x98   :  { %3722 = vmatpush2.bf16.msra.mxu1 %v8116_v5  ;;  %3734 = vmatprep.subr.bf16.mxu0 %v8119_v10  ;;  %v8194_v5 = vld [vmem:[#allocation10 + $0xb14] ss:$24 sps:$4 sm:$0xff]   ;;  %v8195_v10 = vld [vmem:[#allocation10 + $0x7e0] ss:$24 sps:$4 sm:$0xff]  }
  0x99   :  { %3777 = vmatprep.subr.bf16.mxu1 %v8122_v11  ;;  %v8198_v11 = vld [vmem:[#allocation10 + $0xae0] ss:$24 sps:$4 sm:$0xff]  }
  0x9a   :  { %3681 = vmatmul.mubr.bf16.vlgmr.msra.gmra.mxu0 %v9377_v12 }
  0x9b   :  { %3724 = vmatmul.mubr.bf16.vlgmr.msra.gmra.mxu1 %v9379_v13  ;;  %3735 = vmatpush1.bf16.msra.mxu0 %v8117_v14  ;;  %v8203_v14 = vld [vmem:[#allocation10 + $0x7b4] ss:$24 sps:$4 sm:$0xff]  }
  0x9c   :  { %3778 = vmatpush1.bf16.msra.mxu1 %v8120_v15  ;;  %3736 = vmatprep.subr.bf16.mxu0 %v8125_v16  ;;  %v8206_v15 = vld [vmem:[#allocation10 + $0xab4] ss:$24 sps:$4 sm:$0xff]   ;;  %v8201_v16 = vld [vmem:[#allocation10 + $0x7b0] ss:$24 sps:$4 sm:$0xff]  }
  0x9d   :  { %3779 = vmatprep.subr.bf16.mxu1 %v8128_v17  ;;  %3766 = vmatprep.mubr.bf16.mxu0 %v9383_v45  ;;  %v8204_v17 = vld [vmem:[#allocation10 + $0xab0] ss:$24 sps:$4 sm:$0xff]  }
  0x9e   :  { %3809 = vmatprep.mubr.bf16.mxu1 %v9385_v47 }
  0x9f   :  { %3737 = vmatpush1.bf16.msra.mxu0 %v8123_v18  ;;  %v8209_v18 = vld [vmem:[#allocation10 + $0x784] ss:$24 sps:$4 sm:$0xff]  }
  0xa0   :  { %3780 = vmatpush1.bf16.msra.mxu1 %v8126_v19  ;;  %3738 = vmatprep.subr.bf16.mxu0 %v8131_v20  ;;  %v8212_v19 = vld [vmem:[#allocation10 + $0xa84] ss:$24 sps:$4 sm:$0xff]   ;;  %v8207_v20 = vld [vmem:[#allocation10 + $0x780] ss:$24 sps:$4 sm:$0xff]  }
  0xa1   :  { %3781 = vmatprep.subr.bf16.mxu1 %v8134_v21  ;;  %v8210_v21 = vld [vmem:[#allocation10 + $0xa80] ss:$24 sps:$4 sm:$0xff]  }
  0xa3   :  { %3739 = vmatpush1.bf16.msra.mxu0 %v8129_v22  ;;  %v126_v22 = vld [vmem:[#allocation2 + $0x20] sm:$0xff] }
  0xa4   :  { %3782 = vmatpush1.bf16.msra.mxu1 %v8132_v23  ;;  %3740 = vmatprep.subr.bf16.mxu0 %v8137_v24  ;;  %v138_v23 = vld [vmem:[#allocation2 + $0x80] sm:$0xff]  ;;  %v128_v24 = vld [vmem:[#allocation2 + $0x30] sm:$0xff] }
  0xa5   :  { %3783 = vmatprep.subr.bf16.mxu1 %v8140_v25  ;;  %v140_v25 = vld [vmem:[#allocation2 + $0x90] sm:$0xff] }
  0xa7   :  { %3741 = vmatpush1.bf16.msra.mxu0 %v8135_v26  ;;  %v8215_v26 = vld [vmem:[#allocation10 + $0xd54] ss:$24 sps:$4 sm:$0xff]  }
  0xa8   :  { %3784 = vmatpush1.bf16.msra.mxu1 %v8138_v27  ;;  %3742 = vmatprep.subr.bf16.mxu0 %v8143_v28  ;;  %v8218_v27 = vld [vmem:[#allocation10 + $0x1054] ss:$24 sps:$4 sm:$0xff]   ;;  %v9389_v28 = vpack.c.bf16 %v138_v23, %v126_v22  ;;  %v8279_v22 = vld [vmem:[#allocation10 + $0xe40] ss:$24 sps:$4 sm:$0xff]  }
  0xa9   :  { %3785 = vmatprep.subr.bf16.mxu1 %v8146_v29  ;;  %v9391_v29 = vpack.c.bf16 %v140_v25, %v128_v24  ;;  %v8282_v23 = vld [vmem:[#allocation10 + $0x1140] ss:$24 sps:$4 sm:$0xff]   ;;  %v8287_v24 = vld [vmem:[#allocation10 + $0xe14] ss:$24 sps:$4 sm:$0xff]  }
  0xaa   :  { %v8290_v25 = vld [vmem:[#allocation10 + $0x1114] ss:$24 sps:$4 sm:$0xff]  }
  0xab   :  { %3743 = vmatpush1.bf16.msra.mxu0 %v8141_v30  ;;  %v8213_v30 = vld [vmem:[#allocation10 + $0xd50] ss:$24 sps:$4 sm:$0xff]  }
  0xac   :  { %3786 = vmatpush1.bf16.msra.mxu1 %v8144_v31  ;;  %3744 = vmatprep.subr.bf16.mxu0 %v8149_v32  ;;  %v8216_v31 = vld [vmem:[#allocation10 + $0x1050] ss:$24 sps:$4 sm:$0xff]   ;;  %v8221_v32 = vld [vmem:[#allocation10 + $0xd24] ss:$24 sps:$4 sm:$0xff]  }
  0xad   :  { %3787 = vmatprep.subr.bf16.mxu1 %v8152_v33  ;;  %v8224_v33 = vld [vmem:[#allocation10 + $0x1024] ss:$24 sps:$4 sm:$0xff]  }
  0xaf   :  { %3745 = vmatpush1.bf16.msra.mxu0 %v8147_v34  ;;  %v8219_v34 = vld [vmem:[#allocation10 + $0xd20] ss:$24 sps:$4 sm:$0xff]  }
  0xb0   :  { %3788 = vmatpush1.bf16.msra.mxu1 %v8150_v35  ;;  %3746 = vmatprep.subr.bf16.mxu0 %v8155_v36  ;;  %v8222_v35 = vld [vmem:[#allocation10 + $0x1020] ss:$24 sps:$4 sm:$0xff]   ;;  %v8227_v36 = vld [vmem:[#allocation10 + $0xcf4] ss:$24 sps:$4 sm:$0xff]  }
  0xb1   :  { %3789 = vmatprep.subr.bf16.mxu1 %v8158_v37  ;;  %v8230_v37 = vld [vmem:[#allocation10 + $0xff4] ss:$24 sps:$4 sm:$0xff]  }
  0xb3   :  { %3747 = vmatpush1.bf16.msra.mxu0 %v8153_v38  ;;  %v131_v38 = vld [vmem:[#allocation2 + $0x48] sm:$0xff] }
  0xb4   :  { %3790 = vmatpush1.bf16.msra.mxu1 %v8156_v39  ;;  %3748 = vmatprep.subr.bf16.mxu0 %v8161_v43  ;;  %v143_v39 = vld [vmem:[#allocation2 + $0xa8] sm:$0xff]  ;;  %v8225_v43 = vld [vmem:[#allocation10 + $0xcf0] ss:$24 sps:$4 sm:$0xff]  }
  0xb5   :  { %3791 = vmatprep.subr.bf16.mxu1 %v8164_v44  ;;  %v9395_v40 = vpack.c.bf16 %v143_v39, %v131_v38  ;;  %v8228_v44 = vld [vmem:[#allocation10 + $0xff0] ss:$24 sps:$4 sm:$0xff]   ;;  %v8305_v38 = vld [vmem:[#allocation10 + $0xd84] ss:$24 sps:$4 sm:$0xff]  }
  0xb6   :  { %v8308_v39 = vld [vmem:[#allocation10 + $0x1084] ss:$24 sps:$4 sm:$0xff]  }
  0xb7   :  { %3749 = vmatpush1.bf16.msra.mxu0 %v8159_v48  ;;  %v8233_v48 = vld [vmem:[#allocation10 + $0xcc4] ss:$24 sps:$4 sm:$0xff]  }
  0xb8   :  { %3792 = vmatpush1.bf16.msra.mxu1 %v8162_v49  ;;  %3750 = vmatprep.subr.bf16.mxu0 %v8167_v50  ;;  %v8236_v49 = vld [vmem:[#allocation10 + $0xfc4] ss:$24 sps:$4 sm:$0xff]   ;;  %v8231_v50 = vld [vmem:[#allocation10 + $0xcc0] ss:$24 sps:$4 sm:$0xff]  }
  0xb9   :  { %3793 = vmatprep.subr.bf16.mxu1 %v8170_v51  ;;  %v8234_v51 = vld [vmem:[#allocation10 + $0xfc0] ss:$24 sps:$4 sm:$0xff]  }
  0xbb   :  { %3751 = vmatpush2.bf16.msra.mxu0 %v8165_v52  ;;  %v8239_v52 = vld [vmem:[#allocation10 + $0xc94] ss:$24 sps:$4 sm:$0xff]  }
  0xbc   :  { %3794 = vmatpush2.bf16.msra.mxu1 %v8168_v55  ;;  %3752 = vmatprep.subr.bf16.mxu0 %v8173_v56  ;;  %v8242_v55 = vld [vmem:[#allocation10 + $0xf94] ss:$24 sps:$4 sm:$0xff]   ;;  %v8237_v56 = vld [vmem:[#allocation10 + $0xc90] ss:$24 sps:$4 sm:$0xff]  }
  0xbd   :  { %3795 = vmatprep.subr.bf16.mxu1 %v8176_v57  ;;  %v8240_v57 = vld [vmem:[#allocation10 + $0xf90] ss:$24 sps:$4 sm:$0xff]  }
  0xbf   :  { %3753 = vmatpush2.bf16.msra.mxu0 %v8171_v58  ;;  %v8245_v58 = vld [vmem:[#allocation10 + $0xc64] ss:$24 sps:$4 sm:$0xff]  }
  0xc0   :  { %3796 = vmatpush2.bf16.msra.mxu1 %v8174_v59  ;;  %3754 = vmatprep.subr.bf16.mxu0 %v8179_v60  ;;  %v8248_v59 = vld [vmem:[#allocation10 + $0xf64] ss:$24 sps:$4 sm:$0xff]   ;;  %v8243_v60 = vld [vmem:[#allocation10 + $0xc60] ss:$24 sps:$4 sm:$0xff]  }
  0xc1   :  { %3797 = vmatprep.subr.bf16.mxu1 %v8182_v61  ;;  %v8246_v61 = vld [vmem:[#allocation10 + $0xf60] ss:$24 sps:$4 sm:$0xff]  }
  0xc3   :  { %3755 = vmatpush2.bf16.msra.mxu0 %v8177_v62  ;;  %v8251_v62 = vld [vmem:[#allocation10 + $0xc34] ss:$24 sps:$4 sm:$0xff]  }
  0xc4   :  { %3798 = vmatpush2.bf16.msra.mxu1 %v8180_v63  ;;  %3756 = vmatprep.subr.bf16.mxu0 %v8185_v0  ;;  %v8254_v63 = vld [vmem:[#allocation10 + $0xf34] ss:$24 sps:$4 sm:$0xff]   ;;  %v8249_v0 = vld [vmem:[#allocation10 + $0xc30] ss:$24 sps:$4 sm:$0xff]  }
  0xc5   :  { %3799 = vmatprep.subr.bf16.mxu1 %v8188_v1  ;;  %v8252_v1 = vld [vmem:[#allocation10 + $0xf30] ss:$24 sps:$4 sm:$0xff]  }
  0xc7   :  { %3757 = vmatpush2.bf16.msra.mxu0 %v8183_v2  ;;  %v8257_v2 = vld [vmem:[#allocation10 + $0xc04] ss:$24 sps:$4 sm:$0xff]  }
  0xc8   :  { %3800 = vmatpush2.bf16.msra.mxu1 %v8186_v3  ;;  %3758 = vmatprep.subr.bf16.mxu0 %v8191_v4  ;;  %v8260_v3 = vld [vmem:[#allocation10 + $0xf04] ss:$24 sps:$4 sm:$0xff]   ;;  %v8255_v4 = vld [vmem:[#allocation10 + $0xc00] ss:$24 sps:$4 sm:$0xff]  }
  0xc9   :  { %3801 = vmatprep.subr.bf16.mxu1 %v8194_v5  ;;  %v8258_v5 = vld [vmem:[#allocation10 + $0xf00] ss:$24 sps:$4 sm:$0xff]  }
  0xcb   :  { %3759 = vmatpush2.bf16.msra.mxu0 %v8189_v6  ;;  %v8263_v6 = vld [vmem:[#allocation10 + $0xed4] ss:$24 sps:$4 sm:$0xff]  }
  0xcc   :  { %3802 = vmatpush2.bf16.msra.mxu1 %v8192_v7  ;;  %3760 = vmatprep.subr.bf16.mxu0 %v8197_v8  ;;  %v8266_v7 = vld [vmem:[#allocation10 + $0x11d4] ss:$24 sps:$4 sm:$0xff]   ;;  %v8261_v8 = vld [vmem:[#allocation10 + $0xed0] ss:$24 sps:$4 sm:$0xff]  }
  0xcd   :  { %3803 = vmatprep.subr.bf16.mxu1 %v8200_v9  ;;  %v8264_v9 = vld [vmem:[#allocation10 + $0x11d0] ss:$24 sps:$4 sm:$0xff]  }
  0xcf   :  { %3761 = vmatpush2.bf16.msra.mxu0 %v8195_v10  ;;  %v8269_v10 = vld [vmem:[#allocation10 + $0xea4] ss:$24 sps:$4 sm:$0xff]  }
  0xd0   :  { %3804 = vmatpush2.bf16.msra.mxu1 %v8198_v11  ;;  %3762 = vmatprep.subr.bf16.mxu0 %v8203_v14  ;;  %v8272_v11 = vld [vmem:[#allocation10 + $0x11a4] ss:$24 sps:$4 sm:$0xff]   ;;  %v8267_v14 = vld [vmem:[#allocation10 + $0xea0] ss:$24 sps:$4 sm:$0xff]  }
  0xd1   :  { %3805 = vmatprep.subr.bf16.mxu1 %v8206_v15  ;;  %v8270_v15 = vld [vmem:[#allocation10 + $0x11a0] ss:$24 sps:$4 sm:$0xff]  }
  0xd3   :  { %3763 = vmatpush2.bf16.msra.mxu0 %v8201_v16  ;;  %v8275_v16 = vld [vmem:[#allocation10 + $0xe74] ss:$24 sps:$4 sm:$0xff]  }
  0xd4   :  { %3806 = vmatpush2.bf16.msra.mxu1 %v8204_v17  ;;  %3764 = vmatprep.subr.bf16.mxu0 %v8209_v18  ;;  %v8278_v17 = vld [vmem:[#allocation10 + $0x1174] ss:$24 sps:$4 sm:$0xff]   ;;  %v8273_v18 = vld [vmem:[#allocation10 + $0xe70] ss:$24 sps:$4 sm:$0xff]  }
  0xd5   :  { %3807 = vmatprep.subr.bf16.mxu1 %v8212_v19  ;;  %v8276_v19 = vld [vmem:[#allocation10 + $0x1170] ss:$24 sps:$4 sm:$0xff]  }
  0xd7   :  { %3765 = vmatpush2.bf16.msra.mxu0 %v8207_v20  ;;  %v8281_v20 = vld [vmem:[#allocation10 + $0xe44] ss:$24 sps:$4 sm:$0xff]  }
  0xd8   :  { %3808 = vmatpush2.bf16.msra.mxu1 %v8210_v21  ;;  %3820 = vmatprep.subr.bf16.mxu0 %v8215_v26  ;;  %v8284_v21 = vld [vmem:[#allocation10 + $0x1144] ss:$24 sps:$4 sm:$0xff]   ;;  %v8285_v26 = vld [vmem:[#allocation10 + $0xe10] ss:$24 sps:$4 sm:$0xff]  }
  0xd9   :  { %3863 = vmatprep.subr.bf16.mxu1 %v8218_v27  ;;  %v8288_v27 = vld [vmem:[#allocation10 + $0x1110] ss:$24 sps:$4 sm:$0xff]  }
  0xda   :  { %3767 = vmatmul.mubr.bf16.vlgmr.msra.gmra.mxu0 %v9389_v28 }
  0xdb   :  { %3810 = vmatmul.mubr.bf16.vlgmr.msra.gmra.mxu1 %v9391_v29  ;;  %3821 = vmatpush1.bf16.msra.mxu0 %v8213_v30  ;;  %v8293_v30 = vld [vmem:[#allocation10 + $0xde4] ss:$24 sps:$4 sm:$0xff]  }
  0xdc   :  { %3864 = vmatpush1.bf16.msra.mxu1 %v8216_v31  ;;  %3822 = vmatprep.subr.bf16.mxu0 %v8221_v32  ;;  %v8296_v31 = vld [vmem:[#allocation10 + $0x10e4] ss:$24 sps:$4 sm:$0xff]   ;;  %v8291_v32 = vld [vmem:[#allocation10 + $0xde0] ss:$24 sps:$4 sm:$0xff]  }
  0xdd   :  { %3865 = vmatprep.subr.bf16.mxu1 %v8224_v33  ;;  %3852 = vmatprep.mubr.bf16.mxu0 %v9395_v40  ;;  %v8294_v33 = vld [vmem:[#allocation10 + $0x10e0] ss:$24 sps:$4 sm:$0xff]  }
  0xde   :  { %3895 = vmatprep.mubr.bf16.mxu1 %v9397_v46 }
  0xdf   :  { %3823 = vmatpush1.bf16.msra.mxu0 %v8219_v34  ;;  %v8299_v34 = vld [vmem:[#allocation10 + $0xdb4] ss:$24 sps:$4 sm:$0xff]  }
  0xe0   :  { %3866 = vmatpush1.bf16.msra.mxu1 %v8222_v35  ;;  %3824 = vmatprep.subr.bf16.mxu0 %v8227_v36  ;;  %v8302_v35 = vld [vmem:[#allocation10 + $0x10b4] ss:$24 sps:$4 sm:$0xff]   ;;  %v8297_v36 = vld [vmem:[#allocation10 + $0xdb0] ss:$24 sps:$4 sm:$0xff]  }
  0xe1   :  { %3867 = vmatprep.subr.bf16.mxu1 %v8230_v37  ;;  %v8300_v37 = vld [vmem:[#allocation10 + $0x10b0] ss:$24 sps:$4 sm:$0xff]  }
  0xe3   :  { %3825 = vmatpush1.bf16.msra.mxu0 %v8225_v43  ;;  %v130_v43 = vld [vmem:[#allocation2 + $0x40] sm:$0xff] }
  0xe4   :  { %3868 = vmatpush1.bf16.msra.mxu1 %v8228_v44  ;;  %3826 = vmatprep.subr.bf16.mxu0 %v8233_v48  ;;  %v142_v44 = vld [vmem:[#allocation2 + $0xa0] sm:$0xff]  ;;  %v132_v48 = vld [vmem:[#allocation2 + $0x50] sm:$0xff] }
  0xe5   :  { %3869 = vmatprep.subr.bf16.mxu1 %v8236_v49  ;;  %v144_v49 = vld [vmem:[#allocation2 + $0xb0] sm:$0xff] }
  0xe7   :  { %3827 = vmatpush1.bf16.msra.mxu0 %v8231_v50  ;;  %v8311_v50 = vld [vmem:[#allocation10 + $0x15c] ss:$24 sps:$4 sm:$0xff]  }
  0xe8   :  { %3870 = vmatpush1.bf16.msra.mxu1 %v8234_v51  ;;  %3828 = vmatprep.subr.bf16.mxu0 %v8239_v52  ;;  %v8314_v51 = vld [vmem:[#allocation10 + $0x45c] ss:$24 sps:$4 sm:$0xff]   ;;  %v9401_v52 = vpack.c.bf16 %v142_v44, %v130_v43 }
  0xe9   :  { %3871 = vmatprep.subr.bf16.mxu1 %v8242_v55  ;;  %v9403_v55 = vpack.c.bf16 %v144_v49, %v132_v48  ;;  %v8383_v43 = vld [vmem:[#allocation10 + $0x21c] ss:$24 sps:$4 sm:$0xff]   ;;  %v8381_v48 = vld [vmem:[#allocation10 + $0x218] ss:$24 sps:$4 sm:$0xff]  }
  0xea   :  { %v8386_v44 = vld [vmem:[#allocation10 + $0x51c] ss:$24 sps:$4 sm:$0xff]   ;;  %v8384_v49 = vld [vmem:[#allocation10 + $0x518] ss:$24 sps:$4 sm:$0xff]  }
  0xeb   :  { %3829 = vmatpush1.bf16.msra.mxu0 %v8237_v56  ;;  %v8309_v56 = vld [vmem:[#allocation10 + $0x158] ss:$24 sps:$4 sm:$0xff]  }
  0xec   :  { %3872 = vmatpush1.bf16.msra.mxu1 %v8240_v57  ;;  %3830 = vmatprep.subr.bf16.mxu0 %v8245_v58  ;;  %v8312_v57 = vld [vmem:[#allocation10 + $0x458] ss:$24 sps:$4 sm:$0xff]   ;;  %v8317_v58 = vld [vmem:[#allocation10 + $0x12c] ss:$24 sps:$4 sm:$0xff]  }
  0xed   :  { %3873 = vmatprep.subr.bf16.mxu1 %v8248_v59  ;;  %v8320_v59 = vld [vmem:[#allocation10 + $0x42c] ss:$24 sps:$4 sm:$0xff]  }
  0xef   :  { %3831 = vmatpush1.bf16.msra.mxu0 %v8243_v60  ;;  %v8315_v60 = vld [vmem:[#allocation10 + $0x128] ss:$24 sps:$4 sm:$0xff]  }
  0xf0   :  { %3874 = vmatpush1.bf16.msra.mxu1 %v8246_v61  ;;  %3832 = vmatprep.subr.bf16.mxu0 %v8251_v62  ;;  %v8318_v61 = vld [vmem:[#allocation10 + $0x428] ss:$24 sps:$4 sm:$0xff]   ;;  %v8323_v62 = vld [vmem:[#allocation10 + $0xfc] ss:$24 sps:$4 sm:$0xff]  }
  0xf1   :  { %3875 = vmatprep.subr.bf16.mxu1 %v8254_v63  ;;  %v8326_v63 = vld [vmem:[#allocation10 + $0x3fc] ss:$24 sps:$4 sm:$0xff]  }
  0xf3   :  { %3833 = vmatpush1.bf16.msra.mxu0 %v8249_v0  ;;  %v8321_v0 = vld [vmem:[#allocation10 + $0xf8] ss:$24 sps:$4 sm:$0xff]  }
  0xf4   :  { %3876 = vmatpush1.bf16.msra.mxu1 %v8252_v1  ;;  %3834 = vmatprep.subr.bf16.mxu0 %v8257_v2  ;;  %v8324_v1 = vld [vmem:[#allocation10 + $0x3f8] ss:$24 sps:$4 sm:$0xff]   ;;  %v8329_v2 = vld [vmem:[#allocation10 + $0xcc] ss:$24 sps:$4 sm:$0xff]  }
  0xf5   :  { %3877 = vmatprep.subr.bf16.mxu1 %v8260_v3  ;;  %v8332_v3 = vld [vmem:[#allocation10 + $0x3cc] ss:$24 sps:$4 sm:$0xff]  }
  0xf7   :  { %3835 = vmatpush1.bf16.msra.mxu0 %v8255_v4  ;;  %v8327_v4 = vld [vmem:[#allocation10 + $0xc8] ss:$24 sps:$4 sm:$0xff]  }
  0xf8   :  { %3878 = vmatpush1.bf16.msra.mxu1 %v8258_v5  ;;  %3836 = vmatprep.subr.bf16.mxu0 %v8263_v6  ;;  %v8330_v5 = vld [vmem:[#allocation10 + $0x3c8] ss:$24 sps:$4 sm:$0xff]   ;;  %v8335_v6 = vld [vmem:[#allocation10 + $0x9c] ss:$24 sps:$4 sm:$0xff]  }
  0xf9   :  { %3879 = vmatprep.subr.bf16.mxu1 %v8266_v7  ;;  %v8338_v7 = vld [vmem:[#allocation10 + $0x39c] ss:$24 sps:$4 sm:$0xff]  }
  0xfb   :  { %3837 = vmatpush2.bf16.msra.mxu0 %v8261_v8  ;;  %v8333_v8 = vld [vmem:[#allocation10 + $0x98] ss:$24 sps:$4 sm:$0xff]  }
  0xfc   :  { %3880 = vmatpush2.bf16.msra.mxu1 %v8264_v9  ;;  %3838 = vmatprep.subr.bf16.mxu0 %v8269_v10  ;;  %v8336_v9 = vld [vmem:[#allocation10 + $0x398] ss:$24 sps:$4 sm:$0xff]   ;;  %v8341_v10 = vld [vmem:[#allocation10 + $0x6c] ss:$24 sps:$4 sm:$0xff]  }
  0xfd   :  { %3881 = vmatprep.subr.bf16.mxu1 %v8272_v11  ;;  %v8344_v11 = vld [vmem:[#allocation10 + $0x36c] ss:$24 sps:$4 sm:$0xff]  }
  0xff   :  { %3839 = vmatpush2.bf16.msra.mxu0 %v8267_v14  ;;  %v8339_v14 = vld [vmem:[#allocation10 + $0x68] ss:$24 sps:$4 sm:$0xff]  }
 0x100   :  { %3882 = vmatpush2.bf16.msra.mxu1 %v8270_v15  ;;  %3840 = vmatprep.subr.bf16.mxu0 %v8275_v16  ;;  %v8342_v15 = vld [vmem:[#allocation10 + $0x368] ss:$24 sps:$4 sm:$0xff]   ;;  %v8347_v16 = vld [vmem:[#allocation10 + $0x3c] ss:$24 sps:$4 sm:$0xff]  }
 0x101   :  { %3883 = vmatprep.subr.bf16.mxu1 %v8278_v17  ;;  %v8350_v17 = vld [vmem:[#allocation10 + $0x33c] ss:$24 sps:$4 sm:$0xff]  }
 0x103   :  { %3841 = vmatpush2.bf16.msra.mxu0 %v8273_v18  ;;  %v8345_v18 = vld [vmem:[#allocation10 + $0x38] ss:$24 sps:$4 sm:$0xff]  }
 0x104   :  { %3884 = vmatpush2.bf16.msra.mxu1 %v8276_v19  ;;  %3842 = vmatprep.subr.bf16.mxu0 %v8281_v20  ;;  %v8348_v19 = vld [vmem:[#allocation10 + $0x338] ss:$24 sps:$4 sm:$0xff]   ;;  %v8353_v20 = vld [vmem:[#allocation10 + $0xc] ss:$24 sps:$4 sm:$0xff]  }
 0x105   :  { %3885 = vmatprep.subr.bf16.mxu1 %v8284_v21  ;;  %v8356_v21 = vld [vmem:[#allocation10 + $0x30c] ss:$24 sps:$4 sm:$0xff]  }
 0x107   :  { %3843 = vmatpush2.bf16.msra.mxu0 %v8279_v22  ;;  %v8351_v22 = vld [vmem:[#allocation10 + $0x8] ss:$24 sps:$4 sm:$0xff]  }
 0x108   :  { %3886 = vmatpush2.bf16.msra.mxu1 %v8282_v23  ;;  %3844 = vmatprep.subr.bf16.mxu0 %v8287_v24  ;;  %v8354_v23 = vld [vmem:[#allocation10 + $0x308] ss:$24 sps:$4 sm:$0xff]   ;;  %v8359_v24 = vld [vmem:[#allocation10 + $0x2dc] ss:$24 sps:$4 sm:$0xff]  }
 0x109   :  { %3887 = vmatprep.subr.bf16.mxu1 %v8290_v25  ;;  %v8362_v25 = vld [vmem:[#allocation10 + $0x5dc] ss:$24 sps:$4 sm:$0xff]  }
 0x10b   :  { %3845 = vmatpush2.bf16.msra.mxu0 %v8285_v26  ;;  %v8357_v26 = vld [vmem:[#allocation10 + $0x2d8] ss:$24 sps:$4 sm:$0xff]  }
 0x10c   :  { %3888 = vmatpush2.bf16.msra.mxu1 %v8288_v27  ;;  %3846 = vmatprep.subr.bf16.mxu0 %v8293_v30  ;;  %v8360_v27 = vld [vmem:[#allocation10 + $0x5d8] ss:$24 sps:$4 sm:$0xff]   ;;  %v8365_v30 = vld [vmem:[#allocation10 + $0x2ac] ss:$24 sps:$4 sm:$0xff]  }
 0x10d   :  { %3889 = vmatprep.subr.bf16.mxu1 %v8296_v31  ;;  %v8368_v31 = vld [vmem:[#allocation10 + $0x5ac] ss:$24 sps:$4 sm:$0xff]  }
 0x10f   :  { %3847 = vmatpush2.bf16.msra.mxu0 %v8291_v32  ;;  %v8363_v32 = vld [vmem:[#allocation10 + $0x2a8] ss:$24 sps:$4 sm:$0xff]  }
 0x110   :  { %3890 = vmatpush2.bf16.msra.mxu1 %v8294_v33  ;;  %3848 = vmatprep.subr.bf16.mxu0 %v8299_v34  ;;  %v8366_v33 = vld [vmem:[#allocation10 + $0x5a8] ss:$24 sps:$4 sm:$0xff]   ;;  %v8371_v34 = vld [vmem:[#allocation10 + $0x27c] ss:$24 sps:$4 sm:$0xff]  }
 0x111   :  { %3891 = vmatprep.subr.bf16.mxu1 %v8302_v35  ;;  %v8374_v35 = vld [vmem:[#allocation10 + $0x57c] ss:$24 sps:$4 sm:$0xff]  }
 0x113   :  { %3849 = vmatpush2.bf16.msra.mxu0 %v8297_v36  ;;  %v8369_v36 = vld [vmem:[#allocation10 + $0x278] ss:$24 sps:$4 sm:$0xff]  }
 0x114   :  { %3892 = vmatpush2.bf16.msra.mxu1 %v8300_v37  ;;  %3850 = vmatprep.subr.bf16.mxu0 %v8305_v38  ;;  %v8372_v37 = vld [vmem:[#allocation10 + $0x578] ss:$24 sps:$4 sm:$0xff]   ;;  %v8377_v38 = vld [vmem:[#allocation10 + $0x24c] ss:$24 sps:$4 sm:$0xff]  }
 0x115   :  { %3893 = vmatprep.subr.bf16.mxu1 %v8308_v39  ;;  %v8380_v39 = vld [vmem:[#allocation10 + $0x54c] ss:$24 sps:$4 sm:$0xff]  }
 0x117   :  { %3851 = vmatpush2.bf16.msra.mxu0 %v8303_v41  ;;  %v8375_v41 = vld [vmem:[#allocation10 + $0x248] ss:$24 sps:$4 sm:$0xff]  }
 0x118   :  { %3894 = vmatpush2.bf16.msra.mxu1 %v8306_v42  ;;  %3906 = vmatprep.subr.bf16.mxu0 %v8311_v50  ;;  %v8378_v42 = vld [vmem:[#allocation10 + $0x548] ss:$24 sps:$4 sm:$0xff]   ;;  %v8389_v50 = vld [vmem:[#allocation10 + $0x1ec] ss:$24 sps:$4 sm:$0xff]  }
 0x119   :  { %3949 = vmatprep.subr.bf16.mxu1 %v8314_v51  ;;  %v8392_v51 = vld [vmem:[#allocation10 + $0x4ec] ss:$24 sps:$4 sm:$0xff]  }
 0x11a   :  { %3853 = vmatmul.mubr.bf16.vlgmr.msra.gmra.mxu0 %v9401_v52 }
 0x11b   :  { %3896 = vmatmul.mubr.bf16.vlgmr.msra.gmra.mxu1 %v9403_v55  ;;  %3907 = vmatpush1.bf16.msra.mxu0 %v8309_v56  ;;  %v8387_v56 = vld [vmem:[#allocation10 + $0x1e8] ss:$24 sps:$4 sm:$0xff]  }
 0x11c   :  { %3950 = vmatpush1.bf16.msra.mxu1 %v8312_v57  ;;  %3908 = vmatprep.subr.bf16.mxu0 %v8317_v58  ;;  %v8390_v57 = vld [vmem:[#allocation10 + $0x4e8] ss:$24 sps:$4 sm:$0xff]   ;;  %v8395_v58 = vld [vmem:[#allocation10 + $0x1bc] ss:$24 sps:$4 sm:$0xff]  }
 0x11d   :  { %3951 = vmatprep.subr.bf16.mxu1 %v8320_v59  ;;  %3938 = vmatprep.mubr.bf16.mxu0 %v9371_v53  ;;  %v8398_v59 = vld [vmem:[#allocation10 + $0x4bc] ss:$24 sps:$4 sm:$0xff]  }
 0x11e   :  { %3981 = vmatprep.mubr.bf16.mxu1 %v9373_v54 }
 0x11f   :  { %3909 = vmatpush1.bf16.msra.mxu0 %v8315_v60  ;;  %v8393_v60 = vld [vmem:[#allocation10 + $0x1b8] ss:$24 sps:$4 sm:$0xff]  }
 0x120   :  { %3952 = vmatpush1.bf16.msra.mxu1 %v8318_v61  ;;  %3910 = vmatprep.subr.bf16.mxu0 %v8323_v62  ;;  %v8396_v61 = vld [vmem:[#allocation10 + $0x4b8] ss:$24 sps:$4 sm:$0xff]   ;;  %v8401_v62 = vld [vmem:[#allocation10 + $0x18c] ss:$24 sps:$4 sm:$0xff]  }
 0x121   :  { %3953 = vmatprep.subr.bf16.mxu1 %v8326_v63  ;;  %v8404_v63 = vld [vmem:[#allocation10 + $0x48c] ss:$24 sps:$4 sm:$0xff]  }
 0x123   :  { %3911 = vmatpush1.bf16.msra.mxu0 %v8321_v0  ;;  %v8399_v0 = vld [vmem:[#allocation10 + $0x188] ss:$24 sps:$4 sm:$0xff]  }
 0x124   :  { %3954 = vmatpush1.bf16.msra.mxu1 %v8324_v1  ;;  %3912 = vmatprep.subr.bf16.mxu0 %v8329_v2  ;;  %v8402_v1 = vld [vmem:[#allocation10 + $0x488] ss:$24 sps:$4 sm:$0xff]   ;;  %v8407_v2 = vld [vmem:[#allocation10 + $0x75c] ss:$24 sps:$4 sm:$0xff]  }
 0x125   :  { %3955 = vmatprep.subr.bf16.mxu1 %v8332_v3  ;;  %v8410_v3 = vld [vmem:[#allocation10 + $0xa5c] ss:$24 sps:$4 sm:$0xff]  }
 0x127   :  { %3913 = vmatpush1.bf16.msra.mxu0 %v8327_v4  ;;  %v8405_v4 = vld [vmem:[#allocation10 + $0x758] ss:$24 sps:$4 sm:$0xff]  }
 0x128   :  { %3956 = vmatpush1.bf16.msra.mxu1 %v8330_v5  ;;  %3914 = vmatprep.subr.bf16.mxu0 %v8335_v6  ;;  %v8408_v5 = vld [vmem:[#allocation10 + $0xa58] ss:$24 sps:$4 sm:$0xff]   ;;  %v8413_v6 = vld [vmem:[#allocation10 + $0x72c] ss:$24 sps:$4 sm:$0xff]  }
 0x129   :  { %3957 = vmatprep.subr.bf16.mxu1 %v8338_v7  ;;  %v8416_v7 = vld [vmem:[#allocation10 + $0xa2c] ss:$24 sps:$4 sm:$0xff]  }
 0x12b   :  { %3915 = vmatpush1.bf16.msra.mxu0 %v8333_v8  ;;  %v8411_v8 = vld [vmem:[#allocation10 + $0x728] ss:$24 sps:$4 sm:$0xff]  }
 0x12c   :  { %3958 = vmatpush1.bf16.msra.mxu1 %v8336_v9  ;;  %3916 = vmatprep.subr.bf16.mxu0 %v8341_v10  ;;  %v8414_v9 = vld [vmem:[#allocation10 + $0xa28] ss:$24 sps:$4 sm:$0xff]   ;;  %v8419_v10 = vld [vmem:[#allocation10 + $0x6fc] ss:$24 sps:$4 sm:$0xff]  }
 0x12d   :  { %3959 = vmatprep.subr.bf16.mxu1 %v8344_v11  ;;  %v8422_v11 = vld [vmem:[#allocation10 + $0x9fc] ss:$24 sps:$4 sm:$0xff]  }
 0x12f   :  { %3917 = vmatpush1.bf16.msra.mxu0 %v8339_v14  ;;  %v8417_v14 = vld [vmem:[#allocation10 + $0x6f8] ss:$24 sps:$4 sm:$0xff]  }
 0x130   :  { %3960 = vmatpush1.bf16.msra.mxu1 %v8342_v15  ;;  %3918 = vmatprep.subr.bf16.mxu0 %v8347_v16  ;;  %v8420_v15 = vld [vmem:[#allocation10 + $0x9f8] ss:$24 sps:$4 sm:$0xff]   ;;  %v8425_v16 = vld [vmem:[#allocation10 + $0x6cc] ss:$24 sps:$4 sm:$0xff]  }
 0x131   :  { %3961 = vmatprep.subr.bf16.mxu1 %v8350_v17  ;;  %v8428_v17 = vld [vmem:[#allocation10 + $0x9cc] ss:$24 sps:$4 sm:$0xff]  }
 0x133   :  { %3919 = vmatpush1.bf16.msra.mxu0 %v8345_v18  ;;  %v8423_v18 = vld [vmem:[#allocation10 + $0x6c8] ss:$24 sps:$4 sm:$0xff]  }
 0x134   :  { %3962 = vmatpush1.bf16.msra.mxu1 %v8348_v19  ;;  %3920 = vmatprep.subr.bf16.mxu0 %v8353_v20  ;;  %v8426_v19 = vld [vmem:[#allocation10 + $0x9c8] ss:$24 sps:$4 sm:$0xff]   ;;  %v8431_v20 = vld [vmem:[#allocation10 + $0x69c] ss:$24 sps:$4 sm:$0xff]  }
 0x135   :  { %3963 = vmatprep.subr.bf16.mxu1 %v8356_v21  ;;  %v8434_v21 = vld [vmem:[#allocation10 + $0x99c] ss:$24 sps:$4 sm:$0xff]  }
 0x137   :  { %3921 = vmatpush1.bf16.msra.mxu0 %v8351_v22  ;;  %v8429_v22 = vld [vmem:[#allocation10 + $0x698] ss:$24 sps:$4 sm:$0xff]  }
 0x138   :  { %3964 = vmatpush1.bf16.msra.mxu1 %v8354_v23  ;;  %3922 = vmatprep.subr.bf16.mxu0 %v8359_v24  ;;  %v8432_v23 = vld [vmem:[#allocation10 + $0x998] ss:$24 sps:$4 sm:$0xff]   ;;  %v8437_v24 = vld [vmem:[#allocation10 + $0x66c] ss:$24 sps:$4 sm:$0xff]  }
 0x139   :  { %3965 = vmatprep.subr.bf16.mxu1 %v8362_v25  ;;  %v8440_v25 = vld [vmem:[#allocation10 + $0x96c] ss:$24 sps:$4 sm:$0xff]  }
 0x13b   :  { %3923 = vmatpush2.bf16.msra.mxu0 %v8357_v26  ;;  %v8435_v26 = vld [vmem:[#allocation10 + $0x668] ss:$24 sps:$4 sm:$0xff]  }
 0x13c   :  { %3966 = vmatpush2.bf16.msra.mxu1 %v8360_v27  ;;  %3924 = vmatprep.subr.bf16.mxu0 %v8365_v30  ;;  %v8438_v27 = vld [vmem:[#allocation10 + $0x968] ss:$24 sps:$4 sm:$0xff]   ;;  %v8443_v30 = vld [vmem:[#allocation10 + $0x63c] ss:$24 sps:$4 sm:$0xff]  }
 0x13d   :  { %3967 = vmatprep.subr.bf16.mxu1 %v8368_v31  ;;  %v8446_v31 = vld [vmem:[#allocation10 + $0x93c] ss:$24 sps:$4 sm:$0xff]  }
 0x13f   :  { %3925 = vmatpush2.bf16.msra.mxu0 %v8363_v32  ;;  %v8441_v32 = vld [vmem:[#allocation10 + $0x638] ss:$24 sps:$4 sm:$0xff]  }
 0x140   :  { %3968 = vmatpush2.bf16.msra.mxu1 %v8366_v33  ;;  %3926 = vmatprep.subr.bf16.mxu0 %v8371_v34  ;;  %v8444_v33 = vld [vmem:[#allocation10 + $0x938] ss:$24 sps:$4 sm:$0xff]   ;;  %v8449_v34 = vld [vmem:[#allocation10 + $0x60c] ss:$24 sps:$4 sm:$0xff]  }
 0x141   :  { %3969 = vmatprep.subr.bf16.mxu1 %v8374_v35  ;;  %v8452_v35 = vld [vmem:[#allocation10 + $0x90c] ss:$24 sps:$4 sm:$0xff]  }
 0x143   :  { %3927 = vmatpush2.bf16.msra.mxu0 %v8369_v36  ;;  %v8447_v36 = vld [vmem:[#allocation10 + $0x608] ss:$24 sps:$4 sm:$0xff]  }
 0x144   :  { %3970 = vmatpush2.bf16.msra.mxu1 %v8372_v37  ;;  %3928 = vmatprep.subr.bf16.mxu0 %v8377_v38  ;;  %v8450_v37 = vld [vmem:[#allocation10 + $0x908] ss:$24 sps:$4 sm:$0xff]   ;;  %v8455_v38 = vld [vmem:[#allocation10 + $0x8dc] ss:$24 sps:$4 sm:$0xff]  }
 0x145   :  { %3971 = vmatprep.subr.bf16.mxu1 %v8380_v39  ;;  %v8458_v39 = vld [vmem:[#allocation10 + $0xbdc] ss:$24 sps:$4 sm:$0xff]  }
 0x147   :  { %3929 = vmatpush2.bf16.msra.mxu0 %v8375_v41  ;;  %v8453_v41 = vld [vmem:[#allocation10 + $0x8d8] ss:$24 sps:$4 sm:$0xff]  }
 0x148   :  { %3972 = vmatpush2.bf16.msra.mxu1 %v8378_v42  ;;  %3930 = vmatprep.subr.bf16.mxu0 %v8383_v43  ;;  %v8456_v42 = vld [vmem:[#allocation10 + $0xbd8] ss:$24 sps:$4 sm:$0xff]   ;;  %v8461_v43 = vld [vmem:[#allocation10 + $0x8ac] ss:$24 sps:$4 sm:$0xff]  }
 0x149   :  { %3973 = vmatprep.subr.bf16.mxu1 %v8386_v44  ;;  %v8464_v44 = vld [vmem:[#allocation10 + $0xbac] ss:$24 sps:$4 sm:$0xff]  }
 0x14b   :  { %3931 = vmatpush2.bf16.msra.mxu0 %v8381_v48  ;;  %v8459_v48 = vld [vmem:[#allocation10 + $0x8a8] ss:$24 sps:$4 sm:$0xff]  }
 0x14c   :  { %3974 = vmatpush2.bf16.msra.mxu1 %v8384_v49  ;;  %3932 = vmatprep.subr.bf16.mxu0 %v8389_v50  ;;  %v8462_v49 = vld [vmem:[#allocation10 + $0xba8] ss:$24 sps:$4 sm:$0xff]   ;;  %v8467_v50 = vld [vmem:[#allocation10 + $0x87c] ss:$24 sps:$4 sm:$0xff]  }
 0x14d   :  { %3975 = vmatprep.subr.bf16.mxu1 %v8392_v51  ;;  %v8470_v51 = vld [vmem:[#allocation10 + $0xb7c] ss:$24 sps:$4 sm:$0xff]  }
 0x14f   :  { %3933 = vmatpush2.bf16.msra.mxu0 %v8387_v56  ;;  %v8465_v56 = vld [vmem:[#allocation10 + $0x878] ss:$24 sps:$4 sm:$0xff]  }
 0x150   :  { %3976 = vmatpush2.bf16.msra.mxu1 %v8390_v57  ;;  %3934 = vmatprep.subr.bf16.mxu0 %v8395_v58  ;;  %v8468_v57 = vld [vmem:[#allocation10 + $0xb78] ss:$24 sps:$4 sm:$0xff]   ;;  %v8473_v58 = vld [vmem:[#allocation10 + $0x84c] ss:$24 sps:$4 sm:$0xff]  }
 0x151   :  { %3977 = vmatprep.subr.bf16.mxu1 %v8398_v59  ;;  %v8476_v59 = vld [vmem:[#allocation10 + $0xb4c] ss:$24 sps:$4 sm:$0xff]  }
 0x153   :  { %3935 = vmatpush2.bf16.msra.mxu0 %v8393_v60  ;;  %v8471_v60 = vld [vmem:[#allocation10 + $0x848] ss:$24 sps:$4 sm:$0xff]  }
 0x154   :  { %3978 = vmatpush2.bf16.msra.mxu1 %v8396_v61  ;;  %3936 = vmatprep.subr.bf16.mxu0 %v8401_v62  ;;  %v8474_v61 = vld [vmem:[#allocation10 + $0xb48] ss:$24 sps:$4 sm:$0xff]   ;;  %v8479_v62 = vld [vmem:[#allocation10 + $0x81c] ss:$24 sps:$4 sm:$0xff]  }
 0x155   :  { %3979 = vmatprep.subr.bf16.mxu1 %v8404_v63  ;;  %v8482_v63 = vld [vmem:[#allocation10 + $0xb1c] ss:$24 sps:$4 sm:$0xff]  }
 0x157   :  { %3937 = vmatpush2.bf16.msra.mxu0 %v8399_v0  ;;  %v8477_v0 = vld [vmem:[#allocation10 + $0x818] ss:$24 sps:$4 sm:$0xff]  }
 0x158   :  { %3980 = vmatpush2.bf16.msra.mxu1 %v8402_v1  ;;  %3992 = vmatprep.subr.bf16.mxu0 %v8407_v2  ;;  %v8480_v1 = vld [vmem:[#allocation10 + $0xb18] ss:$24 sps:$4 sm:$0xff]   ;;  %v8485_v2 = vld [vmem:[#allocation10 + $0x7ec] ss:$24 sps:$4 sm:$0xff]  }
 0x159   :  { %4035 = vmatprep.subr.bf16.mxu1 %v8410_v3  ;;  %v8488_v3 = vld [vmem:[#allocation10 + $0xaec] ss:$24 sps:$4 sm:$0xff]  }
 0x15a   :  { %3939 = vmatmul.mubr.bf16.vlgmr.msra.gmra.mxu0 %v9377_v12 }
 0x15b   :  { %3982 = vmatmul.mubr.bf16.vlgmr.msra.gmra.mxu1 %v9379_v13  ;;  %3993 = vmatpush1.bf16.msra.mxu0 %v8405_v4  ;;  %v8483_v4 = vld [vmem:[#allocation10 + $0x7e8] ss:$24 sps:$4 sm:$0xff]  }
 0x15c   :  { %4036 = vmatpush1.bf16.msra.mxu1 %v8408_v5  ;;  %3994 = vmatprep.subr.bf16.mxu0 %v8413_v6  ;;  %v8486_v5 = vld [vmem:[#allocation10 + $0xae8] ss:$24 sps:$4 sm:$0xff]   ;;  %v8491_v6 = vld [vmem:[#allocation10 + $0x7bc] ss:$24 sps:$4 sm:$0xff]  }
 0x15d   :  { %4037 = vmatprep.subr.bf16.mxu1 %v8416_v7  ;;  %4024 = vmatprep.mubr.bf16.mxu0 %v9383_v45  ;;  %v8494_v7 = vld [vmem:[#allocation10 + $0xabc] ss:$24 sps:$4 sm:$0xff]  }
 0x15e   :  { %4067 = vmatprep.mubr.bf16.mxu1 %v9385_v47 }
 0x15f   :  { %3995 = vmatpush1.bf16.msra.mxu0 %v8411_v8  ;;  %v8489_v8 = vld [vmem:[#allocation10 + $0x7b8] ss:$24 sps:$4 sm:$0xff]  }
 0x160   :  { %4038 = vmatpush1.bf16.msra.mxu1 %v8414_v9  ;;  %3996 = vmatprep.subr.bf16.mxu0 %v8419_v10  ;;  %v8492_v9 = vld [vmem:[#allocation10 + $0xab8] ss:$24 sps:$4 sm:$0xff]   ;;  %v8497_v10 = vld [vmem:[#allocation10 + $0x78c] ss:$24 sps:$4 sm:$0xff]  }
 0x161   :  { %4039 = vmatprep.subr.bf16.mxu1 %v8422_v11  ;;  %v8500_v11 = vld [vmem:[#allocation10 + $0xa8c] ss:$24 sps:$4 sm:$0xff]  }
 0x163   :  { %3997 = vmatpush1.bf16.msra.mxu0 %v8417_v14  ;;  %v8495_v14 = vld [vmem:[#allocation10 + $0x788] ss:$24 sps:$4 sm:$0xff]  }
 0x164   :  { %4040 = vmatpush1.bf16.msra.mxu1 %v8420_v15  ;;  %3998 = vmatprep.subr.bf16.mxu0 %v8425_v16  ;;  %v8498_v15 = vld [vmem:[#allocation10 + $0xa88] ss:$24 sps:$4 sm:$0xff]   ;;  %v8503_v16 = vld [vmem:[#allocation10 + $0xd5c] ss:$24 sps:$4 sm:$0xff]  }
 0x165   :  { %4041 = vmatprep.subr.bf16.mxu1 %v8428_v17  ;;  %v8506_v17 = vld [vmem:[#allocation10 + $0x105c] ss:$24 sps:$4 sm:$0xff]  }
 0x167   :  { %3999 = vmatpush1.bf16.msra.mxu0 %v8423_v18  ;;  %v8501_v18 = vld [vmem:[#allocation10 + $0xd58] ss:$24 sps:$4 sm:$0xff]  }
 0x168   :  { %4042 = vmatpush1.bf16.msra.mxu1 %v8426_v19  ;;  %4000 = vmatprep.subr.bf16.mxu0 %v8431_v20  ;;  %v8504_v19 = vld [vmem:[#allocation10 + $0x1058] ss:$24 sps:$4 sm:$0xff]   ;;  %v8509_v20 = vld [vmem:[#allocation10 + $0xd2c] ss:$24 sps:$4 sm:$0xff]  }
 0x169   :  { %4043 = vmatprep.subr.bf16.mxu1 %v8434_v21  ;;  %v8512_v21 = vld [vmem:[#allocation10 + $0x102c] ss:$24 sps:$4 sm:$0xff]  }
 0x16b   :  { %4001 = vmatpush1.bf16.msra.mxu0 %v8429_v22  ;;  %v8507_v22 = vld [vmem:[#allocation10 + $0xd28] ss:$24 sps:$4 sm:$0xff]  }
 0x16c   :  { %4044 = vmatpush1.bf16.msra.mxu1 %v8432_v23  ;;  %4002 = vmatprep.subr.bf16.mxu0 %v8437_v24  ;;  %v8510_v23 = vld [vmem:[#allocation10 + $0x1028] ss:$24 sps:$4 sm:$0xff]   ;;  %v8515_v24 = vld [vmem:[#allocation10 + $0xcfc] ss:$24 sps:$4 sm:$0xff]  }
 0x16d   :  { %4045 = vmatprep.subr.bf16.mxu1 %v8440_v25  ;;  %v8518_v25 = vld [vmem:[#allocation10 + $0xffc] ss:$24 sps:$4 sm:$0xff]  }
 0x16f   :  { %4003 = vmatpush1.bf16.msra.mxu0 %v8435_v26  ;;  %v8513_v26 = vld [vmem:[#allocation10 + $0xcf8] ss:$24 sps:$4 sm:$0xff]  }
 0x170   :  { %4046 = vmatpush1.bf16.msra.mxu1 %v8438_v27  ;;  %4004 = vmatprep.subr.bf16.mxu0 %v8443_v30  ;;  %v8516_v27 = vld [vmem:[#allocation10 + $0xff8] ss:$24 sps:$4 sm:$0xff]   ;;  %v8521_v30 = vld [vmem:[#allocation10 + $0xccc] ss:$24 sps:$4 sm:$0xff]  }
 0x171   :  { %4047 = vmatprep.subr.bf16.mxu1 %v8446_v31  ;;  %v8524_v31 = vld [vmem:[#allocation10 + $0xfcc] ss:$24 sps:$4 sm:$0xff]  }
 0x173   :  { %4005 = vmatpush1.bf16.msra.mxu0 %v8441_v32  ;;  %v8519_v32 = vld [vmem:[#allocation10 + $0xcc8] ss:$24 sps:$4 sm:$0xff]  }
 0x174   :  { %4048 = vmatpush1.bf16.msra.mxu1 %v8444_v33  ;;  %4006 = vmatprep.subr.bf16.mxu0 %v8449_v34  ;;  %v8522_v33 = vld [vmem:[#allocation10 + $0xfc8] ss:$24 sps:$4 sm:$0xff]   ;;  %v8527_v34 = vld [vmem:[#allocation10 + $0xc9c] ss:$24 sps:$4 sm:$0xff]  }
 0x175   :  { %4049 = vmatprep.subr.bf16.mxu1 %v8452_v35  ;;  %v8530_v35 = vld [vmem:[#allocation10 + $0xf9c] ss:$24 sps:$4 sm:$0xff]  }
 0x177   :  { %4007 = vmatpush1.bf16.msra.mxu0 %v8447_v36  ;;  %v8525_v36 = vld [vmem:[#allocation10 + $0xc98] ss:$24 sps:$4 sm:$0xff]  }
 0x178   :  { %4050 = vmatpush1.bf16.msra.mxu1 %v8450_v37  ;;  %4008 = vmatprep.subr.bf16.mxu0 %v8455_v38  ;;  %v8528_v37 = vld [vmem:[#allocation10 + $0xf98] ss:$24 sps:$4 sm:$0xff]   ;;  %v8533_v38 = vld [vmem:[#allocation10 + $0xc6c] ss:$24 sps:$4 sm:$0xff]  }
 0x179   :  { %4051 = vmatprep.subr.bf16.mxu1 %v8458_v39  ;;  %v8536_v39 = vld [vmem:[#allocation10 + $0xf6c] ss:$24 sps:$4 sm:$0xff]  }
 0x17b   :  { %4009 = vmatpush2.bf16.msra.mxu0 %v8453_v41  ;;  %v8531_v41 = vld [vmem:[#allocation10 + $0xc68] ss:$24 sps:$4 sm:$0xff]  }
 0x17c   :  { %4052 = vmatpush2.bf16.msra.mxu1 %v8456_v42  ;;  %4010 = vmatprep.subr.bf16.mxu0 %v8461_v43  ;;  %v8534_v42 = vld [vmem:[#allocation10 + $0xf68] ss:$24 sps:$4 sm:$0xff]   ;;  %v8539_v43 = vld [vmem:[#allocation10 + $0xc3c] ss:$24 sps:$4 sm:$0xff]  }
 0x17d   :  { %4053 = vmatprep.subr.bf16.mxu1 %v8464_v44  ;;  %v8542_v44 = vld [vmem:[#allocation10 + $0xf3c] ss:$24 sps:$4 sm:$0xff]  }
 0x17f   :  { %4011 = vmatpush2.bf16.msra.mxu0 %v8459_v48  ;;  %v8537_v48 = vld [vmem:[#allocation10 + $0xc38] ss:$24 sps:$4 sm:$0xff]  }
 0x180   :  { %4054 = vmatpush2.bf16.msra.mxu1 %v8462_v49  ;;  %4012 = vmatprep.subr.bf16.mxu0 %v8467_v50  ;;  %v8540_v49 = vld [vmem:[#allocation10 + $0xf38] ss:$24 sps:$4 sm:$0xff]   ;;  %v8545_v50 = vld [vmem:[#allocation10 + $0xc0c] ss:$24 sps:$4 sm:$0xff]  }
 0x181   :  { %4055 = vmatprep.subr.bf16.mxu1 %v8470_v51  ;;  %v8548_v51 = vld [vmem:[#allocation10 + $0xf0c] ss:$24 sps:$4 sm:$0xff]  }
 0x183   :  { %4013 = vmatpush2.bf16.msra.mxu0 %v8465_v56  ;;  %v8543_v56 = vld [vmem:[#allocation10 + $0xc08] ss:$24 sps:$4 sm:$0xff]  }
 0x184   :  { %4056 = vmatpush2.bf16.msra.mxu1 %v8468_v57  ;;  %4014 = vmatprep.subr.bf16.mxu0 %v8473_v58  ;;  %v8546_v57 = vld [vmem:[#allocation10 + $0xf08] ss:$24 sps:$4 sm:$0xff]   ;;  %v8551_v58 = vld [vmem:[#allocation10 + $0xedc] ss:$24 sps:$4 sm:$0xff]  }
 0x185   :  { %4057 = vmatprep.subr.bf16.mxu1 %v8476_v59  ;;  %v8554_v59 = vld [vmem:[#allocation10 + $0x11dc] ss:$24 sps:$4 sm:$0xff]  }
 0x187   :  { %4015 = vmatpush2.bf16.msra.mxu0 %v8471_v60  ;;  %v8549_v60 = vld [vmem:[#allocation10 + $0xed8] ss:$24 sps:$4 sm:$0xff]  }
 0x188   :  { %4058 = vmatpush2.bf16.msra.mxu1 %v8474_v61  ;;  %4016 = vmatprep.subr.bf16.mxu0 %v8479_v62  ;;  %v8552_v61 = vld [vmem:[#allocation10 + $0x11d8] ss:$24 sps:$4 sm:$0xff]   ;;  %v8557_v62 = vld [vmem:[#allocation10 + $0xeac] ss:$24 sps:$4 sm:$0xff]  }
 0x189   :  { %4059 = vmatprep.subr.bf16.mxu1 %v8482_v63  ;;  %v8560_v63 = vld [vmem:[#allocation10 + $0x11ac] ss:$24 sps:$4 sm:$0xff]  }
 0x18b   :  { %4017 = vmatpush2.bf16.msra.mxu0 %v8477_v0  ;;  %v8555_v0 = vld [vmem:[#allocation10 + $0xea8] ss:$24 sps:$4 sm:$0xff]  }
 0x18c   :  { %4060 = vmatpush2.bf16.msra.mxu1 %v8480_v1  ;;  %4018 = vmatprep.subr.bf16.mxu0 %v8485_v2  ;;  %v8558_v1 = vld [vmem:[#allocation10 + $0x11a8] ss:$24 sps:$4 sm:$0xff]   ;;  %v8563_v2 = vld [vmem:[#allocation10 + $0xe7c] ss:$24 sps:$4 sm:$0xff]  }
 0x18d   :  { %4061 = vmatprep.subr.bf16.mxu1 %v8488_v3  ;;  %v8566_v3 = vld [vmem:[#allocation10 + $0x117c] ss:$24 sps:$4 sm:$0xff]  }
 0x18f   :  { %4019 = vmatpush2.bf16.msra.mxu0 %v8483_v4  ;;  %v8561_v4 = vld [vmem:[#allocation10 + $0xe78] ss:$24 sps:$4 sm:$0xff]  }
 0x190   :  { %4062 = vmatpush2.bf16.msra.mxu1 %v8486_v5  ;;  %4020 = vmatprep.subr.bf16.mxu0 %v8491_v6  ;;  %v8564_v5 = vld [vmem:[#allocation10 + $0x1178] ss:$24 sps:$4 sm:$0xff]   ;;  %v8569_v6 = vld [vmem:[#allocation10 + $0xe4c] ss:$24 sps:$4 sm:$0xff]  }
 0x191   :  { %4063 = vmatprep.subr.bf16.mxu1 %v8494_v7  ;;  %v8572_v7 = vld [vmem:[#allocation10 + $0x114c] ss:$24 sps:$4 sm:$0xff]  }
 0x193   :  { %4021 = vmatpush2.bf16.msra.mxu0 %v8489_v8  ;;  %v8567_v8 = vld [vmem:[#allocation10 + $0xe48] ss:$24 sps:$4 sm:$0xff]  }
 0x194   :  { %4064 = vmatpush2.bf16.msra.mxu1 %v8492_v9  ;;  %4022 = vmatprep.subr.bf16.mxu0 %v8497_v10  ;;  %v8570_v9 = vld [vmem:[#allocation10 + $0x1148] ss:$24 sps:$4 sm:$0xff]   ;;  %v8575_v10 = vld [vmem:[#allocation10 + $0xe1c] ss:$24 sps:$4 sm:$0xff]  }
 0x195   :  { %4065 = vmatprep.subr.bf16.mxu1 %v8500_v11  ;;  %v8578_v11 = vld [vmem:[#allocation10 + $0x111c] ss:$24 sps:$4 sm:$0xff]  }
 0x197   :  { %4023 = vmatpush2.bf16.msra.mxu0 %v8495_v14  ;;  %v8573_v14 = vld [vmem:[#allocation10 + $0xe18] ss:$24 sps:$4 sm:$0xff]  }
 0x198   :  { %4066 = vmatpush2.bf16.msra.mxu1 %v8498_v15  ;;  %4078 = vmatprep.subr.bf16.mxu0 %v8503_v16  ;;  %v8576_v15 = vld [vmem:[#allocation10 + $0x1118] ss:$24 sps:$4 sm:$0xff]   ;;  %v8581_v16 = vld [vmem:[#allocation10 + $0xdec] ss:$24 sps:$4 sm:$0xff]  }
 0x199   :  { %4121 = vmatprep.subr.bf16.mxu1 %v8506_v17  ;;  %v8584_v17 = vld [vmem:[#allocation10 + $0x10ec] ss:$24 sps:$4 sm:$0xff]  }
 0x19a   :  { %4025 = vmatmul.mubr.bf16.vlgmr.msra.gmra.mxu0 %v9389_v28 }
 0x19b   :  { %4068 = vmatmul.mubr.bf16.vlgmr.msra.gmra.mxu1 %v9391_v29  ;;  %4079 = vmatpush1.bf16.msra.mxu0 %v8501_v18  ;;  %v8579_v18 = vld [vmem:[#allocation10 + $0xde8] ss:$24 sps:$4 sm:$0xff]  }
 0x19c   :  { %4122 = vmatpush1.bf16.msra.mxu1 %v8504_v19  ;;  %4080 = vmatprep.subr.bf16.mxu0 %v8509_v20  ;;  %v8582_v19 = vld [vmem:[#allocation10 + $0x10e8] ss:$24 sps:$4 sm:$0xff]   ;;  %v8587_v20 = vld [vmem:[#allocation10 + $0xdbc] ss:$24 sps:$4 sm:$0xff]  }
 0x19d   :  { %4123 = vmatprep.subr.bf16.mxu1 %v8512_v21  ;;  %4110 = vmatprep.mubr.bf16.mxu0 %v9395_v40  ;;  %v8590_v21 = vld [vmem:[#allocation10 + $0x10bc] ss:$24 sps:$4 sm:$0xff]  }
 0x19e   :  { %4153 = vmatprep.mubr.bf16.mxu1 %v9397_v46 }
 0x19f   :  { %4081 = vmatpush1.bf16.msra.mxu0 %v8507_v22  ;;  %v8585_v22 = vld [vmem:[#allocation10 + $0xdb8] ss:$24 sps:$4 sm:$0xff]  }
 0x1a0   :  { %4124 = vmatpush1.bf16.msra.mxu1 %v8510_v23  ;;  %4082 = vmatprep.subr.bf16.mxu0 %v8515_v24  ;;  %v8588_v23 = vld [vmem:[#allocation10 + $0x10b8] ss:$24 sps:$4 sm:$0xff]   ;;  %v8593_v24 = vld [vmem:[#allocation10 + $0xd8c] ss:$24 sps:$4 sm:$0xff]  }
 0x1a1   :  { %4125 = vmatprep.subr.bf16.mxu1 %v8518_v25  ;;  %v8596_v25 = vld [vmem:[#allocation10 + $0x108c] ss:$24 sps:$4 sm:$0xff]  }
 0x1a3   :  { %4083 = vmatpush1.bf16.msra.mxu0 %v8513_v26  ;;  %v8591_v26 = vld [vmem:[#allocation10 + $0xd88] ss:$24 sps:$4 sm:$0xff]  }
 0x1a4   :  { %4126 = vmatpush1.bf16.msra.mxu1 %v8516_v27  ;;  %4084 = vmatprep.subr.bf16.mxu0 %v8521_v30  ;;  %v8594_v27 = vld [vmem:[#allocation10 + $0x1088] ss:$24 sps:$4 sm:$0xff]   ;;  %v8599_v30 = vld [vmem:[#allocation10 + $0x164] ss:$24 sps:$4 sm:$0xff]  }
 0x1a5   :  { %4127 = vmatprep.subr.bf16.mxu1 %v8524_v31  ;;  %v8602_v31 = vld [vmem:[#allocation10 + $0x464] ss:$24 sps:$4 sm:$0xff]  }
 0x1a7   :  { %4085 = vmatpush1.bf16.msra.mxu0 %v8519_v32  ;;  %v8597_v32 = vld [vmem:[#allocation10 + $0x160] ss:$24 sps:$4 sm:$0xff]  }
 0x1a8   :  { %4128 = vmatpush1.bf16.msra.mxu1 %v8522_v33  ;;  %4086 = vmatprep.subr.bf16.mxu0 %v8527_v34  ;;  %v8600_v33 = vld [vmem:[#allocation10 + $0x460] ss:$24 sps:$4 sm:$0xff]   ;;  %v8605_v34 = vld [vmem:[#allocation10 + $0x134] ss:$24 sps:$4 sm:$0xff]  }
 0x1a9   :  { %4129 = vmatprep.subr.bf16.mxu1 %v8530_v35  ;;  %v8608_v35 = vld [vmem:[#allocation10 + $0x434] ss:$24 sps:$4 sm:$0xff]  }
 0x1ab   :  { %4087 = vmatpush1.bf16.msra.mxu0 %v8525_v36  ;;  %v8603_v36 = vld [vmem:[#allocation10 + $0x130] ss:$24 sps:$4 sm:$0xff]  }
 0x1ac   :  { %4130 = vmatpush1.bf16.msra.mxu1 %v8528_v37  ;;  %4088 = vmatprep.subr.bf16.mxu0 %v8533_v38  ;;  %v8606_v37 = vld [vmem:[#allocation10 + $0x430] ss:$24 sps:$4 sm:$0xff]   ;;  %v8611_v38 = vld [vmem:[#allocation10 + $0x104] ss:$24 sps:$4 sm:$0xff]  }
 0x1ad   :  { %4131 = vmatprep.subr.bf16.mxu1 %v8536_v39  ;;  %v8614_v39 = vld [vmem:[#allocation10 + $0x404] ss:$24 sps:$4 sm:$0xff]  }
 0x1af   :  { %4089 = vmatpush1.bf16.msra.mxu0 %v8531_v41  ;;  %v8609_v41 = vld [vmem:[#allocation10 + $0x100] ss:$24 sps:$4 sm:$0xff]  }
 0x1b0   :  { %4132 = vmatpush1.bf16.msra.mxu1 %v8534_v42  ;;  %4090 = vmatprep.subr.bf16.mxu0 %v8539_v43  ;;  %v8612_v42 = vld [vmem:[#allocation10 + $0x400] ss:$24 sps:$4 sm:$0xff]   ;;  %v8617_v43 = vld [vmem:[#allocation10 + $0xd4] ss:$24 sps:$4 sm:$0xff]  }
 0x1b1   :  { %4133 = vmatprep.subr.bf16.mxu1 %v8542_v44  ;;  %v8620_v44 = vld [vmem:[#allocation10 + $0x3d4] ss:$24 sps:$4 sm:$0xff]  }
 0x1b3   :  { %4091 = vmatpush1.bf16.msra.mxu0 %v8537_v48  ;;  %v8615_v48 = vld [vmem:[#allocation10 + $0xd0] ss:$24 sps:$4 sm:$0xff]  }
 0x1b4   :  { %4134 = vmatpush1.bf16.msra.mxu1 %v8540_v49  ;;  %4092 = vmatprep.subr.bf16.mxu0 %v8545_v50  ;;  %v8618_v49 = vld [vmem:[#allocation10 + $0x3d0] ss:$24 sps:$4 sm:$0xff]   ;;  %v8623_v50 = vld [vmem:[#allocation10 + $0xa4] ss:$24 sps:$4 sm:$0xff]  }
 0x1b5   :  { %4135 = vmatprep.subr.bf16.mxu1 %v8548_v51  ;;  %v8626_v51 = vld [vmem:[#allocation10 + $0x3a4] ss:$24 sps:$4 sm:$0xff]  }
 0x1b7   :  { %4093 = vmatpush1.bf16.msra.mxu0 %v8543_v56  ;;  %v8621_v56 = vld [vmem:[#allocation10 + $0xa0] ss:$24 sps:$4 sm:$0xff]  }
 0x1b8   :  { %4136 = vmatpush1.bf16.msra.mxu1 %v8546_v57  ;;  %4094 = vmatprep.subr.bf16.mxu0 %v8551_v58  ;;  %v8632_v57 = vld [vmem:[#allocation10 + $0x374] ss:$24 sps:$4 sm:$0xff]   ;;  %v8627_v58 = vld [vmem:[#allocation10 + $0x70] ss:$24 sps:$4 sm:$0xff]  }
 0x1b9   :  { %4137 = vmatprep.subr.bf16.mxu1 %v8554_v59  ;;  %v8630_v59 = vld [vmem:[#allocation10 + $0x370] ss:$24 sps:$4 sm:$0xff]  }
 0x1bb   :  { %4095 = vmatpush2.bf16.msra.mxu0 %v8549_v60  ;;  %v8635_v60 = vld [vmem:[#allocation10 + $0x44] ss:$24 sps:$4 sm:$0xff]  }
 0x1bc   :  { %4138 = vmatpush2.bf16.msra.mxu1 %v8552_v61  ;;  %4096 = vmatprep.subr.bf16.mxu0 %v8557_v62  ;;  %v8638_v61 = vld [vmem:[#allocation10 + $0x344] ss:$24 sps:$4 sm:$0xff]   ;;  %v8633_v62 = vld [vmem:[#allocation10 + $0x40] ss:$24 sps:$4 sm:$0xff]  }
 0x1bd   :  { %4139 = vmatprep.subr.bf16.mxu1 %v8560_v63  ;;  %v8636_v63 = vld [vmem:[#allocation10 + $0x340] ss:$24 sps:$4 sm:$0xff]  }
 0x1bf   :  { %4097 = vmatpush2.bf16.msra.mxu0 %v8555_v0  ;;  %v8641_v0 = vld [vmem:[#allocation10 + $0x14] ss:$24 sps:$4 sm:$0xff]  }
 0x1c0   :  { %4140 = vmatpush2.bf16.msra.mxu1 %v8558_v1  ;;  %4098 = vmatprep.subr.bf16.mxu0 %v8563_v2  ;;  %v8644_v1 = vld [vmem:[#allocation10 + $0x314] ss:$24 sps:$4 sm:$0xff]   ;;  %v8639_v2 = vld [vmem:[#allocation10 + $0x10] ss:$24 sps:$4 sm:$0xff]  }
 0x1c1   :  { %4141 = vmatprep.subr.bf16.mxu1 %v8566_v3  ;;  %v8642_v3 = vld [vmem:[#allocation10 + $0x310] ss:$24 sps:$4 sm:$0xff]  }
 0x1c3   :  { %4099 = vmatpush2.bf16.msra.mxu0 %v8561_v4  ;;  %v8647_v4 = vld [vmem:[#allocation10 + $0x2e4] ss:$24 sps:$4 sm:$0xff]  }
 0x1c4   :  { %4142 = vmatpush2.bf16.msra.mxu1 %v8564_v5  ;;  %4100 = vmatprep.subr.bf16.mxu0 %v8569_v6  ;;  %v8650_v5 = vld [vmem:[#allocation10 + $0x5e4] ss:$24 sps:$4 sm:$0xff]   ;;  %v8645_v6 = vld [vmem:[#allocation10 + $0x2e0] ss:$24 sps:$4 sm:$0xff]  }
 0x1c5   :  { %4143 = vmatprep.subr.bf16.mxu1 %v8572_v7  ;;  %v8648_v7 = vld [vmem:[#allocation10 + $0x5e0] ss:$24 sps:$4 sm:$0xff]  }
 0x1c7   :  { %4101 = vmatpush2.bf16.msra.mxu0 %v8567_v8  ;;  %v8653_v8 = vld [vmem:[#allocation10 + $0x2b4] ss:$24 sps:$4 sm:$0xff]  }
 0x1c8   :  { %4144 = vmatpush2.bf16.msra.mxu1 %v8570_v9  ;;  %4102 = vmatprep.subr.bf16.mxu0 %v8575_v10  ;;  %v8656_v9 = vld [vmem:[#allocation10 + $0x5b4] ss:$24 sps:$4 sm:$0xff]   ;;  %v8651_v10 = vld [vmem:[#allocation10 + $0x2b0] ss:$24 sps:$4 sm:$0xff]  }
 0x1c9   :  { %4145 = vmatprep.subr.bf16.mxu1 %v8578_v11  ;;  %v8654_v11 = vld [vmem:[#allocation10 + $0x5b0] ss:$24 sps:$4 sm:$0xff]  }
 0x1cb   :  { %4103 = vmatpush2.bf16.msra.mxu0 %v8573_v14  ;;  %v8659_v14 = vld [vmem:[#allocation10 + $0x284] ss:$24 sps:$4 sm:$0xff]  }
 0x1cc   :  { %4146 = vmatpush2.bf16.msra.mxu1 %v8576_v15  ;;  %4104 = vmatprep.subr.bf16.mxu0 %v8581_v16  ;;  %v8662_v15 = vld [vmem:[#allocation10 + $0x584] ss:$24 sps:$4 sm:$0xff]   ;;  %v8657_v16 = vld [vmem:[#allocation10 + $0x280] ss:$24 sps:$4 sm:$0xff]  }
 0x1cd   :  { %4147 = vmatprep.subr.bf16.mxu1 %v8584_v17  ;;  %v8660_v17 = vld [vmem:[#allocation10 + $0x580] ss:$24 sps:$4 sm:$0xff]  }
 0x1cf   :  { %4105 = vmatpush2.bf16.msra.mxu0 %v8579_v18  ;;  %v8665_v18 = vld [vmem:[#allocation10 + $0x254] ss:$24 sps:$4 sm:$0xff]  }
 0x1d0   :  { %4148 = vmatpush2.bf16.msra.mxu1 %v8582_v19  ;;  %4106 = vmatprep.subr.bf16.mxu0 %v8587_v20  ;;  %v8668_v19 = vld [vmem:[#allocation10 + $0x554] ss:$24 sps:$4 sm:$0xff]   ;;  %v8663_v20 = vld [vmem:[#allocation10 + $0x250] ss:$24 sps:$4 sm:$0xff]  }
 0x1d1   :  { %4149 = vmatprep.subr.bf16.mxu1 %v8590_v21  ;;  %v8666_v21 = vld [vmem:[#allocation10 + $0x550] ss:$24 sps:$4 sm:$0xff]  }
 0x1d3   :  { %4107 = vmatpush2.bf16.msra.mxu0 %v8585_v22  ;;  %v8671_v22 = vld [vmem:[#allocation10 + $0x224] ss:$24 sps:$4 sm:$0xff]  }
 0x1d4   :  { %4150 = vmatpush2.bf16.msra.mxu1 %v8588_v23  ;;  %4108 = vmatprep.subr.bf16.mxu0 %v8593_v24  ;;  %v8674_v23 = vld [vmem:[#allocation10 + $0x524] ss:$24 sps:$4 sm:$0xff]   ;;  %v8669_v24 = vld [vmem:[#allocation10 + $0x220] ss:$24 sps:$4 sm:$0xff]  }
 0x1d5   :  { %4151 = vmatprep.subr.bf16.mxu1 %v8596_v25  ;;  %v8672_v25 = vld [vmem:[#allocation10 + $0x520] ss:$24 sps:$4 sm:$0xff]  }
 0x1d7   :  { %4109 = vmatpush2.bf16.msra.mxu0 %v8591_v26  ;;  %v8677_v26 = vld [vmem:[#allocation10 + $0x1f4] ss:$24 sps:$4 sm:$0xff]  }
 0x1d8   :  { %4152 = vmatpush2.bf16.msra.mxu1 %v8594_v27  ;;  %4164 = vmatprep.subr.bf16.mxu0 %v8599_v30  ;;  %v8680_v27 = vld [vmem:[#allocation10 + $0x4f4] ss:$24 sps:$4 sm:$0xff]   ;;  %v8675_v30 = vld [vmem:[#allocation10 + $0x1f0] ss:$24 sps:$4 sm:$0xff]  }
 0x1d9   :  { %4207 = vmatprep.subr.bf16.mxu1 %v8602_v31  ;;  %v8678_v31 = vld [vmem:[#allocation10 + $0x4f0] ss:$24 sps:$4 sm:$0xff]  }
 0x1da   :  { %4111 = vmatmul.mubr.bf16.vlgmr.msra.gmra.mxu0 %v9401_v52 }
 0x1db   :  { %4154 = vmatmul.mubr.bf16.vlgmr.msra.gmra.mxu1 %v9403_v55  ;;  %4165 = vmatpush1.bf16.msra.mxu0 %v8597_v32  ;;  %v8683_v32 = vld [vmem:[#allocation10 + $0x1c4] ss:$24 sps:$4 sm:$0xff]  }
 0x1dc   :  { %4208 = vmatpush1.bf16.msra.mxu1 %v8600_v33  ;;  %4166 = vmatprep.subr.bf16.mxu0 %v8605_v34  ;;  %v8686_v33 = vld [vmem:[#allocation10 + $0x4c4] ss:$24 sps:$4 sm:$0xff]   ;;  %v8681_v34 = vld [vmem:[#allocation10 + $0x1c0] ss:$24 sps:$4 sm:$0xff]  }
 0x1dd   :  { %4209 = vmatprep.subr.bf16.mxu1 %v8608_v35  ;;  %4196 = vmatprep.mubr.bf16.mxu0 %v9371_v53  ;;  %v8624_v53 = vld [vmem:[#allocation10 + $0x3a0] ss:$24 sps:$4 sm:$0xff]  }
 0x1de   :  { %4239 = vmatprep.mubr.bf16.mxu1 %v9373_v54  ;;  %v8629_v54 = vld [vmem:[#allocation10 + $0x74] ss:$24 sps:$4 sm:$0xff]   ;;  %v8684_v35 = vld [vmem:[#allocation10 + $0x4c0] ss:$24 sps:$4 sm:$0xff]  }
 0x1df   :  { %4167 = vmatpush1.bf16.msra.mxu0 %v8603_v36  ;;  %v8689_v36 = vld [vmem:[#allocation10 + $0x194] ss:$24 sps:$4 sm:$0xff]  }
 0x1e0   :  { %4210 = vmatpush1.bf16.msra.mxu1 %v8606_v37  ;;  %4168 = vmatprep.subr.bf16.mxu0 %v8611_v38  ;;  %v8692_v37 = vld [vmem:[#allocation10 + $0x494] ss:$24 sps:$4 sm:$0xff]   ;;  %v8687_v38 = vld [vmem:[#allocation10 + $0x190] ss:$24 sps:$4 sm:$0xff]  }
 0x1e1   :  { %4211 = vmatprep.subr.bf16.mxu1 %v8614_v39  ;;  %v8690_v39 = vld [vmem:[#allocation10 + $0x490] ss:$24 sps:$4 sm:$0xff]  }
 0x1e3   :  { %4169 = vmatpush1.bf16.msra.mxu0 %v8609_v41  ;;  %v8695_v41 = vld [vmem:[#allocation10 + $0x764] ss:$24 sps:$4 sm:$0xff]  }
 0x1e4   :  { %4212 = vmatpush1.bf16.msra.mxu1 %v8612_v42  ;;  %4170 = vmatprep.subr.bf16.mxu0 %v8617_v43  ;;  %v8698_v42 = vld [vmem:[#allocation10 + $0xa64] ss:$24 sps:$4 sm:$0xff]   ;;  %v8693_v43 = vld [vmem:[#allocation10 + $0x760] ss:$24 sps:$4 sm:$0xff]  }
 0x1e5   :  { %4213 = vmatprep.subr.bf16.mxu1 %v8620_v44  ;;  %v8696_v44 = vld [vmem:[#allocation10 + $0xa60] ss:$24 sps:$4 sm:$0xff]  }
 0x1e7   :  { %4171 = vmatpush1.bf16.msra.mxu0 %v8615_v48  ;;  %v8701_v48 = vld [vmem:[#allocation10 + $0x734] ss:$24 sps:$4 sm:$0xff]  }
 0x1e8   :  { %4214 = vmatpush1.bf16.msra.mxu1 %v8618_v49  ;;  %4172 = vmatprep.subr.bf16.mxu0 %v8623_v50  ;;  %v8704_v49 = vld [vmem:[#allocation10 + $0xa34] ss:$24 sps:$4 sm:$0xff]   ;;  %v8699_v50 = vld [vmem:[#allocation10 + $0x730] ss:$24 sps:$4 sm:$0xff]  }
 0x1e9   :  { %4215 = vmatprep.subr.bf16.mxu1 %v8626_v51  ;;  %v8702_v51 = vld [vmem:[#allocation10 + $0xa30] ss:$24 sps:$4 sm:$0xff]  }
 0x1eb   :  { %4173 = vmatpush1.bf16.msra.mxu0 %v8621_v56  ;;  %v8707_v56 = vld [vmem:[#allocation10 + $0x704] ss:$24 sps:$4 sm:$0xff]  }
 0x1ec   :  { %4216 = vmatpush1.bf16.msra.mxu1 %v8624_v53  ;;  %4174 = vmatprep.subr.bf16.mxu0 %v8629_v54  ;;  %v8710_v53 = vld [vmem:[#allocation10 + $0xa04] ss:$24 sps:$4 sm:$0xff]   ;;  %v8705_v54 = vld [vmem:[#allocation10 + $0x700] ss:$24 sps:$4 sm:$0xff]  }
 0x1ed   :  { %4217 = vmatprep.subr.bf16.mxu1 %v8632_v57  ;;  %v8708_v57 = vld [vmem:[#allocation10 + $0xa00] ss:$24 sps:$4 sm:$0xff]  }
 0x1ef   :  { %4175 = vmatpush1.bf16.msra.mxu0 %v8627_v58  ;;  %v8713_v58 = vld [vmem:[#allocation10 + $0x6d4] ss:$24 sps:$4 sm:$0xff]  }
 0x1f0   :  { %4218 = vmatpush1.bf16.msra.mxu1 %v8630_v59  ;;  %4176 = vmatprep.subr.bf16.mxu0 %v8635_v60  ;;  %v8711_v59 = vld [vmem:[#allocation10 + $0x6d0] ss:$24 sps:$4 sm:$0xff]   ;;  %v8719_v60 = vld [vmem:[#allocation10 + $0x6a4] ss:$24 sps:$4 sm:$0xff]  }
 0x1f1   :  { %4219 = vmatprep.subr.bf16.mxu1 %v8638_v61  ;;  %v8722_v61 = vld [vmem:[#allocation10 + $0x9a4] ss:$24 sps:$4 sm:$0xff]  }
 0x1f3   :  { %4177 = vmatpush1.bf16.msra.mxu0 %v8633_v62  ;;  %v8717_v62 = vld [vmem:[#allocation10 + $0x6a0] ss:$24 sps:$4 sm:$0xff]  }
 0x1f4   :  { %4220 = vmatpush1.bf16.msra.mxu1 %v8636_v63  ;;  %4178 = vmatprep.subr.bf16.mxu0 %v8641_v0  ;;  %v8720_v63 = vld [vmem:[#allocation10 + $0x9a0] ss:$24 sps:$4 sm:$0xff]   ;;  %v8725_v0 = vld [vmem:[#allocation10 + $0x674] ss:$24 sps:$4 sm:$0xff]  }
 0x1f5   :  { %4221 = vmatprep.subr.bf16.mxu1 %v8644_v1  ;;  %v8726_v1 = vld [vmem:[#allocation10 + $0x970] ss:$24 sps:$4 sm:$0xff]  }
 0x1f7   :  { %4179 = vmatpush1.bf16.msra.mxu0 %v8639_v2  ;;  %v8731_v2 = vld [vmem:[#allocation10 + $0x644] ss:$24 sps:$4 sm:$0xff]  }
 0x1f8   :  { %4222 = vmatpush1.bf16.msra.mxu1 %v8642_v3  ;;  %4180 = vmatprep.subr.bf16.mxu0 %v8647_v4  ;;  %v8734_v3 = vld [vmem:[#allocation10 + $0x944] ss:$24 sps:$4 sm:$0xff]   ;;  %v8729_v4 = vld [vmem:[#allocation10 + $0x640] ss:$24 sps:$4 sm:$0xff]  }
 0x1f9   :  { %4223 = vmatprep.subr.bf16.mxu1 %v8650_v5  ;;  %v8732_v5 = vld [vmem:[#allocation10 + $0x940] ss:$24 sps:$4 sm:$0xff]  }
 0x1fb   :  { %4181 = vmatpush2.bf16.msra.mxu0 %v8645_v6  ;;  %v8737_v6 = vld [vmem:[#allocation10 + $0x614] ss:$24 sps:$4 sm:$0xff]  }
 0x1fc   :  { %4224 = vmatpush2.bf16.msra.mxu1 %v8648_v7  ;;  %4182 = vmatprep.subr.bf16.mxu0 %v8653_v8  ;;  %v8740_v7 = vld [vmem:[#allocation10 + $0x914] ss:$24 sps:$4 sm:$0xff]   ;;  %v8735_v8 = vld [vmem:[#allocation10 + $0x610] ss:$24 sps:$4 sm:$0xff]  }
 0x1fd   :  { %4225 = vmatprep.subr.bf16.mxu1 %v8656_v9  ;;  %v8738_v9 = vld [vmem:[#allocation10 + $0x910] ss:$24 sps:$4 sm:$0xff]  }
 0x1ff   :  { %4183 = vmatpush2.bf16.msra.mxu0 %v8651_v10  ;;  %v8743_v10 = vld [vmem:[#allocation10 + $0x8e4] ss:$24 sps:$4 sm:$0xff]  }
 0x200   :  { %4226 = vmatpush2.bf16.msra.mxu1 %v8654_v11  ;;  %4184 = vmatprep.subr.bf16.mxu0 %v8659_v14  ;;  %v8746_v11 = vld [vmem:[#allocation10 + $0xbe4] ss:$24 sps:$4 sm:$0xff]   ;;  %v8741_v14 = vld [vmem:[#allocation10 + $0x8e0] ss:$24 sps:$4 sm:$0xff]  }
 0x201   :  { %4227 = vmatprep.subr.bf16.mxu1 %v8662_v15  ;;  %v8744_v15 = vld [vmem:[#allocation10 + $0xbe0] ss:$24 sps:$4 sm:$0xff]  }
 0x203   :  { %4185 = vmatpush2.bf16.msra.mxu0 %v8657_v16  ;;  %v8749_v16 = vld [vmem:[#allocation10 + $0x8b4] ss:$24 sps:$4 sm:$0xff]  }
 0x204   :  { %4228 = vmatpush2.bf16.msra.mxu1 %v8660_v17  ;;  %4186 = vmatprep.subr.bf16.mxu0 %v8665_v18  ;;  %v8752_v17 = vld [vmem:[#allocation10 + $0xbb4] ss:$24 sps:$4 sm:$0xff]   ;;  %v8747_v18 = vld [vmem:[#allocation10 + $0x8b0] ss:$24 sps:$4 sm:$0xff]  }
 0x205   :  { %4229 = vmatprep.subr.bf16.mxu1 %v8668_v19  ;;  %v8750_v19 = vld [vmem:[#allocation10 + $0xbb0] ss:$24 sps:$4 sm:$0xff]  }
 0x207   :  { %4187 = vmatpush2.bf16.msra.mxu0 %v8663_v20  ;;  %v8755_v20 = vld [vmem:[#allocation10 + $0x884] ss:$24 sps:$4 sm:$0xff]  }
 0x208   :  { %4230 = vmatpush2.bf16.msra.mxu1 %v8666_v21  ;;  %4188 = vmatprep.subr.bf16.mxu0 %v8671_v22  ;;  %v8758_v21 = vld [vmem:[#allocation10 + $0xb84] ss:$24 sps:$4 sm:$0xff]   ;;  %v8753_v22 = vld [vmem:[#allocation10 + $0x880] ss:$24 sps:$4 sm:$0xff]  }
 0x209   :  { %4231 = vmatprep.subr.bf16.mxu1 %v8674_v23  ;;  %v8756_v23 = vld [vmem:[#allocation10 + $0xb80] ss:$24 sps:$4 sm:$0xff]  }
 0x20b   :  { %4189 = vmatpush2.bf16.msra.mxu0 %v8669_v24  ;;  %v8761_v24 = vld [vmem:[#allocation10 + $0x854] ss:$24 sps:$4 sm:$0xff]  }
 0x20c   :  { %4232 = vmatpush2.bf16.msra.mxu1 %v8672_v25  ;;  %4190 = vmatprep.subr.bf16.mxu0 %v8677_v26  ;;  %v8764_v25 = vld [vmem:[#allocation10 + $0xb54] ss:$24 sps:$4 sm:$0xff]   ;;  %v8759_v26 = vld [vmem:[#allocation10 + $0x850] ss:$24 sps:$4 sm:$0xff]  }
 0x20d   :  { %4233 = vmatprep.subr.bf16.mxu1 %v8680_v27  ;;  %v8762_v27 = vld [vmem:[#allocation10 + $0xb50] ss:$24 sps:$4 sm:$0xff]  }
 0x20f   :  { %4191 = vmatpush2.bf16.msra.mxu0 %v8675_v30  ;;  %v8767_v30 = vld [vmem:[#allocation10 + $0x824] ss:$24 sps:$4 sm:$0xff]  }
 0x210   :  { %4234 = vmatpush2.bf16.msra.mxu1 %v8678_v31  ;;  %4192 = vmatprep.subr.bf16.mxu0 %v8683_v32  ;;  %v8770_v31 = vld [vmem:[#allocation10 + $0xb24] ss:$24 sps:$4 sm:$0xff]   ;;  %v8765_v32 = vld [vmem:[#allocation10 + $0x820] ss:$24 sps:$4 sm:$0xff]  }
 0x211   :  { %4235 = vmatprep.subr.bf16.mxu1 %v8686_v33  ;;  %v8768_v33 = vld [vmem:[#allocation10 + $0xb20] ss:$24 sps:$4 sm:$0xff]  }
 0x213   :  { %4193 = vmatpush2.bf16.msra.mxu0 %v8681_v34  ;;  %v8773_v34 = vld [vmem:[#allocation10 + $0x7f4] ss:$24 sps:$4 sm:$0xff]  }
 0x214   :  { %4236 = vmatpush2.bf16.msra.mxu1 %v8684_v35  ;;  %4194 = vmatprep.subr.bf16.mxu0 %v8689_v36  ;;  %v8776_v35 = vld [vmem:[#allocation10 + $0xaf4] ss:$24 sps:$4 sm:$0xff]   ;;  %v8771_v36 = vld [vmem:[#allocation10 + $0x7f0] ss:$24 sps:$4 sm:$0xff]  }
 0x215   :  { %4237 = vmatprep.subr.bf16.mxu1 %v8692_v37  ;;  %v8774_v37 = vld [vmem:[#allocation10 + $0xaf0] ss:$24 sps:$4 sm:$0xff]  }
 0x217   :  { %4195 = vmatpush2.bf16.msra.mxu0 %v8687_v38  ;;  %v8779_v38 = vld [vmem:[#allocation10 + $0x7c4] ss:$24 sps:$4 sm:$0xff]  }
 0x218   :  { %4238 = vmatpush2.bf16.msra.mxu1 %v8690_v39  ;;  %4250 = vmatprep.subr.bf16.mxu0 %v8695_v41  ;;  %v8782_v39 = vld [vmem:[#allocation10 + $0xac4] ss:$24 sps:$4 sm:$0xff]   ;;  %v8777_v41 = vld [vmem:[#allocation10 + $0x7c0] ss:$24 sps:$4 sm:$0xff]  }
 0x219   :  { %4293 = vmatprep.subr.bf16.mxu1 %v8698_v42  ;;  %v8780_v42 = vld [vmem:[#allocation10 + $0xac0] ss:$24 sps:$4 sm:$0xff]  }
 0x21a   :  { %4197 = vmatmul.mubr.bf16.vlgmr.msra.gmra.mxu0 %v9377_v12  ;;  %v8716_v12 = vld [vmem:[#allocation10 + $0x9d4] ss:$24 sps:$4 sm:$0xff]  }
 0x21b   :  { %4240 = vmatmul.mubr.bf16.vlgmr.msra.gmra.mxu1 %v9379_v13  ;;  %4251 = vmatpush1.bf16.msra.mxu0 %v8693_v43  ;;  %v8714_v13 = vld [vmem:[#allocation10 + $0x9d0] ss:$24 sps:$4 sm:$0xff]   ;;  %v8785_v43 = vld [vmem:[#allocation10 + $0x794] ss:$24 sps:$4 sm:$0xff]  }
 0x21c   :  { %4294 = vmatpush1.bf16.msra.mxu1 %v8696_v44  ;;  %4252 = vmatprep.subr.bf16.mxu0 %v8701_v48  ;;  %v8788_v44 = vld [vmem:[#allocation10 + $0xa94] ss:$24 sps:$4 sm:$0xff]   ;;  %v8783_v48 = vld [vmem:[#allocation10 + $0x790] ss:$24 sps:$4 sm:$0xff]  }
 0x21d   :  { %4295 = vmatprep.subr.bf16.mxu1 %v8704_v49  ;;  %4282 = vmatprep.mubr.bf16.mxu0 %v9383_v45  ;;  %v8728_v45 = vld [vmem:[#allocation10 + $0x974] ss:$24 sps:$4 sm:$0xff]   ;;  %v8786_v49 = vld [vmem:[#allocation10 + $0xa90] ss:$24 sps:$4 sm:$0xff]  }
 0x21e   :  { %4325 = vmatprep.mubr.bf16.mxu1 %v9385_v47  ;;  %v8723_v47 = vld [vmem:[#allocation10 + $0x670] ss:$24 sps:$4 sm:$0xff]  }
 0x21f   :  { %4253 = vmatpush1.bf16.msra.mxu0 %v8699_v50  ;;  %v9425_v50 = vpop.f32.mrf.mxu0 }
 0x220   :  { %4296 = vmatpush1.bf16.msra.mxu1 %v8702_v51  ;;  %4254 = vmatprep.subr.bf16.mxu0 %v8707_v56  ;;  %v9427_v51 = vpop.f32.mrf.mxu1  ;;  %v8791_v56 = vld [vmem:[#allocation10 + $0xd64] ss:$24 sps:$4 sm:$0xff]  }
 0x221   :  { %4297 = vmatprep.subr.bf16.mxu1 %v8710_v53  ;;  %v8794_v53 = vld [vmem:[#allocation10 + $0x1064] ss:$24 sps:$4 sm:$0xff]  }
 0x223   :  { %4255 = vmatpush1.bf16.msra.mxu0 %v8705_v54  ;;  %v8789_v54 = vld [vmem:[#allocation10 + $0xd60] ss:$24 sps:$4 sm:$0xff]  }
 0x224   :  { %4298 = vmatpush1.bf16.msra.mxu1 %v8708_v57  ;;  %4256 = vmatprep.subr.bf16.mxu0 %v8713_v58  ;;  %v8792_v57 = vld [vmem:[#allocation10 + $0x1060] ss:$24 sps:$4 sm:$0xff]   ;;  %v9429_v58 = vpop.f32.mrf.mxu0 }
 0x225   :  { %4299 = vmatprep.subr.bf16.mxu1 %v8716_v12  ;;  %v9431_v12 = vpop.f32.mrf.mxu1 }
 0x227   :  { %4257 = vmatpush1.bf16.msra.mxu0 %v8711_v59  ;;  %v8797_v59 = vld [vmem:[#allocation10 + $0xd34] ss:$24 sps:$4 sm:$0xff]  }
 0x228   :  { %4300 = vmatpush1.bf16.msra.mxu1 %v8714_v13  ;;  %4258 = vmatprep.subr.bf16.mxu0 %v8719_v60  ;;  %v8800_v13 = vld [vmem:[#allocation10 + $0x1034] ss:$24 sps:$4 sm:$0xff]   ;;  %v8795_v60 = vld [vmem:[#allocation10 + $0xd30] ss:$24 sps:$4 sm:$0xff]  }
 0x229   :  { %4301 = vmatprep.subr.bf16.mxu1 %v8722_v61  ;;  %v8798_v61 = vld [vmem:[#allocation10 + $0x1030] ss:$24 sps:$4 sm:$0xff]  }
 0x22b   :  { %4259 = vmatpush1.bf16.msra.mxu0 %v8717_v62  ;;  %v9435_v62 = vpop.f32.mrf.mxu0 }
 0x22c   :  { %4302 = vmatpush1.bf16.msra.mxu1 %v8720_v63  ;;  %4260 = vmatprep.subr.bf16.mxu0 %v8725_v0  ;;  %v9437_v63 = vpop.f32.mrf.mxu1  ;;  %v8803_v0 = vld [vmem:[#allocation10 + $0xd04] ss:$24 sps:$4 sm:$0xff]  }
 0x22d   :  { %4303 = vmatprep.subr.bf16.mxu1 %v8728_v45  ;;  %v8806_v45 = vld [vmem:[#allocation10 + $0x1004] ss:$24 sps:$4 sm:$0xff]  }
 0x22f   :  { %4261 = vmatpush1.bf16.msra.mxu0 %v8723_v47  ;;  %v9441_v47 = vpop.f32.mrf.mxu0 }
 0x230   :  { %4304 = vmatpush1.bf16.msra.mxu1 %v8726_v1  ;;  %4262 = vmatprep.subr.bf16.mxu0 %v8731_v2  ;;  %v9443_v1 = vpop.f32.mrf.mxu1  ;;  %v8809_v2 = vld [vmem:[#allocation10 + $0xcd4] ss:$24 sps:$4 sm:$0xff]  }
 0x231   :  { %4305 = vmatprep.subr.bf16.mxu1 %v8734_v3  ;;  %v8812_v3 = vld [vmem:[#allocation10 + $0xfd4] ss:$24 sps:$4 sm:$0xff]  }
 0x233   :  { %4263 = vmatpush1.bf16.msra.mxu0 %v8729_v4  ;;  %v9445_v4 = vpop.f32.mrf.mxu0 }
 0x234   :  { %4306 = vmatpush1.bf16.msra.mxu1 %v8732_v5  ;;  %4264 = vmatprep.subr.bf16.mxu0 %v8737_v6  ;;  %v9447_v5 = vpop.f32.mrf.mxu1  ;;  %v8815_v6 = vld [vmem:[#allocation10 + $0xca4] ss:$24 sps:$4 sm:$0xff]  }
 0x235   :  { %4307 = vmatprep.subr.bf16.mxu1 %v8740_v7  ;;  %v8818_v7 = vld [vmem:[#allocation10 + $0xfa4] ss:$24 sps:$4 sm:$0xff]  }
 0x237   :  { %4265 = vmatpush1.bf16.msra.mxu0 %v8735_v8  ;;  %v9449_v8 = vpop.f32.mrf.mxu0 }
 0x238   :  { %4308 = vmatpush1.bf16.msra.mxu1 %v8738_v9  ;;  %4266 = vmatprep.subr.bf16.mxu0 %v8743_v10  ;;  %v9451_v9 = vpop.f32.mrf.mxu1  ;;  %v8813_v10 = vld [vmem:[#allocation10 + $0xca0] ss:$24 sps:$4 sm:$0xff]  }
 0x239   :  { %4309 = vmatprep.subr.bf16.mxu1 %v8746_v11  ;;  %v8816_v11 = vld [vmem:[#allocation10 + $0xfa0] ss:$24 sps:$4 sm:$0xff]  }
 0x23b   :  { %4267 = vmatpush2.bf16.msra.mxu0 %v8741_v14  ;;  %v8821_v14 = vld [vmem:[#allocation10 + $0xc74] ss:$24 sps:$4 sm:$0xff]  }
 0x23c   :  { %4310 = vmatpush2.bf16.msra.mxu1 %v8744_v15  ;;  %4268 = vmatprep.subr.bf16.mxu0 %v8749_v16  ;;  %v8824_v15 = vld [vmem:[#allocation10 + $0xf74] ss:$24 sps:$4 sm:$0xff]   ;;  %v9453_v16 = vpop.f32.mrf.mxu0 }
 0x23d   :  { %4311 = vmatprep.subr.bf16.mxu1 %v8752_v17  ;;  %v9455_v17 = vpop.f32.mrf.mxu1 }
 0x23f   :  { %4269 = vmatpush2.bf16.msra.mxu0 %v8747_v18  ;;  %v8819_v18 = vld [vmem:[#allocation10 + $0xc70] ss:$24 sps:$4 sm:$0xff]  }
 0x240   :  { %4312 = vmatpush2.bf16.msra.mxu1 %v8750_v19  ;;  %4270 = vmatprep.subr.bf16.mxu0 %v8755_v20  ;;  %v8822_v19 = vld [vmem:[#allocation10 + $0xf70] ss:$24 sps:$4 sm:$0xff]   ;;  %v8827_v20 = vld [vmem:[#allocation10 + $0xc44] ss:$24 sps:$4 sm:$0xff]  }
 0x241   :  { %4313 = vmatprep.subr.bf16.mxu1 %v8758_v21  ;;  %v8830_v21 = vld [vmem:[#allocation10 + $0xf44] ss:$24 sps:$4 sm:$0xff]  }
 0x243   :  { %4271 = vmatpush2.bf16.msra.mxu0 %v8753_v22  ;;  %v9457_v22 = vpop.f32.mrf.mxu0 }
 0x244   :  { %4314 = vmatpush2.bf16.msra.mxu1 %v8756_v23  ;;  %4272 = vmatprep.subr.bf16.mxu0 %v8761_v24  ;;  %v9459_v23 = vpop.f32.mrf.mxu1  ;;  %v8825_v24 = vld [vmem:[#allocation10 + $0xc40] ss:$24 sps:$4 sm:$0xff]  }
 0x245   :  { %4315 = vmatprep.subr.bf16.mxu1 %v8764_v25  ;;  %v8828_v25 = vld [vmem:[#allocation10 + $0xf40] ss:$24 sps:$4 sm:$0xff]  }
 0x247   :  { %4273 = vmatpush2.bf16.msra.mxu0 %v8759_v26  ;;  %v738_v26 = vlaneseq }
 0x248   :  { %4316 = vmatpush2.bf16.msra.mxu1 %v8762_v27  ;;  %4274 = vmatprep.subr.bf16.mxu0 %v8767_v30  ;;  %v9461_v27 = vpop.f32.mrf.mxu0  ;;  %v9463_v30 = vpop.f32.mrf.mxu1 }
 0x249   :  { %4317 = vmatprep.subr.bf16.mxu1 %v8770_v31  ;;  %v8833_v31 = vld [vmem:[#allocation10 + $0xc14] ss:$24 sps:$4 sm:$0xff]  }
 0x24b   :  { %4275 = vmatpush2.bf16.msra.mxu0 %v8765_v32  ;;  %v8836_v32 = vld [vmem:[#allocation10 + $0xf14] ss:$24 sps:$4 sm:$0xff]  }
 0x24c   :  { %4318 = vmatpush2.bf16.msra.mxu1 %v8768_v33  ;;  %4276 = vmatprep.subr.bf16.mxu0 %v8773_v34  ;;  %v8831_v33 = vld [vmem:[#allocation10 + $0xc10] ss:$24 sps:$4 sm:$0xff]  }
 0x24d   :  { %4319 = vmatprep.subr.bf16.mxu1 %v8776_v35  ;;  %v8834_v34 = vld [vmem:[#allocation10 + $0xf10] ss:$24 sps:$4 sm:$0xff]   ;;  %v9465_v35 = vshrl.u32 %v738_v26, 7 }
 0x24f   :  { %4277 = vmatpush2.bf16.msra.mxu0 %v8771_v36  ;;  %v9467_v36 = vpop.f32.mrf.mxu0 }
 0x250   :  { %4320 = vmatpush2.bf16.msra.mxu1 %v8774_v37  ;;  %4278 = vmatprep.subr.bf16.mxu0 %v8779_v38  ;;  %v9469_v37 = vpop.f32.mrf.mxu1  ;;  %v8839_v38 = vld [vmem:[#allocation10 + $0xee4] ss:$24 sps:$4 sm:$0xff]  }
 0x251   :  { %4321 = vmatprep.subr.bf16.mxu1 %v8782_v39  ;;  %v8842_v39 = vld [vmem:[#allocation10 + $0x11e4] ss:$24 sps:$4 sm:$0xff]  }
 0x253   :  { %4279 = vmatpush2.bf16.msra.mxu0 %v8777_v41  ;;  %v8837_v41 = vld [vmem:[#allocation10 + $0xee0] ss:$24 sps:$4 sm:$0xff]  }
 0x254   :  { %4322 = vmatpush2.bf16.msra.mxu1 %v8780_v42  ;;  %4280 = vmatprep.subr.bf16.mxu0 %v8785_v43  ;;  %v8840_v42 = vld [vmem:[#allocation10 + $0x11e0] ss:$24 sps:$4 sm:$0xff]   ;;  %v744_v43 = vsub.s32 1, %v9465_v35 }
 0x255   :  { %4323 = vmatprep.subr.bf16.mxu1 %v8788_v44  ;;  %v9472_v44 = vpop.f32.mrf.mxu0 }
 0x257   :  { %4281 = vmatpush2.bf16.msra.mxu0 %v8783_v48  ;;  %v9474_v48 = vpop.f32.mrf.mxu1 }
 0x258   :  { %4324 = vmatpush2.bf16.msra.mxu1 %v8786_v49  ;;  %4336 = vmatprep.subr.bf16.mxu0 %v8791_v56  ;;  %v8845_v49 = vld [vmem:[#allocation10 + $0xeb4] ss:$24 sps:$4 sm:$0xff]  }
 0x259   :  { %4379 = vmatprep.subr.bf16.mxu1 %v8794_v53  ;;  %v8848_v56 = vld [vmem:[#allocation10 + $0x11b4] ss:$24 sps:$4 sm:$0xff]  }
 0x25a   :  { %4283 = vmatmul.mubr.bf16.vlgmr.msra.gmra.mxu0 %v9389_v28  ;;  %v8801_v28 = vld [vmem:[#allocation10 + $0xd00] ss:$24 sps:$4 sm:$0xff]  }
 0x25b   :  { %4326 = vmatmul.mubr.bf16.vlgmr.msra.gmra.mxu1 %v9391_v29  ;;  %4337 = vmatpush1.bf16.msra.mxu0 %v8789_v54  ;;  %v8804_v29 = vld [vmem:[#allocation10 + $0x1000] ss:$24 sps:$4 sm:$0xff]   ;;  %v740_v54 = vsub.s32 0, %v9465_v35 }
 0x25c   :  { %4380 = vmatpush1.bf16.msra.mxu1 %v8792_v57  ;;  %4338 = vmatprep.subr.bf16.mxu0 %v8797_v59  ;;  %v9476_v53 = vld [vmem:[#allocation13] ss:$2 sm:$0x3f] }
 0x25d   :  { %4381 = vmatprep.subr.bf16.mxu1 %v8800_v13  ;;  %4368 = vmatprep.mubr.bf16.mxu0 %v9395_v40  ;;  %v8807_v40 = vld [vmem:[#allocation10 + $0xcd0] ss:$24 sps:$4 sm:$0xff]   ;;  %v745_v13 = vrot.slane %v9476_v53, %v744_v43 }
 0x25e   :  { %4411 = vmatprep.mubr.bf16.mxu1 %v9397_v46  ;;  %v8810_v46 = vld [vmem:[#allocation10 + $0xfd0] ss:$24 sps:$4 sm:$0xff]  }
 0x25f   :  { %4339 = vmatpush1.bf16.msra.mxu0 %v8795_v60  ;;  %v8843_v57 = vld [vmem:[#allocation10 + $0xeb0] ss:$24 sps:$4 sm:$0xff]   ;;  %v3860_v60 = vpop.f32.mrf.mxu0 }
 0x260   :  { %4382 = vmatpush1.bf16.msra.mxu1 %v8798_v61  ;;  %4340 = vmatprep.subr.bf16.mxu0 %v8803_v0  ;;  %v8846_v59 = vld [vmem:[#allocation10 + $0x11b0] ss:$24 sps:$4 sm:$0xff]   ;;  %v9482_v61 = vpop.f32.mrf.mxu1  ;;  %v8851_v0 = vld [vmem:[#allocation10 + $0xe84] ss:$24 sps:$4 sm:$0xff]  }
 0x261   :  { %4383 = vmatprep.subr.bf16.mxu1 %v8806_v45  ;;  %v8854_v45 = vld [vmem:[#allocation10 + $0x1184] ss:$24 sps:$4 sm:$0xff]  }
 0x263   :  { %4341 = vmatpush1.bf16.msra.mxu0 %v8801_v28  ;;  %v3689_v28 = vadd.f32 %v9441_v47, %v745_v13 }
 0x264   :  { %4384 = vmatpush1.bf16.msra.mxu1 %v8804_v29  ;;  %4342 = vmatprep.subr.bf16.mxu0 %v8809_v2  ;;  %v9485_v29 = vpop.f32.mrf.mxu0  ;;  %v9487_v2 = vpop.f32.mrf.mxu1 }
 0x265   :  { %4385 = vmatprep.subr.bf16.mxu1 %v8812_v3  ;;  %v741_v3 = vrot.slane %v9476_v53, %v740_v54 }
 0x267   :  { %4343 = vmatpush1.bf16.msra.mxu0 %v8807_v40  ;;  %v8849_v40 = vld [vmem:[#allocation10 + $0xe80] ss:$24 sps:$4 sm:$0xff]   ;;  %v3687_v47 = vadd.f32 %v9435_v62, %v741_v3  ;;  %v8866_v62 = vld [vmem:[#allocation10 + $0x1124] ss:$24 sps:$4 sm:$0xff]  }
 0x268   :  { %4386 = vmatpush1.bf16.msra.mxu1 %v8810_v46  ;;  %4344 = vmatprep.subr.bf16.mxu0 %v8815_v6  ;;  %v8852_v46 = vld [vmem:[#allocation10 + $0x1180] ss:$24 sps:$4 sm:$0xff]   ;;  %v3685_v6 = vadd.f32 %v9429_v58, %v745_v13 }
 0x269   :  { %4387 = vmatprep.subr.bf16.mxu1 %v8818_v7  ;;  %v8857_v7 = vld [vmem:[#allocation10 + $0xe54] ss:$24 sps:$4 sm:$0xff]  }
 0x26a   :  { %v3728_v58 = vadd.f32 %v9431_v12, %v3685_v6  ;;  %v8861_v12 = vld [vmem:[#allocation10 + $0xe20] ss:$24 sps:$4 sm:$0xff]   ;;  %v8881_v6 = vld [vmem:[#allocation10 + $0xd94] ss:$24 sps:$4 sm:$0xff]  }
 0x26b   :  { %4345 = vmatpush1.bf16.msra.mxu0 %v8813_v10  ;;  %v8860_v10 = vld [vmem:[#allocation10 + $0x1154] ss:$24 sps:$4 sm:$0xff]  }
 0x26c   :  { %4388 = vmatpush1.bf16.msra.mxu1 %v8816_v11  ;;  %4346 = vmatprep.subr.bf16.mxu0 %v8821_v14  ;;  %v3732_v11 = vadd.f32 %v9443_v1, %v3689_v28  ;;  %v9495_v14 = vpop.f32.mrf.mxu0  ;;  %v3730_v1 = vadd.f32 %v9437_v63, %v3687_v47 }
 0x26d   :  { %4389 = vmatprep.subr.bf16.mxu1 %v8824_v15  ;;  %v9497_v15 = vpop.f32.mrf.mxu1 }
 0x26e   :  { %v3944_v26 = vpop.f32.mrf.mxu0 }
 0x26f   :  { %4347 = vmatpush1.bf16.msra.mxu0 %v8819_v18  ;;  %v3683_v18 = vadd.f32 %v9425_v50, %v741_v3  ;;  %v8873_v3 = vld [vmem:[#allocation10 + $0xdc0] ss:$24 sps:$4 sm:$0xff]  }
 0x270   :  { %4390 = vmatpush1.bf16.msra.mxu1 %v8822_v19  ;;  %4348 = vmatprep.subr.bf16.mxu0 %v8827_v20  ;;  %v8855_v19 = vld [vmem:[#allocation10 + $0xe50] ss:$24 sps:$4 sm:$0xff]  }
 0x271   :  { %4391 = vmatprep.subr.bf16.mxu1 %v8830_v21  ;;  %v8858_v20 = vld [vmem:[#allocation10 + $0x1150] ss:$24 sps:$4 sm:$0xff]   ;;  %v3775_v21 = vadd.f32 %v9457_v22, %v3732_v11  ;;  %v3726_v50 = vadd.f32 %v9427_v51, %v3683_v18  ;;  %v748_v51 = vsub.s32 2, %v9465_v35 }
 0x272   :  { %v8879_v18 = vld [vmem:[#allocation10 + $0xd90] ss:$24 sps:$4 sm:$0xff]  }
 0x273   :  { %4349 = vmatpush1.bf16.msra.mxu0 %v8825_v24  ;;  %v8863_v24 = vld [vmem:[#allocation10 + $0xe24] ss:$24 sps:$4 sm:$0xff]   ;;  %v3818_v22 = vadd.f32 %v9459_v23, %v3775_v21  ;;  %v3769_v63 = vadd.f32 %v9445_v4, %v3726_v50  ;;  %v8867_v23 = vld [vmem:[#allocation10 + $0xdf0] ss:$24 sps:$4 sm:$0xff]  }
 0x274   :  { %4392 = vmatpush1.bf16.msra.mxu1 %v8828_v25  ;;  %4350 = vmatprep.subr.bf16.mxu0 %v8833_v31  ;;  %v3771_v25 = vadd.f32 %v9449_v8, %v3728_v58  ;;  %v9504_v31 = vpop.f32.mrf.mxu1  ;;  %v752_v8 = vsub.s32 3, %v9465_v35  ;;  %v8875_v4 = vld [vmem:[#allocation10 + $0xdc4] ss:$24 sps:$4 sm:$0xff]  }
 0x275   :  { %4393 = vmatprep.subr.bf16.mxu1 %v8836_v32  ;;  %v3773_v32 = vadd.f32 %v9453_v16, %v3730_v1  ;;  %v3946_v16 = vpop.f32.mrf.mxu0 }
 0x277   :  { %4351 = vmatpush1.bf16.msra.mxu0 %v8831_v33  ;;  %v8864_v33 = vld [vmem:[#allocation10 + $0x1120] ss:$24 sps:$4 sm:$0xff]  }
 0x278   :  { %4394 = vmatpush1.bf16.msra.mxu1 %v8834_v34  ;;  %4352 = vmatprep.subr.bf16.mxu0 %v8839_v38  ;;  %v8869_v34 = vld [vmem:[#allocation10 + $0xdf4] ss:$24 sps:$4 sm:$0xff]  }
 0x279   :  { %4395 = vmatprep.subr.bf16.mxu1 %v8842_v39  ;;  %v8872_v38 = vld [vmem:[#allocation10 + $0x10f4] ss:$24 sps:$4 sm:$0xff]   ;;  %v3814_v39 = vadd.f32 %v9451_v9, %v3771_v25  ;;  %v8878_v9 = vld [vmem:[#allocation10 + $0x10c4] ss:$24 sps:$4 sm:$0xff]  }
 0x27b   :  { %4353 = vmatpush2.bf16.msra.mxu0 %v8837_v41  ;;  %v3861_v41 = vadd.f32 %v3860_v60, %v3818_v22  ;;  %v3812_v60 = vadd.f32 %v9447_v5, %v3769_v63 }
 0x27c   :  { %4396 = vmatpush2.bf16.msra.mxu1 %v8840_v42  ;;  %4354 = vmatprep.subr.bf16.mxu0 %v8845_v49  ;;  %v3989_v42 = vpop.f32.mrf.mxu1  ;;  %v3816_v49 = vadd.f32 %v9455_v17, %v3773_v32  ;;  %v753_v17 = vrot.slane %v9476_v53, %v752_v8 }
 0x27d   :  { %4397 = vmatprep.subr.bf16.mxu1 %v8848_v56  ;;  %v8870_v56 = vld [vmem:[#allocation10 + $0x10f0] ss:$24 sps:$4 sm:$0xff]   ;;  %v3855_v28 = vadd.f32 %v9461_v27, %v3812_v60 }
 0x27e   :  { %v9515_v13 = vpop.f32.mrf.mxu1 }
 0x27f   :  { %4355 = vmatpush2.bf16.msra.mxu0 %v8843_v57  ;;  %v3857_v57 = vadd.f32 %v9467_v36, %v3814_v39  ;;  %v749_v36 = vrot.slane %v9476_v53, %v748_v51  ;;  %v9539_v11 = vadd.f32 %v9463_v30, %v3855_v28 }
 0x280   :  { %4398 = vmatpush2.bf16.msra.mxu1 %v8846_v59  ;;  %4356 = vmatprep.subr.bf16.mxu0 %v8851_v0  ;;  %v4026_v59 = vpop.f32.mrf.mxu0  ;;  %v3859_v0 = vadd.f32 %v9472_v44, %v3816_v49 }
 0x281   :  { %4399 = vmatprep.subr.bf16.mxu1 %v8854_v45  ;;  %v9523_v45 = vadd.f32 %v9482_v61, %v3861_v41  ;;  %v9530_v5 = vadd.f32 %v9469_v37, %v3857_v57  ;;  %v8884_v61 = vld [vmem:[#allocation10 + $0x1094] ss:$24 sps:$4 sm:$0xff]   ;;  %v3941_v47 = vadd.f32 %v9485_v29, %v749_v36  ;;  %v3945_v37 = vadd.f32 %v3944_v26, %v749_v36 }
 0x282   :  { %v4028_v44 = vpop.f32.mrf.mxu0 }
 0x283   :  { %4357 = vmatpush2.bf16.msra.mxu0 %v8849_v40  ;;  %v8876_v40 = vld [vmem:[#allocation10 + $0x10c0] ss:$24 sps:$4 sm:$0xff]   ;;  %v4429_v27 = vmax.f32 %v9523_v45, 0.0  ;;  %v3984_v29 = vadd.f32 %v9487_v2, %v3941_v47  ;;  %v3988_v1 = vadd.f32 %v9504_v31, %v3945_v37  ;;  %v8889_v47 = vld [vmem:[#allocation8 + $0x30] sm:$0xff]   ;;  %v8890_v37 = vld [vmem:[#allocation8 + $0x68] sm:$0xff]  }
 0x284   :  { %4400 = vmatpush2.bf16.msra.mxu1 %v8852_v46  ;;  %4358 = vmatprep.subr.bf16.mxu0 %v8857_v7  ;;  %v4071_v46 = vpop.f32.mrf.mxu1  ;;  %v9533_v7 = vadd.f32 %v9474_v48, %v3859_v0  ;;  %v4030_v58 = vpop.f32.mrf.mxu0  ;;  %v8905_v45 = vld [vmem:[#allocation8 + $0xb0] sm:$0xff]  }
 0x285   :  { %4401 = vmatprep.subr.bf16.mxu1 %v8860_v10  ;;  %v3943_v10 = vadd.f32 %v9495_v14, %v753_v17  ;;  %v4027_v26 = vadd.f32 %v4026_v59, %v3984_v29  ;;  %v8898_v29 = vld [vmem:[#allocation8 + $0x48] sm:$0xff]  }
 0x286   :  { %v4073_v21 = vpop.f32.mrf.mxu1  ;;  %v4428_v48 = vmax.f32 %v9533_v7, 0.0  ;;  %v4032_v50 = vpop.f32.mrf.mxu0  ;;  %v8920_v7 = vld [vmem:[#allocation8 + $0x170] sm:$0xff]  }
 0x287   :  { %4359 = vmatpush2.bf16.msra.mxu0 %v8855_v19  ;;  %v8882_v19 = vld [vmem:[#allocation10 + $0x1090] ss:$24 sps:$4 sm:$0xff]   ;;  %v3986_v14 = vadd.f32 %v9497_v15, %v3943_v10  ;;  %v4070_v63 = vadd.f32 %v9515_v13, %v4027_v26  ;;  %v8901_v26 = vld [vmem:[#allocation8] sm:$0xff]  }
 0x288   :  { %4402 = vmatpush2.bf16.msra.mxu1 %v8858_v20  ;;  %4360 = vmatprep.subr.bf16.mxu0 %v8863_v24  ;;  %v4423_v20 = vmax.f32 %v9530_v5, 0.0  ;;  %v3947_v24 = vadd.f32 %v3946_v16, %v753_v17  ;;  %v4075_v32 = vpop.f32.mrf.mxu1  ;;  %v8888_v10 = vld [vmem:[#allocation8 + $0x70] sm:$0xff]  }
 0x289   :  { %4403 = vmatprep.subr.bf16.mxu1 %v8866_v62  ;;  %v4422_v62 = vmax.f32 %v9539_v11, 0.0  ;;  %v4029_v25 = vadd.f32 %v4028_v44, %v3986_v14  ;;  %v8895_v14 = vld [vmem:[#allocation8 + $0x18] sm:$0xff]   ;;  %v8921_v11 = vld [vmem:[#allocation8 + $0x130] sm:$0xff]  }
 0x28a   :  { %v4435_v30 = vpack.c.bf16 %v4429_v27, %v4423_v20 }
 0x28b   :  { %4361 = vmatpush2.bf16.msra.mxu0 %v8861_v12  ;;  %v4434_v15 = vpack.c.bf16 %v4428_v48, %v4422_v62  ;;  %v3990_v12 = vadd.f32 %v3989_v42, %v3947_v24  ;;  %v4072_v31 = vadd.f32 %v4071_v46, %v4029_v25  ;;  %v8886_v46 = vld [vmem:[#allocation8 + $0x78] sm:$0xff]   ;;  %v8896_v24 = vld [vmem:[#allocation8 + $0x50] sm:$0xff]   ;;  %v8900_v25 = vld [vmem:[#allocation8 + $0x40] sm:$0xff]  }
 0x28c   :  { %4404 = vmatpush2.bf16.msra.mxu1 %v8864_v33  ;;  %4362 = vmatprep.subr.bf16.mxu0 %v8869_v34  ;;  %v4031_v33 = vadd.f32 %v4030_v58, %v3988_v1  ;;  %v8893_v58 = vld [vmem:[#allocation8 + $0x20] sm:$0xff]   ;;  %v8899_v1 = vld [vmem:[#allocation8 + $0x8] sm:$0xff]  }
 0x28d   :  { %4405 = vmatprep.subr.bf16.mxu1 %v8872_v38  ;;  %v4033_v34 = vadd.f32 %v4032_v50, %v3990_v12  ;;  %v9297_v38 = vmov 0   ;;  %v8918_v50 = vld [vmem:[#allocation8 + $0x178] sm:$0xff]  }
 0x28e   :  { %v4074_v16 = vadd.f32 %v4073_v21, %v4031_v33  ;;  %v8894_v21 = vld [vmem:[#allocation8 + $0x58] sm:$0xff]  }
 0x28f   :  { %4363 = vmatpush2.bf16.msra.mxu0 %v8867_v23 }
 0x290   :  { %4406 = vmatpush2.bf16.msra.mxu1 %v8870_v56  ;;  %4364 = vmatprep.subr.bf16.mxu0 %v8875_v4 }
 0x291   :  { %4407 = vmatprep.subr.bf16.mxu1 %v8878_v9 }
 0x293   :  { %4365 = vmatpush2.bf16.msra.mxu0 %v8873_v3 }
 0x294   :  { %4408 = vmatpush2.bf16.msra.mxu1 %v8876_v40  ;;  %4366 = vmatprep.subr.bf16.mxu0 %v8881_v6 }
 0x295   :  { %4409 = vmatprep.subr.bf16.mxu1 %v8884_v61  ;;  %v8887_v61 = vld [vmem:[#allocation8 + $0x38] sm:$0xff]  }
 0x297   :  { %4367 = vmatpush2.bf16.msra.mxu0 %v8879_v18  ;;  %v8891_v18 = vld [vmem:[#allocation8 + $0x28] sm:$0xff]  }
 0x298   :  { %4410 = vmatpush2.bf16.msra.mxu1 %v8882_v19  ;;  %4463 = vmatprep.subr.bf16.mxu0 %v4435_v30  ;;  %v8892_v19 = vld [vmem:[#allocation8 + $0x60] sm:$0xff]   ;;  %v8897_v30 = vld [vmem:[#allocation8 + $0x10] sm:$0xff]  }
 0x29a   :  { %v4112_v22 = vpop.f32.mrf.mxu0  ;;  %4369 = vmatmul.mubr.bf16.vlgmr.msra.gmra.mxu0 %v9401_v52  ;;  %v9560_v52 = vld [vmem:[#allocation5] sm:$0xff]  }
 0x29b   :  { %v4155_v2 = vpop.f32.mrf.mxu1  ;;  %4412 = vmatmul.mubr.bf16.vlgmr.msra.gmra.mxu1 %v9403_v55  ;;  %4464 = vmatpush1.bf16.msra.mxu0 %v4434_v15  ;;  %v4113_v49 = vadd.f32 %v4112_v22, %v4070_v63  ;;  %v4076_v55 = vadd.f32 %v4075_v32, %v4033_v34  ;;  %v756_v34 = vsub.s32 4, %v9465_v35 }
 0x29c   :  { %4481 = vmatprep.mubr.bf16.mxu0 %v9297_v38  ;;  %v4114_v39 = vpop.f32.mrf.mxu0  ;;  %4524 = vmatprep.mubr.bf16.mxu1 %v9297_v38 }
 0x29d   :  { %v4157_v41 = vpop.f32.mrf.mxu1  ;;  %v4115_v42 = vadd.f32 %v4114_v39, %v4072_v31  ;;  %v9566_v60 = vadd.f32 %v4155_v2, %v4113_v49  ;;  %v760_v31 = vsub.s32 5, %v9465_v35  ;;  %v757_v49 = vrot.slane %v9476_v53, %v756_v34 }
 0x29e   :  { %v4116_v23 = vpop.f32.mrf.mxu0 }
 0x29f   :  { %v4159_v56 = vpop.f32.mrf.mxu1  ;;  %v4117_v57 = vadd.f32 %v4116_v23, %v4074_v16  ;;  %v9562_v4 = vadd.f32 %v4157_v41, %v4115_v42  ;;  %v4424_v40 = vmax.f32 %v9566_v60, 0.0  ;;  %v761_v42 = vrot.slane %v9476_v53, %v760_v31  ;;  %v8935_v60 = vld [vmem:[#allocation8 + $0x230] sm:$0xff]  }
 0x2a0   :  { %v4118_v59 = vpop.f32.mrf.mxu0 }
 0x2a1   :  { %v9564_v9 = vadd.f32 %v4159_v56, %v4117_v57  ;;  %v4119_v13 = vadd.f32 %v4118_v59, %v4076_v55  ;;  %v4161_v0 = vpop.f32.mrf.mxu1  ;;  %v4425_v28 = vmax.f32 %v9562_v4, 0.0  ;;  %v8912_v4 = vld [vmem:[#allocation8 + $0xd0] sm:$0xff]  }
 0x2a2   :  { %7500 = vmatmul.mubr.msk.bf16.vlgmr.msra.gmra.mxu0 %vm4445_vm0, %v9560_v52 }
 0x2a3   :  { %v9570_v17 = vadd.f32 %v4161_v0, %v4119_v13  ;;  %4567 = vmatprep.mubr.bf16.mxu0 %v9297_v38  ;;  %v4430_v36 = vmax.f32 %v9564_v9, 0.0  ;;  %v8934_v9 = vld [vmem:[#allocation8 + $0x238] sm:$0xff]  }
 0x2a5   :  { %v4431_v3 = vmax.f32 %v9570_v17, 0.0  ;;  %v4436_v6 = vpack.c.bf16 %v4430_v36, %v4424_v40  ;;  %v8913_v17 = vld [vmem:[#allocation8 + $0x90] sm:$0xff]  }
 0x2a7   :  { %v4437_v44 = vpack.c.bf16 %v4431_v3, %v4425_v28 }
 0x2a9   :  { %4506 = vmatprep.subr.bf16.mxu1 %v4437_v44 }
 0x2aa   :  { %4507 = vmatpush1.bf16.msra.mxu1 %v4436_v6 }
 0x2ab   :  { %7684 = vmatprep.subr.bf16.mxu1 %v8886_v46 }
 0x2ad   :  { %7501 = vmatmul.mubr.msk.bf16.vlgmr.msra.gmra.mxu1 %vm4445_vm0, %v9560_v52 }
 0x2ae   :  { %7685 = vmatpush3.bf16.msra.mxu1 %v8887_v61 }
 0x2af   :  { %7686 = vmatprep.subr.bf16.mxu1 %v8888_v10 }
 0x2b2   :  { %7687 = vmatpush3.bf16.msra.mxu1 %v8889_v47 }
 0x2b3   :  { %7688 = vmatprep.subr.bf16.mxu1 %v8890_v37 }
 0x2b6   :  { %7689 = vmatpush3.bf16.msra.mxu1 %v8891_v18 }
 0x2b7   :  { %7690 = vmatprep.subr.bf16.mxu1 %v8892_v19 }
 0x2ba   :  { %7691 = vmatpush3.bf16.msra.mxu1 %v8893_v58 }
 0x2bb   :  { %7692 = vmatprep.subr.bf16.mxu1 %v8894_v21 }
 0x2be   :  { %7693 = vmatpush3.bf16.msra.mxu1 %v8895_v14 }
 0x2bf   :  { %7694 = vmatprep.subr.bf16.mxu1 %v8896_v24 }
 0x2c2   :  { %7695 = vmatpush3.bf16.msra.mxu1 %v8897_v30 }
 0x2c3   :  { %7696 = vmatprep.subr.bf16.mxu1 %v8898_v29 }
 0x2c6   :  { %7697 = vmatpush3.bf16.msra.mxu1 %v8899_v1 }
 0x2c7   :  { %7698 = vmatprep.subr.bf16.mxu1 %v8900_v25 }
 0x2ca   :  { %7699 = vmatpush3.bf16.msra.mxu1 %v8901_v26 }
 0x2cb   :  { %7728 = vmatprep.subr.bf16.mxu1 %v8918_v50 }
 0x2da   :  { %v4198_v32 = vpop.f32.mrf.mxu0 }
 0x2db   :  { %v4241_v15 = vpop.f32.mrf.mxu1  ;;  %v4199_v57 = vadd.f32 %v4198_v32, %v757_v49 }
 0x2dc   :  { %v4200_v12 = vpop.f32.mrf.mxu0 }
 0x2dd   :  { %v4243_v33 = vpop.f32.mrf.mxu1  ;;  %v4201_v55 = vadd.f32 %v4200_v12, %v761_v42  ;;  %v4242_v6 = vadd.f32 %v4241_v15, %v4199_v57 }
 0x2de   :  { %v4202_v22 = vpop.f32.mrf.mxu0 }
 0x2df   :  { %v4245_v2 = vpop.f32.mrf.mxu1  ;;  %v4203_v59 = vadd.f32 %v4202_v22, %v757_v49  ;;  %v4244_v44 = vadd.f32 %v4243_v33, %v4201_v55 }
 0x2e0   :  { %v4204_v63 = vpop.f32.mrf.mxu0 }
 0x2e1   :  { %v4247_v39 = vpop.f32.mrf.mxu1  ;;  %v4205_v46 = vadd.f32 %v4204_v63, %v761_v42  ;;  %v4246_v61 = vadd.f32 %v4245_v2, %v4203_v59 }
 0x2e3   :  { %v4248_v19 = vadd.f32 %v4247_v39, %v4205_v46 }
 0x31a   :  { %v4284_v41 = vpop.f32.mrf.mxu0 }
 0x31b   :  { %v4327_v16 = vpop.f32.mrf.mxu1  ;;  %v4285_v47 = vadd.f32 %v4284_v41, %v4242_v6 }
 0x31c   :  { %v4286_v23 = vpop.f32.mrf.mxu0 }
 0x31d   :  { %v4329_v56 = vpop.f32.mrf.mxu1  ;;  %v4287_v10 = vadd.f32 %v4286_v23, %v4244_v44  ;;  %v4328_v30 = vadd.f32 %v4327_v16, %v4285_v47  ;;  %v8902_v44 = vld [vmem:[#allocation8 + $0xf8] sm:$0xff]  }
 0x31e   :  { %v4288_v13 = vpop.f32.mrf.mxu0 }
 0x31f   :  { %v4331_v0 = vpop.f32.mrf.mxu1  ;;  %v4289_v58 = vadd.f32 %v4288_v13, %v4246_v61  ;;  %v4330_v53 = vadd.f32 %v4329_v56, %v4287_v10 }
 0x320   :  { %v4290_v37 = vpop.f32.mrf.mxu0 }
 0x321   :  { %v4333_v18 = vpop.f32.mrf.mxu1  ;;  %v4291_v24 = vadd.f32 %v4290_v37, %v4248_v19  ;;  %v4332_v25 = vadd.f32 %v4331_v0, %v4289_v58  ;;  %v8904_v58 = vld [vmem:[#allocation8 + $0xf0] sm:$0xff]  }
 0x323   :  { %v4334_v15 = vadd.f32 %v4333_v18, %v4291_v24  ;;  %v8903_v18 = vld [vmem:[#allocation8 + $0xb8] sm:$0xff]  }
 0x35a   :  { %v4370_v21 = vpop.f32.mrf.mxu0 }
 0x35b   :  { %v4413_v14 = vpop.f32.mrf.mxu1  ;;  %v4371_v50 = vadd.f32 %v4370_v21, %v4328_v30  ;;  %v8919_v21 = vld [vmem:[#allocation8 + $0x138] sm:$0xff]   ;;  %v8908_v30 = vld [vmem:[#allocation8 + $0xe0] sm:$0xff]  }
 0x35c   :  { %v4372_v29 = vpop.f32.mrf.mxu0 }
 0x35d   :  { %v4415_v1 = vpop.f32.mrf.mxu1  ;;  %v4373_v26 = vadd.f32 %v4372_v29, %v4330_v53  ;;  %v9599_v41 = vadd.f32 %v4413_v14, %v4371_v50  ;;  %v8907_v53 = vld [vmem:[#allocation8 + $0xa8] sm:$0xff]  }
 0x35e   :  { %v4374_v32 = vpop.f32.mrf.mxu0  ;;  %v8923_v29 = vld [vmem:[#allocation8 + $0x128] sm:$0xff]  }
 0x35f   :  { %v4417_v12 = vpop.f32.mrf.mxu1  ;;  %v4375_v33 = vadd.f32 %v4374_v32, %v4332_v25  ;;  %v9595_v2 = vadd.f32 %v4415_v1, %v4373_v26  ;;  %v4426_v59 = vmax.f32 %v9599_v41, 0.0  ;;  %v8924_v26 = vld [vmem:[#allocation8 + $0x160] sm:$0xff]  }
 0x360   :  { %v4376_v22 = vpop.f32.mrf.mxu0  ;;  %v8909_v32 = vld [vmem:[#allocation8 + $0xa0] sm:$0xff]  }
 0x361   :  { %v9597_v63 = vadd.f32 %v4417_v12, %v4375_v33  ;;  %v4377_v39 = vadd.f32 %v4376_v22, %v4334_v15  ;;  %v4419_v42 = vpop.f32.mrf.mxu1  ;;  %v4427_v55 = vmax.f32 %v9595_v2, 0.0  ;;  %v8910_v12 = vld [vmem:[#allocation8 + $0xd8] sm:$0xff]   ;;  %v8925_v15 = vld [vmem:[#allocation8 + $0x120] sm:$0xff]   ;;  %v8940_v2 = vld [vmem:[#allocation8 + $0x208] sm:$0xff]  }
 0x362   :  { %v4483_v49 = vpop.f32.mrf.mxu0  ;;  %v8926_v33 = vld [vmem:[#allocation8 + $0x158] sm:$0xff]  }
 0x363   :  { %v9601_v16 = vadd.f32 %v4419_v42, %v4377_v39  ;;  %v4432_v23 = vmax.f32 %v9597_v63, 0.0  ;;  %v4578_v37 = vadd.f32 %v4483_v49, %v4422_v62  ;;  %v8911_v22 = vld [vmem:[#allocation8 + $0x98] sm:$0xff]   ;;  %v8915_v39 = vld [vmem:[#allocation8 + $0x88] sm:$0xff]   ;;  %v8916_v42 = vld [vmem:[#allocation8 + $0xc0] sm:$0xff]  }
 0x364   :  { %v4485_v56 = vpop.f32.mrf.mxu0  ;;  %v8917_v49 = vld [vmem:[#allocation8 + $0x80] sm:$0xff]   ;;  %v8939_v63 = vld [vmem:[#allocation8 + $0x210] sm:$0xff]  }
 0x365   :  { %v4433_v57 = vmax.f32 %v9601_v16, 0.0  ;;  %v4438_v46 = vpack.c.bf16 %v4432_v23, %v4426_v59  ;;  %v4579_v10 = vadd.f32 %v4485_v56, %v4423_v20  ;;  %v8922_v20 = vld [vmem:[#allocation8 + $0x168] sm:$0xff]   ;;  %v8941_v16 = vld [vmem:[#allocation8 + $0x200] sm:$0xff]  }
 0x366   :  { %v4487_v13 = vpop.f32.mrf.mxu0 }
 0x367   :  { %v4439_v0 = vpack.c.bf16 %v4433_v57, %v4427_v55  ;;  %v4584_v6 = vadd.f32 %v4487_v13, %v4428_v48 }
 0x368   :  { %v4489_v61 = vpop.f32.mrf.mxu0 }
 0x369   :  { %v4585_v47 = vadd.f32 %v4489_v61, %v4429_v27  ;;  %4549 = vmatprep.subr.bf16.mxu0 %v4439_v0  ;;  %v4686_v14 = vpack.c.bf16 %v4584_v6, %v4578_v37  ;;  %v8906_v27 = vld [vmem:[#allocation8 + $0xe8] sm:$0xff]   ;;  %v8937_v37 = vld [vmem:[#allocation8 + $0x220] sm:$0xff]  }
 0x36a   :  { %4550 = vmatpush1.bf16.msra.mxu0 %v4438_v46  ;;  %v8929_v46 = vld [vmem:[#allocation8 + $0x110] sm:$0xff]   ;;  %v8930_v6 = vld [vmem:[#allocation8 + $0x148] sm:$0xff]  }
 0x36b   :  { %v4687_v19 = vpack.c.bf16 %v4585_v47, %v4579_v10  ;;  %7706 = vmatprep.subr.bf16.mxu0 %v8902_v44  ;;  %v8928_v44 = vld [vmem:[#allocation8 + $0x150] sm:$0xff]   ;;  %v8931_v61 = vld [vmem:[#allocation8 + $0x108] sm:$0xff]   ;;  %v8932_v10 = vld [vmem:[#allocation8 + $0x140] sm:$0xff]  }
 0x36c   :  { %v8933_v47 = vld [vmem:[#allocation8 + $0x100] sm:$0xff]  }
 0x36d   :  { %v4526_v48 = vpop.f32.mrf.mxu1  ;;  %7502 = vmatmul.mubr.msk.bf16.vlgmr.msra.gmra.mxu0 %vm4445_vm0, %v9560_v52  ;;  %5017 = vmatprep.mubr.bf16.mxu1 %v4687_v19 }
 0x36e   :  { %5018 = vmatmul.mubr.bf16.vlgmr.msra.gmra.mxu1 %v4686_v14  ;;  %7707 = vmatpush3.bf16.msra.mxu0 %v8903_v18  ;;  %v4580_v13 = vadd.f32 %v4526_v48, %v4424_v40  ;;  %v8936_v40 = vld [vmem:[#allocation8 + $0x228] sm:$0xff]  }
 0x36f   :  { %v4528_v5 = vpop.f32.mrf.mxu1  ;;  %7708 = vmatprep.subr.bf16.mxu0 %v8904_v58  ;;  %7729 = vmatpush3.bf16.msra.mxu1 %v8919_v21 }
 0x370   :  { %7730 = vmatprep.subr.bf16.mxu1 %v8920_v7  ;;  %v4581_v1 = vadd.f32 %v4528_v5, %v4425_v28  ;;  %v8927_v28 = vld [vmem:[#allocation8 + $0x118] sm:$0xff]  }
 0x371   :  { %v4530_v62 = vpop.f32.mrf.mxu1 }
 0x372   :  { %7709 = vmatpush3.bf16.msra.mxu0 %v8905_v45  ;;  %v4586_v56 = vadd.f32 %v4530_v62, %v4430_v36  ;;  %v9298_v36 = vmov 0.0  }
 0x373   :  { %v4532_v24 = vpop.f32.mrf.mxu1  ;;  %7710 = vmatprep.subr.bf16.mxu0 %v8906_v27  ;;  %7731 = vmatpush3.bf16.msra.mxu1 %v8921_v11  ;;  %v8938_v11 = vld [vmem:[#allocation8 + $0x218] sm:$0xff]  }
 0x374   :  { %v4587_v25 = vadd.f32 %v4532_v24, %v4431_v3  ;;  %7732 = vmatprep.subr.bf16.mxu1 %v8922_v20  ;;  %v8914_v3 = vld [vmem:[#allocation8 + $0xc8] sm:$0xff]   ;;  %v4688_v0 = vpack.c.bf16 %v4586_v56, %v4580_v13  ;;  %v7503_v24 = vld [vmem:[#allocation11] ss:$0 sm:$0xff]  ;;  %v8942_v13 = vld [vmem:[#allocation8 + $0x1b8] sm:$0xff]  }
 0x376   :  { %v4689_v50 = vpack.c.bf16 %v4587_v25, %v4581_v1  ;;  %7711 = vmatpush3.bf16.msra.mxu0 %v8907_v53 }
 0x377   :  { %7712 = vmatprep.subr.bf16.mxu0 %v8908_v30  ;;  %7733 = vmatpush3.bf16.msra.mxu1 %v8923_v29 }
 0x378   :  { %5058 = vmatprep.mubr.bf16.mxu0 %v4689_v50  ;;  %7734 = vmatprep.subr.bf16.mxu1 %v8924_v26 }
 0x37a   :  { %7713 = vmatpush3.bf16.msra.mxu0 %v8909_v32 }
 0x37b   :  { %7714 = vmatprep.subr.bf16.mxu0 %v8910_v12  ;;  %7735 = vmatpush3.bf16.msra.mxu1 %v8925_v15 }
 0x37c   :  { %7736 = vmatprep.subr.bf16.mxu1 %v8926_v33 }
 0x37e   :  { %7715 = vmatpush3.bf16.msra.mxu0 %v8911_v22 }
 0x37f   :  { %7716 = vmatprep.subr.bf16.mxu0 %v8912_v4  ;;  %7737 = vmatpush3.bf16.msra.mxu1 %v8927_v28 }
 0x380   :  { %7738 = vmatprep.subr.bf16.mxu1 %v8928_v44  ;;  %v8944_v44 = vld [vmem:[#allocation8 + $0x1a8] sm:$0xff]  }
 0x382   :  { %7717 = vmatpush3.bf16.msra.mxu0 %v8913_v17 }
 0x383   :  { %7718 = vmatprep.subr.bf16.mxu0 %v8914_v3  ;;  %7739 = vmatpush3.bf16.msra.mxu1 %v8929_v46  ;;  %v8945_v46 = vld [vmem:[#allocation8 + $0x1a0] sm:$0xff]  }
 0x384   :  { %7740 = vmatprep.subr.bf16.mxu1 %v8930_v6  ;;  %v8946_v6 = vld [vmem:[#allocation8 + $0x198] sm:$0xff]  }
 0x386   :  { %7719 = vmatpush3.bf16.msra.mxu0 %v8915_v39 }
 0x387   :  { %7720 = vmatprep.subr.bf16.mxu0 %v8916_v42  ;;  %7741 = vmatpush3.bf16.msra.mxu1 %v8931_v61  ;;  %v8947_v61 = vld [vmem:[#allocation8 + $0x190] sm:$0xff]  }
 0x388   :  { %7742 = vmatprep.subr.bf16.mxu1 %v8932_v10  ;;  %v7552_v10 = vld [vmem:[#allocation11 + $0x3] ss:$0 sm:$0xff] }
 0x38a   :  { %7721 = vmatpush3.bf16.msra.mxu0 %v8917_v49 }
 0x38b   :  { %7743 = vmatpush3.bf16.msra.mxu1 %v8933_v47  ;;  %7826 = vmatprep.subr.bf16.mxu0 %v9298_v36 }
 0x38c   :  { %7846 = vmatprep.subr.bf16.mxu1 %v9298_v36 }
 0x38d   :  { %5059 = vmatmul.mubr.bf16.vlgmr.msra.gmra.mxu0 %v4688_v0  ;;  %v8943_v0 = vld [vmem:[#allocation8 + $0x1b0] sm:$0xff]  }
 0x38e   :  { %7827 = vmatpush3.bf16.msra.mxu0 %v8934_v9  ;;  %7842 = vmatprep.mubr.msk.bf16.mxu0 %vm9299_vm1, %v9298_v36 }
 0x38f   :  { %7828 = vmatprep.subr.bf16.mxu0 %v9298_v36 }
 0x392   :  { %7829 = vmatpush3.bf16.msra.mxu0 %v8935_v60 }
 0x393   :  { %7830 = vmatprep.subr.bf16.mxu0 %v9298_v36 }
 0x396   :  { %7831 = vmatpush3.bf16.msra.mxu0 %v8936_v40 }
 0x397   :  { %7832 = vmatprep.subr.bf16.mxu0 %v9298_v36 }
 0x39a   :  { %7833 = vmatpush3.bf16.msra.mxu0 %v8937_v37  ;;  %v7561_v37 = vld [vmem:[#allocation11 + $0x6] ss:$0 sm:$0xff] }
 0x39b   :  { %7834 = vmatprep.subr.bf16.mxu0 %v9298_v36 }
 0x39e   :  { %7835 = vmatpush3.bf16.msra.mxu0 %v8938_v11  ;;  %v8948_v11 = vld [vmem:[#allocation8 + $0x188] sm:$0xff]  }
 0x39f   :  { %7836 = vmatprep.subr.bf16.mxu0 %v9298_v36 }
 0x3a2   :  { %7837 = vmatpush3.bf16.msra.mxu0 %v8939_v63  ;;  %v8949_v63 = vld [vmem:[#allocation8 + $0x180] sm:$0xff]  }
 0x3a3   :  { %7838 = vmatprep.subr.bf16.mxu0 %v9298_v36 }
 0x3a6   :  { %7839 = vmatpush3.bf16.msra.mxu0 %v8940_v2  ;;  %v8950_v2 = vld [vmem:[#allocation8 + $0x278] sm:$0xff]  }
 0x3a7   :  { %7840 = vmatprep.subr.bf16.mxu0 %v9298_v36 }
 0x3aa   :  { %7841 = vmatpush3.bf16.msra.mxu0 %v8941_v16  ;;  %v8951_v16 = vld [vmem:[#allocation8 + $0x270] sm:$0xff]  }
 0x3ab   :  { %7852 = vmatprep.subr.bf16.mxu0 %v9298_v36 }
 0x42d   :  { %v4569_v18 = vpop.f32.mrf.mxu0 }
 0x42e   :  { %v4582_v45 = vadd.f32 %v4569_v18, %v4426_v59  ;;  %v7700_v41 = vpop.f32.mrf.mxu1 }
 0x42f   :  { %v4571_v19 = vpop.f32.mrf.mxu0 }
 0x430   :  { %v4583_v7 = vadd.f32 %v4571_v19, %v4427_v55  ;;  %v7701_v55 = vpop.f32.mrf.mxu1 }
 0x431   :  { %v4573_v58 = vpop.f32.mrf.mxu0  ;;  %v7702_v53 = vadd.f32 %v7701_v55, %v7700_v41  ;;  %v8952_v41 = vld [vmem:[#allocation8 + $0x268] sm:$0xff]   ;;  %v8954_v55 = vld [vmem:[#allocation8 + $0x258] sm:$0xff]  }
 0x432   :  { %v4588_v21 = vadd.f32 %v4573_v58, %v4432_v23  ;;  %v7703_v59 = vpop.f32.mrf.mxu1 }
 0x433   :  { %v4575_v14 = vpop.f32.mrf.mxu0  ;;  %v5020_v50 = vadd.f32 %v7702_v53, %v7503_v24 }
 0x434   :  { %v4589_v48 = vadd.f32 %v4575_v14, %v4433_v57  ;;  %v4690_v27 = vpack.c.bf16 %v4588_v21, %v4582_v45  ;;  %v7704_v62 = vpop.f32.mrf.mxu1 }
 0x435   :  { %v7705_v1 = vadd.f32 %v7704_v62, %v7703_v59 }
 0x436   :  { %v4691_v5 = vpack.c.bf16 %v4589_v48, %v4583_v7  ;;  %v7562_v7 = vld [vmem:[#allocation11 + $0x9] ss:$0 sm:$0xff] }
 0x437   :  { %v5023_v33 = vadd.f32 %v7705_v1, %v7503_v24  ;;  %v8956_v1 = vld [vmem:[#allocation8 + $0x248] sm:$0xff]  }
 0x438   :  { %5099 = vmatprep.mubr.bf16.mxu1 %v4691_v5 }
 0x439   :  { %5100 = vmatmul.mubr.bf16.vlgmr.msra.gmra.mxu1 %v4690_v27 }
 0x43a   :  { %7848 = vmatprep.mubr.msk.bf16.mxu1 %vm9299_vm1, %v9298_v36 }
 0x44d   :  { %v7722_v23 = vpop.f32.mrf.mxu0 }
 0x44f   :  { %v7723_v57 = vpop.f32.mrf.mxu0 }
 0x450   :  { %v7724_v25 = vadd.f32 %v7723_v57, %v7722_v23  ;;  %v8953_v23 = vld [vmem:[#allocation8 + $0x260] sm:$0xff]  }
 0x451   :  { %v7725_v20 = vpop.f32.mrf.mxu0 }
 0x452   :  { %v5061_v22 = vadd.f32 %v7724_v25, %v5020_v50  ;;  %v8957_v25 = vld [vmem:[#allocation8 + $0x240] sm:$0xff]  }
 0x453   :  { %v7726_v30 = vpop.f32.mrf.mxu0 }
 0x454   :  { %v7727_v32 = vadd.f32 %v7726_v30, %v7725_v20 }
 0x456   :  { %v5064_v28 = vadd.f32 %v7727_v32, %v5023_v33 }
 0x4f9   :  { %v7744_v29 = vpop.f32.mrf.mxu1 }
 0x4fb   :  { %v7745_v26 = vpop.f32.mrf.mxu1 }
 0x4fc   :  { %v7746_v12 = vadd.f32 %v7745_v26, %v7744_v29  ;;  %v8955_v29 = vld [vmem:[#allocation8 + $0x250] sm:$0xff]   ;;  %v7564_v26 = vld [vmem:[#allocation11 + $0x1] ss:$0 sm:$0xff] }
 0x4fd   :  { %v7747_v15 = vpop.f32.mrf.mxu1 }
 0x4fe   :  { %v5102_v17 = vadd.f32 %v7746_v12, %v5061_v22 }
 0x4ff   :  { %v7748_v4 = vpop.f32.mrf.mxu1 }
 0x500   :  { %v7749_v3 = vadd.f32 %v7748_v4, %v7747_v15  ;;  %v5108_v42 = vmax.f32 %v5102_v17, 0.0 }
 0x502   :  { %v5105_v39 = vadd.f32 %v7749_v3, %v5064_v28  ;;  %v8958_v3 = vld [vmem:[#allocation8 + $0x1f8] sm:$0xff]  }
 0x504   :  { %v5109_v49 = vmax.f32 %v5105_v39, 0.0  ;;  %v8959_v39 = vld [vmem:[#allocation8 + $0x1f0] sm:$0xff]  }
 0x506   :  { %v5126_v56 = vpack.c.bf16 %v5109_v49, %v5108_v42  ;;  %v8960_v42 = vld [vmem:[#allocation8 + $0x1e8] sm:$0xff]   ;;  %v8961_v49 = vld [vmem:[#allocation8 + $0x1e0] sm:$0xff]  }
 0x508   :  { %7843 = vmatmul.mubr.bf16.vlgmr.msra.gmra.mxu0 %v5126_v56  ;;  %v8962_v56 = vld [vmem:[#allocation8 + $0x1d8] sm:$0xff]  }
 0x509   :  { %7868 = vmatprep.mubr.msk.bf16.mxu0 %vm9299_vm1, %v9298_v36  ;;  %7853 = vmatpush3.bf16.msra.mxu0 %v8942_v13  ;;  %v8963_v13 = vld [vmem:[#allocation8 + $0x1d0] sm:$0xff]  }
 0x50a   :  { %7854 = vmatprep.subr.bf16.mxu0 %v9298_v36 }
 0x50d   :  { %7855 = vmatpush3.bf16.msra.mxu0 %v8943_v0  ;;  %v7573_v0 = vld [vmem:[#allocation11 + $0x4] ss:$0 sm:$0xff] }
 0x50e   :  { %7856 = vmatprep.subr.bf16.mxu0 %v9298_v36 }
 0x511   :  { %7857 = vmatpush3.bf16.msra.mxu0 %v8944_v44 }
 0x512   :  { %7858 = vmatprep.subr.bf16.mxu0 %v9298_v36 }
 0x515   :  { %7859 = vmatpush3.bf16.msra.mxu0 %v8945_v46 }
 0x516   :  { %7860 = vmatprep.subr.bf16.mxu0 %v9298_v36 }
 0x519   :  { %7861 = vmatpush3.bf16.msra.mxu0 %v8946_v6 }
 0x51a   :  { %7862 = vmatprep.subr.bf16.mxu0 %v9298_v36 }
 0x51d   :  { %7863 = vmatpush3.bf16.msra.mxu0 %v8947_v61 }
 0x51e   :  { %7864 = vmatprep.subr.bf16.mxu0 %v9298_v36 }
 0x521   :  { %7865 = vmatpush3.bf16.msra.mxu0 %v8948_v11  ;;  %v8976_v11 = vld [vmem:[#allocation8 + $0x2a8] sm:$0xff]  }
 0x522   :  { %7866 = vmatprep.subr.bf16.mxu0 %v9298_v36 }
 0x525   :  { %7867 = vmatpush3.bf16.msra.mxu0 %v8949_v63  ;;  %v8978_v63 = vld [vmem:[#allocation8 + $0x298] sm:$0xff]  }
 0x526   :  { %7892 = vmatprep.subr.bf16.mxu0 %v9298_v36 }
 0x5c8   :  { %v5214_v47 = vpop.f32.mrf.mxu0 }
 0x5c9   :  { %v5215_v9 = vadd.f32 %v7552_v10, %v5214_v47 }
 0x5ca   :  { %v7844_v60 = vpop.f32.mrf.mxu0 }
 0x5cb   :  { %v5221_v40 = vmax.f32 %v5215_v9, 0.0 }
 0x5cc   :  { %v5217_v18 = vpop.f32.mrf.mxu0 }
 0x5cd   :  { %v5218_v19 = vadd.f32 %v7552_v10, %v5217_v18  ;;  %v5228_v21 = vmul.f32 %v7561_v37, %v5221_v40  ;;  %v7582_v10 = vld [vmem:[#allocation11 + $0x7] ss:$0 sm:$0xff]  ;;  %v7583_v18 = vld [vmem:[#allocation11 + $0xa] ss:$0 sm:$0xff] }
 0x5ce   :  { %v7845_v58 = vpop.f32.mrf.mxu0 }
 0x5cf   :  { %v5222_v14 = vmax.f32 %v5218_v19, 0.0  ;;  %v5235_v45 = vadd.f32 %v7562_v7, %v5228_v21 }
 0x5d1   :  { %v5229_v48 = vmul.f32 %v7561_v37, %v5222_v14 }
 0x5d3   :  { %v5236_v5 = vadd.f32 %v7562_v7, %v5229_v48  ;;  %v8964_v7 = vld [vmem:[#allocation8 + $0x1c8] sm:$0xff]   ;;  %v8965_v48 = vld [vmem:[#allocation8 + $0x1c0] sm:$0xff]  }
 0x5d5   :  { %v9663_v27 = vpack.c.bf16 %v5236_v5, %v5235_v45 }
 0x5d7   :  { %7847 = vmatpush3.bf16.msra.mxu1 %v9663_v27 }
 0x5d8   :  { %7872 = vmatprep.subr.bf16.mxu1 %v9298_v36 }
 0x5da   :  { %7849 = vmatmul.mubr.msk.bf16.vlgmr.msra.gmra.mxu1 %vm4445_vm0, %v9560_v52 }
 0x5db   :  { %7888 = vmatprep.mubr.msk.bf16.mxu1 %vm9299_vm1, %v9298_v36  ;;  %7873 = vmatpush3.bf16.msra.mxu1 %v8950_v2  ;;  %v8979_v2 = vld [vmem:[#allocation8 + $0x290] sm:$0xff]  }
 0x5dc   :  { %7874 = vmatprep.subr.bf16.mxu1 %v9298_v36 }
 0x5df   :  { %7875 = vmatpush3.bf16.msra.mxu1 %v8951_v16 }
 0x5e0   :  { %7876 = vmatprep.subr.bf16.mxu1 %v9298_v36 }
 0x5e3   :  { %7877 = vmatpush3.bf16.msra.mxu1 %v8952_v41 }
 0x5e4   :  { %7878 = vmatprep.subr.bf16.mxu1 %v9298_v36 }
 0x5e7   :  { %7879 = vmatpush3.bf16.msra.mxu1 %v8953_v23 }
 0x5e8   :  { %7880 = vmatprep.subr.bf16.mxu1 %v9298_v36 }
 0x5eb   :  { %7881 = vmatpush3.bf16.msra.mxu1 %v8954_v55 }
 0x5ec   :  { %7882 = vmatprep.subr.bf16.mxu1 %v9298_v36 }
 0x5ef   :  { %7883 = vmatpush3.bf16.msra.mxu1 %v8955_v29  ;;  %v8970_v29 = vld [vmem:[#allocation8 + $0x2d8] sm:$0xff]  }
 0x5f0   :  { %7884 = vmatprep.subr.bf16.mxu1 %v9298_v36 }
 0x5f3   :  { %7885 = vmatpush3.bf16.msra.mxu1 %v8956_v1  ;;  %v8971_v1 = vld [vmem:[#allocation8 + $0x2d0] sm:$0xff]  }
 0x5f4   :  { %7886 = vmatprep.subr.bf16.mxu1 %v9298_v36 }
 0x5f7   :  { %7887 = vmatpush3.bf16.msra.mxu1 %v8957_v25  ;;  %v8972_v25 = vld [vmem:[#allocation8 + $0x2c8] sm:$0xff]  }
 0x5f8   :  { %7898 = vmatprep.subr.bf16.mxu1 %v9298_v36 }
 0x69a   :  { %v5272_v57 = vpop.f32.mrf.mxu1 }
 0x69b   :  { %v5279_v62 = vadd.f32 %v5272_v57, %v5235_v45  ;;  %v8974_v45 = vld [vmem:[#allocation8 + $0x2b8] sm:$0xff]  }
 0x69c   :  { %v7850_v59 = vpop.f32.mrf.mxu1 }
 0x69e   :  { %v5275_v20 = vpop.f32.mrf.mxu1 }
 0x69f   :  { %v5280_v53 = vadd.f32 %v5275_v20, %v5236_v5  ;;  %v8975_v5 = vld [vmem:[#allocation8 + $0x2b0] sm:$0xff]   ;;  %v8966_v20 = vld [vmem:[#allocation8 + $0x2f8] sm:$0xff]  }
 0x6a0   :  { %v7851_v24 = vpop.f32.mrf.mxu1 }
 0x6a1   :  { %v5297_v30 = vpack.c.bf16 %v5280_v53, %v5279_v62  ;;  %v8967_v53 = vld [vmem:[#allocation8 + $0x2f0] sm:$0xff]   ;;  %v8968_v24 = vld [vmem:[#allocation8 + $0x2e8] sm:$0xff]  }
 0x6a3   :  { %7869 = vmatmul.mubr.bf16.vlgmr.msra.gmra.mxu0 %v5297_v30  ;;  %v8969_v30 = vld [vmem:[#allocation8 + $0x2e0] sm:$0xff]  }
 0x6a4   :  { %7894 = vmatprep.mubr.msk.bf16.mxu0 %vm9299_vm1, %v9298_v36 }
 0x763   :  { %v5385_v50 = vpop.f32.mrf.mxu0 }
 0x764   :  { %v5386_v12 = vadd.f32 %v7564_v26, %v5385_v50  ;;  %v8980_v50 = vld [vmem:[#allocation8 + $0x288] sm:$0xff]  }
 0x765   :  { %v7870_v32 = vpop.f32.mrf.mxu0 }
 0x766   :  { %v5392_v4 = vmax.f32 %v5386_v12, 0.0  ;;  %v8981_v32 = vld [vmem:[#allocation8 + $0x280] sm:$0xff]   ;;  %v8990_v12 = vld [vmem:[#allocation8 + $0x378] sm:$0xff]  }
 0x767   :  { %v5388_v15 = vpop.f32.mrf.mxu0 }
 0x768   :  { %v5389_v33 = vadd.f32 %v7564_v26, %v5388_v15  ;;  %v8973_v26 = vld [vmem:[#allocation8 + $0x2c0] sm:$0xff]   ;;  %v8991_v15 = vld [vmem:[#allocation8 + $0x370] sm:$0xff]  }
 0x769   :  { %v7871_v22 = vpop.f32.mrf.mxu0 }
 0x76a   :  { %v5393_v28 = vmax.f32 %v5389_v33, 0.0  ;;  %v8992_v33 = vld [vmem:[#allocation8 + $0x368] sm:$0xff]   ;;  %v7585_v22 = vld [vmem:[#allocation11 + $0x2] ss:$0 sm:$0xff] }
 0x76c   :  { %v5410_v17 = vpack.c.bf16 %v5393_v28, %v5392_v4 }
 0x76e   :  { %7889 = vmatmul.mubr.bf16.vlgmr.msra.gmra.mxu1 %v5410_v17 }
 0x76f   :  { %7914 = vmatprep.mubr.msk.bf16.mxu1 %vm9299_vm1, %v9298_v36  ;;  %7899 = vmatpush3.bf16.msra.mxu1 %v8958_v3 }
 0x770   :  { %7900 = vmatprep.subr.bf16.mxu1 %v9298_v36 }
 0x773   :  { %7901 = vmatpush3.bf16.msra.mxu1 %v8959_v39 }
 0x774   :  { %7902 = vmatprep.subr.bf16.mxu1 %v9298_v36 }
 0x777   :  { %7903 = vmatpush3.bf16.msra.mxu1 %v8960_v42 }
 0x778   :  { %7904 = vmatprep.subr.bf16.mxu1 %v9298_v36 }
 0x77b   :  { %7905 = vmatpush3.bf16.msra.mxu1 %v8961_v49 }
 0x77c   :  { %7906 = vmatprep.subr.bf16.mxu1 %v9298_v36 }
 0x77f   :  { %7907 = vmatpush3.bf16.msra.mxu1 %v8962_v56 }
 0x780   :  { %7908 = vmatprep.subr.bf16.mxu1 %v9298_v36 }
 0x783   :  { %7909 = vmatpush3.bf16.msra.mxu1 %v8963_v13  ;;  %v8982_v13 = vld [vmem:[#allocation8 + $0x338] sm:$0xff]  }
 0x784   :  { %7910 = vmatprep.subr.bf16.mxu1 %v9298_v36 }
 0x787   :  { %7911 = vmatpush3.bf16.msra.mxu1 %v8964_v7  ;;  %v8997_v7 = vld [vmem:[#allocation8 + $0x340] sm:$0xff]  }
 0x788   :  { %7912 = vmatprep.subr.bf16.mxu1 %v9298_v36 }
 0x78b   :  { %7913 = vmatpush3.bf16.msra.mxu1 %v8965_v48  ;;  %v7594_v48 = vld [vmem:[#allocation11 + $0x5] ss:$0 sm:$0xff] }
 0x78c   :  { %7938 = vmatprep.subr.bf16.mxu1 %v9298_v36 }
 0x82e   :  { %v5498_v44 = vpop.f32.mrf.mxu1 }
 0x82f   :  { %v5499_v46 = vadd.f32 %v7573_v0, %v5498_v44  ;;  %v8983_v44 = vld [vmem:[#allocation8 + $0x330] sm:$0xff]  }
 0x830   :  { %v7890_v6 = vpop.f32.mrf.mxu1 }
 0x831   :  { %v5505_v61 = vmax.f32 %v5499_v46, 0.0  ;;  %v8984_v46 = vld [vmem:[#allocation8 + $0x328] sm:$0xff]   ;;  %v8985_v6 = vld [vmem:[#allocation8 + $0x320] sm:$0xff]  }
 0x832   :  { %v5501_v47 = vpop.f32.mrf.mxu1 }
 0x833   :  { %v5502_v9 = vadd.f32 %v7573_v0, %v5501_v47  ;;  %v5512_v40 = vmul.f32 %v7582_v10, %v5505_v61  ;;  %v8986_v61 = vld [vmem:[#allocation8 + $0x318] sm:$0xff]  }
 0x834   :  { %v7891_v60 = vpop.f32.mrf.mxu1 }
 0x835   :  { %v5506_v37 = vmax.f32 %v5502_v9, 0.0  ;;  %v5519_v58 = vadd.f32 %v7583_v18, %v5512_v40  ;;  %v8988_v9 = vld [vmem:[#allocation8 + $0x308] sm:$0xff]  }
 0x837   :  { %v5513_v19 = vmul.f32 %v7582_v10, %v5506_v37  ;;  %v8987_v10 = vld [vmem:[#allocation8 + $0x310] sm:$0xff]   ;;  %v8989_v37 = vld [vmem:[#allocation8 + $0x300] sm:$0xff]  }
 0x839   :  { %v5520_v21 = vadd.f32 %v7583_v18, %v5513_v19  ;;  %v8994_v19 = vld [vmem:[#allocation8 + $0x358] sm:$0xff]  }
 0x83b   :  { %v9691_v14 = vpack.c.bf16 %v5520_v21, %v5519_v58 }
 0x83d   :  { %7893 = vmatpush3.bf16.msra.mxu0 %v9691_v14 }
 0x83e   :  { %7918 = vmatprep.subr.bf16.mxu0 %v9298_v36 }
 0x840   :  { %7895 = vmatmul.mubr.msk.bf16.vlgmr.msra.gmra.mxu0 %vm4445_vm0, %v9560_v52  ;;  %v8977_v52 = vld [vmem:[#allocation8 + $0x2a0] sm:$0xff]  }
 0x841   :  { %7934 = vmatprep.mubr.msk.bf16.mxu0 %vm9299_vm1, %v9298_v36  ;;  %7919 = vmatpush3.bf16.msra.mxu0 %v8974_v45 }
 0x842   :  { %7920 = vmatprep.subr.bf16.mxu0 %v9298_v36 }
 0x845   :  { %7921 = vmatpush3.bf16.msra.mxu0 %v8975_v5 }
 0x846   :  { %7922 = vmatprep.subr.bf16.mxu0 %v9298_v36 }
 0x849   :  { %7923 = vmatpush3.bf16.msra.mxu0 %v8976_v11 }
 0x84a   :  { %7924 = vmatprep.subr.bf16.mxu0 %v9298_v36 }
 0x84d   :  { %7925 = vmatpush3.bf16.msra.mxu0 %v8977_v52  ;;  %v7603_v52 = vld [vmem:[#allocation11 + $0x8] ss:$0 sm:$0xff] }
 0x84e   :  { %7926 = vmatprep.subr.bf16.mxu0 %v9298_v36 }
 0x851   :  { %7927 = vmatpush3.bf16.msra.mxu0 %v8978_v63 }
 0x852   :  { %7928 = vmatprep.subr.bf16.mxu0 %v9298_v36 }
 0x855   :  { %7929 = vmatpush3.bf16.msra.mxu0 %v8979_v2 }
 0x856   :  { %7930 = vmatprep.subr.bf16.mxu0 %v9298_v36 }
 0x859   :  { %7931 = vmatpush3.bf16.msra.mxu0 %v8980_v50 }
 0x85a   :  { %7932 = vmatprep.subr.bf16.mxu0 %v9298_v36 }
 0x85d   :  { %7933 = vmatpush3.bf16.msra.mxu0 %v8981_v32 }
 0x85e   :  { %7958 = vmatprep.subr.bf16.mxu0 %v9298_v36 }
 0x900   :  { %v5556_v16 = vpop.f32.mrf.mxu0 }
 0x901   :  { %v5563_v55 = vadd.f32 %v5556_v16, %v5519_v58  ;;  %v8995_v58 = vld [vmem:[#allocation8 + $0x350] sm:$0xff]  }
 0x902   :  { %v7896_v41 = vpop.f32.mrf.mxu0 }
 0x904   :  { %v5559_v23 = vpop.f32.mrf.mxu0 }
 0x905   :  { %v5564_v57 = vadd.f32 %v5559_v23, %v5520_v21  ;;  %v8996_v21 = vld [vmem:[#allocation8 + $0x348] sm:$0xff]  }
 0x906   :  { %v7897_v59 = vpop.f32.mrf.mxu0 }
 0x907   :  { %v5581_v62 = vpack.c.bf16 %v5564_v57, %v5563_v55  ;;  %v7604_v55 = vld [vmem:[#allocation11 + $0xb] ss:$0 sm:$0xff] }
 0x909   :  { %7915 = vmatmul.mubr.bf16.vlgmr.msra.gmra.mxu1 %v5581_v62 }
 0x90a   :  { %7939 = vmatpush3.bf16.msra.mxu1 %v8966_v20  ;;  %7954 = vmatprep.mubr.msk.bf16.mxu1 %vm9299_vm1, %v9298_v36 }
 0x90b   :  { %7940 = vmatprep.subr.bf16.mxu1 %v9298_v36 }
 0x90e   :  { %7941 = vmatpush3.bf16.msra.mxu1 %v8967_v53  ;;  %v7613_v53 = vld [vmem:[#allocation11 + $0xc] ss:$0 sm:$0xff] }
 0x90f   :  { %7942 = vmatprep.subr.bf16.mxu1 %v9298_v36 }
 0x912   :  { %7943 = vmatpush3.bf16.msra.mxu1 %v8968_v24 }
 0x913   :  { %7944 = vmatprep.subr.bf16.mxu1 %v9298_v36 }
 0x916   :  { %7945 = vmatpush3.bf16.msra.mxu1 %v8969_v30 }
 0x917   :  { %7946 = vmatprep.subr.bf16.mxu1 %v9298_v36 }
 0x91a   :  { %7947 = vmatpush3.bf16.msra.mxu1 %v8970_v29 }
 0x91b   :  { %7948 = vmatprep.subr.bf16.mxu1 %v9298_v36 }
 0x91e   :  { %7949 = vmatpush3.bf16.msra.mxu1 %v8971_v1 }
 0x91f   :  { %7950 = vmatprep.subr.bf16.mxu1 %v9298_v36 }
 0x922   :  { %7951 = vmatpush3.bf16.msra.mxu1 %v8972_v25 }
 0x923   :  { %7952 = vmatprep.subr.bf16.mxu1 %v9298_v36 }
 0x926   :  { %7953 = vmatpush3.bf16.msra.mxu1 %v8973_v26 }
 0x927   :  { %7978 = vmatprep.subr.bf16.mxu1 %v9298_v36 }
 0x929   :  { %7955 = vmatmul.mubr.bf16.vlgmr.msra.gmra.mxu1 %v9663_v27  ;;  %v8993_v27 = vld [vmem:[#allocation8 + $0x360] sm:$0xff]  }
 0x92a   :  { %7994 = vmatprep.mubr.msk.bf16.mxu1 %vm9299_vm1, %v9298_v36  ;;  %7979 = vmatpush3.bf16.msra.mxu1 %v8990_v12  ;;  %v9000_v12 = vld [vmem:[#allocation10 + $0x1354] ss:$24 sps:$4 sm:$0xff]  }
 0x92b   :  { %7980 = vmatprep.subr.bf16.mxu1 %v9298_v36 }
 0x92e   :  { %7981 = vmatpush3.bf16.msra.mxu1 %v8991_v15  ;;  %v8998_v15 = vld [vmem:[#allocation10 + $0x1350] ss:$24 sps:$4 sm:$0xff]  }
 0x92f   :  { %7982 = vmatprep.subr.bf16.mxu1 %v9298_v36 }
 0x932   :  { %7983 = vmatpush3.bf16.msra.mxu1 %v8992_v33  ;;  %v9003_v33 = vld [vmem:[#allocation10 + $0x135c] ss:$24 sps:$4 sm:$0xff]  }
 0x933   :  { %7984 = vmatprep.subr.bf16.mxu1 %v9298_v36 }
 0x936   :  { %7985 = vmatpush3.bf16.msra.mxu1 %v8993_v27  ;;  %v9001_v27 = vld [vmem:[#allocation10 + $0x1358] ss:$24 sps:$4 sm:$0xff]  }
 0x937   :  { %7986 = vmatprep.subr.bf16.mxu1 %v9298_v36 }
 0x93a   :  { %7987 = vmatpush3.bf16.msra.mxu1 %v8994_v19  ;;  %v9039_v19 = vld [vmem:[#allocation10 + $0x123c] ss:$24 sps:$4 sm:$0xff]  }
 0x93b   :  { %7988 = vmatprep.subr.bf16.mxu1 %v9298_v36 }
 0x93e   :  { %7989 = vmatpush3.bf16.msra.mxu1 %v8995_v58  ;;  %v9037_v58 = vld [vmem:[#allocation10 + $0x1238] ss:$24 sps:$4 sm:$0xff]  }
 0x93f   :  { %7990 = vmatprep.subr.bf16.mxu1 %v9298_v36 }
 0x942   :  { %7991 = vmatpush3.bf16.msra.mxu1 %v8996_v21  ;;  %v9042_v21 = vld [vmem:[#allocation10 + $0x1204] ss:$24 sps:$4 sm:$0xff]  }
 0x943   :  { %7992 = vmatprep.subr.bf16.mxu1 %v9298_v36 }
 0x946   :  { %7993 = vmatpush3.bf16.msra.mxu1 %v8997_v7  ;;  %v9040_v7 = vld [vmem:[#allocation10 + $0x1200] ss:$24 sps:$4 sm:$0xff]  }
 0x947   :  { %6527 = vmatprep.subr.bf16.mxu1 %v9003_v33 }
 0x9c9   :  { %v5669_v4 = vpop.f32.mrf.mxu1 }
 0x9ca   :  { %v5670_v17 = vadd.f32 %v7585_v22, %v5669_v4  ;;  %v9004_v4 = vld [vmem:[#allocation10 + $0x1320] ss:$24 sps:$4 sm:$0xff]  }
 0x9cb   :  { %v7916_v28 = vpop.f32.mrf.mxu1 }
 0x9cc   :  { %v5676_v49 = vmax.f32 %v5670_v17, 0.0  ;;  %v9009_v28 = vld [vmem:[#allocation10 + $0x132c] ss:$24 sps:$4 sm:$0xff]   ;;  %v9007_v17 = vld [vmem:[#allocation10 + $0x1328] ss:$24 sps:$4 sm:$0xff]  }
 0x9cd   :  { %v5672_v3 = vpop.f32.mrf.mxu1 }
 0x9ce   :  { %v5673_v39 = vadd.f32 %v7585_v22, %v5672_v3  ;;  %v9006_v22 = vld [vmem:[#allocation10 + $0x1324] ss:$24 sps:$4 sm:$0xff]   ;;  %v9012_v3 = vld [vmem:[#allocation10 + $0x12f4] ss:$24 sps:$4 sm:$0xff]  }
 0x9cf   :  { %v7917_v42 = vpop.f32.mrf.mxu1 }
 0x9d0   :  { %v5677_v56 = vmax.f32 %v5673_v39, 0.0  ;;  %v9010_v39 = vld [vmem:[#allocation10 + $0x12f0] ss:$24 sps:$4 sm:$0xff]   ;;  %v9015_v42 = vld [vmem:[#allocation10 + $0x12fc] ss:$24 sps:$4 sm:$0xff]  }
 0x9d2   :  { %v5694_v0 = vpack.c.bf16 %v5677_v56, %v5676_v49  ;;  %v9013_v49 = vld [vmem:[#allocation10 + $0x12f8] ss:$24 sps:$4 sm:$0xff]   ;;  %v9018_v56 = vld [vmem:[#allocation10 + $0x12c4] ss:$24 sps:$4 sm:$0xff]  }
 0x9d4   :  { %7935 = vmatmul.mubr.bf16.vlgmr.msra.gmra.mxu0 %v5694_v0  ;;  %v9021_v0 = vld [vmem:[#allocation10 + $0x12cc] ss:$24 sps:$4 sm:$0xff]  }
 0x9d5   :  { %7959 = vmatpush3.bf16.msra.mxu0 %v8982_v13  ;;  %7974 = vmatprep.mubr.msk.bf16.mxu0 %vm9299_vm1, %v9298_v36  ;;  %v9016_v13 = vld [vmem:[#allocation10 + $0x12c0] ss:$24 sps:$4 sm:$0xff]  }
 0x9d6   :  { %7960 = vmatprep.subr.bf16.mxu0 %v9298_v36 }
 0x9d9   :  { %7961 = vmatpush3.bf16.msra.mxu0 %v8983_v44  ;;  %v9019_v44 = vld [vmem:[#allocation10 + $0x12c8] ss:$24 sps:$4 sm:$0xff]  }
 0x9da   :  { %7962 = vmatprep.subr.bf16.mxu0 %v9298_v36 }
 0x9dd   :  { %7963 = vmatpush3.bf16.msra.mxu0 %v8984_v46  ;;  %v9024_v46 = vld [vmem:[#allocation10 + $0x1294] ss:$24 sps:$4 sm:$0xff]  }
 0x9de   :  { %7964 = vmatprep.subr.bf16.mxu0 %v9298_v36 }
 0x9e1   :  { %7965 = vmatpush3.bf16.msra.mxu0 %v8985_v6  ;;  %v9022_v6 = vld [vmem:[#allocation10 + $0x1290] ss:$24 sps:$4 sm:$0xff]  }
 0x9e2   :  { %7966 = vmatprep.subr.bf16.mxu0 %v9298_v36 }
 0x9e5   :  { %7967 = vmatpush3.bf16.msra.mxu0 %v8986_v61  ;;  %v9027_v61 = vld [vmem:[#allocation10 + $0x129c] ss:$24 sps:$4 sm:$0xff]  }
 0x9e6   :  { %7968 = vmatprep.subr.bf16.mxu0 %v9298_v36 }
 0x9e9   :  { %v5904_v47 = vpop.f32.mrf.mxu1  ;;  %7969 = vmatpush3.bf16.msra.mxu0 %v8987_v10  ;;  %v9025_v10 = vld [vmem:[#allocation10 + $0x1298] ss:$24 sps:$4 sm:$0xff]  }
 0x9ea   :  { %7970 = vmatprep.subr.bf16.mxu0 %v9298_v36  ;;  %v5915_v24 = vadd.f32 %v7613_v53, %v5904_v47  ;;  %v9030_v47 = vld [vmem:[#allocation10 + $0x1264] ss:$24 sps:$4 sm:$0xff]  }
 0x9eb   :  { %v7956_v60 = vpop.f32.mrf.mxu1 }
 0x9ec   :  { %v9033_v60 = vld [vmem:[#allocation10 + $0x126c] ss:$24 sps:$4 sm:$0xff]  }
 0x9ed   :  { %v5907_v40 = vpop.f32.mrf.mxu1  ;;  %7971 = vmatpush3.bf16.msra.mxu0 %v8988_v9  ;;  %v9028_v9 = vld [vmem:[#allocation10 + $0x1260] ss:$24 sps:$4 sm:$0xff]  }
 0x9ee   :  { %7972 = vmatprep.subr.bf16.mxu0 %v9298_v36  ;;  %v5916_v25 = vadd.f32 %v7613_v53, %v5907_v40  ;;  %v9031_v40 = vld [vmem:[#allocation10 + $0x1268] ss:$24 sps:$4 sm:$0xff]  }
 0x9ef   :  { %v7957_v18 = vpop.f32.mrf.mxu1 }
 0x9f0   :  { %v9034_v18 = vld [vmem:[#allocation10 + $0x1230] ss:$24 sps:$4 sm:$0xff]  }
 0x9f1   :  { %7973 = vmatpush3.bf16.msra.mxu0 %v8989_v37  ;;  %v9036_v37 = vld [vmem:[#allocation10 + $0x1234] ss:$24 sps:$4 sm:$0xff]  }
 0x9f2   :  { %6484 = vmatprep.subr.bf16.mxu0 %v9000_v12 }
 0x9f4   :  { %7975 = vmatmul.mubr.bf16.vlgmr.msra.gmra.mxu0 %v9691_v14 }
 0x9f5   :  { %6516 = vmatprep.mubr.bf16.mxu0 %v9297_v38  ;;  %6485 = vmatpush1.bf16.msra.mxu0 %v8998_v15 }
 0x9f6   :  { %6486 = vmatprep.subr.bf16.mxu0 %v9006_v22 }
 0x9f9   :  { %6487 = vmatpush1.bf16.msra.mxu0 %v9004_v4 }
 0x9fa   :  { %6488 = vmatprep.subr.bf16.mxu0 %v9012_v3 }
 0x9fd   :  { %6489 = vmatpush1.bf16.msra.mxu0 %v9010_v39 }
 0x9fe   :  { %6490 = vmatprep.subr.bf16.mxu0 %v9018_v56  ;;  %v9051_v56 = vld [vmem:[#allocation10 + $0x1334] ss:$24 sps:$4 sm:$0xff]  }
 0xa01   :  { %6491 = vmatpush1.bf16.msra.mxu0 %v9016_v13  ;;  %v9049_v13 = vld [vmem:[#allocation10 + $0x1330] ss:$24 sps:$4 sm:$0xff]  }
 0xa02   :  { %6492 = vmatprep.subr.bf16.mxu0 %v9024_v46  ;;  %v9057_v46 = vld [vmem:[#allocation10 + $0x12d4] ss:$24 sps:$4 sm:$0xff]  }
 0xa05   :  { %6493 = vmatpush1.bf16.msra.mxu0 %v9022_v6  ;;  %v9055_v6 = vld [vmem:[#allocation10 + $0x12d0] ss:$24 sps:$4 sm:$0xff]  }
 0xa06   :  { %6494 = vmatprep.subr.bf16.mxu0 %v9030_v47  ;;  %v9063_v47 = vld [vmem:[#allocation10 + $0x1274] ss:$24 sps:$4 sm:$0xff]  }
 0xa09   :  { %6495 = vmatpush1.bf16.msra.mxu0 %v9028_v9  ;;  %v9061_v9 = vld [vmem:[#allocation10 + $0x1270] ss:$24 sps:$4 sm:$0xff]  }
 0xa0a   :  { %6496 = vmatprep.subr.bf16.mxu0 %v9036_v37  ;;  %v9067_v37 = vld [vmem:[#allocation10 + $0x1210] ss:$24 sps:$4 sm:$0xff]  }
 0xa0d   :  { %6497 = vmatpush1.bf16.msra.mxu0 %v9034_v18  ;;  %v6212_v18 = vld [vmem:[#allocation13 + $0x1] ss:$2 sm:$0x3f] }
 0xa0e   :  { %6498 = vmatprep.subr.bf16.mxu0 %v9042_v21  ;;  %v6221_v21 = vrot.slane %v6212_v18, %v744_v43  ;;  %v9080_v43 = vld [vmem:[#allocation2 + $0x8] sm:$0xff] }
 0xa11   :  { %6499 = vmatpush1.bf16.msra.mxu0 %v9040_v7  ;;  %v6229_v7 = vrot.slane %v6212_v18, %v752_v8 }
 0xa94   :  { %v5782_v45 = vpop.f32.mrf.mxu0 }
 0xa95   :  { %v5783_v5 = vadd.f32 %v7594_v48, %v5782_v45  ;;  %v9043_v45 = vld [vmem:[#allocation10 + $0x1208] ss:$24 sps:$4 sm:$0xff]  }
 0xa96   :  { %v7936_v14 = vpop.f32.mrf.mxu0 }
 0xa97   :  { %v5789_v11 = vmax.f32 %v5783_v5, 0.0  ;;  %v9048_v5 = vld [vmem:[#allocation10 + $0x1364] ss:$24 sps:$4 sm:$0xff]  }
 0xa98   :  { %v5785_v63 = vpop.f32.mrf.mxu0  ;;  %6570 = vmatprep.subr.bf16.mxu0 %v9048_v5 }
 0xa99   :  { %v5786_v2 = vadd.f32 %v7594_v48, %v5785_v63  ;;  %v5796_v41 = vmul.f32 %v7603_v52, %v5789_v11  ;;  %v9045_v48 = vld [vmem:[#allocation10 + $0x120c] ss:$24 sps:$4 sm:$0xff]  }
 0xa9a   :  { %v7937_v16 = vpop.f32.mrf.mxu0 }
 0xa9b   :  { %v5790_v23 = vmax.f32 %v5786_v2, 0.0  ;;  %v5803_v59 = vadd.f32 %v7604_v55, %v5796_v41 }
 0xa9d   :  { %v5797_v57 = vmul.f32 %v7603_v52, %v5790_v23 }
 0xa9f   :  { %v5804_v20 = vadd.f32 %v7604_v55, %v5797_v57 }
 0xaa1   :  { %v6040_v62 = vpack.c.bf16 %v5804_v20, %v5803_v59 }
 0xaa3   :  { %7995 = vmatmul.mubr.bf16.vlgmr.msra.gmra.mxu1 %v6040_v62 }
 0xaa4   :  { %6559 = vmatprep.mubr.bf16.mxu1 %v9297_v38  ;;  %6528 = vmatpush1.bf16.msra.mxu1 %v9001_v27 }
 0xaa5   :  { %6529 = vmatprep.subr.bf16.mxu1 %v9009_v28 }
 0xaa8   :  { %6530 = vmatpush1.bf16.msra.mxu1 %v9007_v17 }
 0xaa9   :  { %6531 = vmatprep.subr.bf16.mxu1 %v9015_v42  ;;  %v9046_v42 = vld [vmem:[#allocation10 + $0x1360] ss:$24 sps:$4 sm:$0xff]  }
 0xaac   :  { %6532 = vmatpush1.bf16.msra.mxu1 %v9013_v49 }
 0xaad   :  { %6533 = vmatprep.subr.bf16.mxu1 %v9021_v0  ;;  %v9054_v0 = vld [vmem:[#allocation10 + $0x1304] ss:$24 sps:$4 sm:$0xff]  }
 0xab0   :  { %6534 = vmatpush1.bf16.msra.mxu1 %v9019_v44  ;;  %v9052_v44 = vld [vmem:[#allocation10 + $0x1300] ss:$24 sps:$4 sm:$0xff]  }
 0xab1   :  { %6535 = vmatprep.subr.bf16.mxu1 %v9027_v61  ;;  %v9060_v61 = vld [vmem:[#allocation10 + $0x12a4] ss:$24 sps:$4 sm:$0xff]  }
 0xab4   :  { %v6015_v30 = vpop.f32.mrf.mxu0  ;;  %6536 = vmatpush1.bf16.msra.mxu1 %v9025_v10  ;;  %v9058_v10 = vld [vmem:[#allocation10 + $0x12a0] ss:$24 sps:$4 sm:$0xff]  }
 0xab5   :  { %v9741_v29 = vadd.f32 %v6015_v30, %v5915_v24  ;;  %6537 = vmatprep.subr.bf16.mxu1 %v9033_v60  ;;  %v9064_v60 = vld [vmem:[#allocation10 + $0x1240] ss:$24 sps:$4 sm:$0xff]  }
 0xab6   :  { %v7976_v1 = vpop.f32.mrf.mxu0 }
 0xab8   :  { %v6018_v26 = vpop.f32.mrf.mxu0  ;;  %6538 = vmatpush1.bf16.msra.mxu1 %v9031_v40  ;;  %v9069_v40 = vld [vmem:[#allocation10 + $0x1214] ss:$24 sps:$4 sm:$0xff]  }
 0xab9   :  { %v9743_v50 = vadd.f32 %v6018_v26, %v5916_v25  ;;  %6539 = vmatprep.subr.bf16.mxu1 %v9039_v19  ;;  %v6217_v19 = vrot.slane %v6212_v18, %v740_v54 }
 0xaba   :  { %v7977_v32 = vpop.f32.mrf.mxu0 }
 0xabc   :  { %6540 = vmatpush1.bf16.msra.mxu1 %v9037_v58  ;;  %v6225_v58 = vrot.slane %v6212_v18, %v748_v51 }
 0xabd   :  { %6541 = vmatprep.subr.bf16.mxu1 %v9045_v48 }
 0xac0   :  { %6542 = vmatpush1.bf16.msra.mxu1 %v9043_v45 }
 0xb63   :  { %v6123_v14 = vpop.f32.mrf.mxu1 }
 0xb64   :  { %v6130_v11 = vadd.f32 %v6123_v14, %v9741_v29 }
 0xb65   :  { %v7996_v52 = vpop.f32.mrf.mxu1 }
 0xb66   :  { %v6134_v63 = vmin.f32 %v6130_v11, 20.0  ;;  %vm6132_vm3 = vcmp.gt.f32.partialorder %v6130_v11, 20.0 }
 0xb67   :  { %v6126_v2 = vpop.f32.mrf.mxu1 }
 0xb68   :  { %v6136_v16 = vmul.f32 1.442695, %v6134_v63  ;;  %v6131_v41 = vadd.f32 %v6126_v2, %v9743_v50  ;;  %v9078_v63 = vld [vmem:[#allocation2] sm:$0xff] }
 0xb69   :  { %v7997_v23 = vpop.f32.mrf.mxu1 }
 0xb6a   :  { %9070 = vpow2.f32 %v6136_v16  ;;  %v6135_v55 = vmin.f32 %v6131_v41, 20.0  ;;  %vm6133_vm5 = vcmp.gt.f32.partialorder %v6131_v41, 20.0  ;;  %v9079_v16 = vld [vmem:[#allocation2 + $0x10] sm:$0xff] }
 0xb6c   :  { %v6138_v57 = vmul.f32 1.442695, %v6135_v55 }
 0xb6e   :  { %9072 = vpow2.f32 %v6138_v57 }
 0xb77   :  { %v9071_v59 = vpop.eup %9070 }
 0xb78   :  { %v6140_v20 = vadd.f32 1.0, %v9071_v59  ;;  %v6143_v24 = vmul.f32 -0.5, %v9071_v59  ;;  %v6146_v1 = vand.u32 2147483647, %v9071_v59 }
 0xb7a   :  { %9074 = vlog2.f32 %v6140_v20  ;;  %v6144_v30 = vadd.f32 1.0, %v6143_v24  ;;  %vm6147_vm2 = vcmp.lt.f32.partialorder %v6146_v1, 0.0004427343  ;;  %v9083_v1 = vld [vmem:[#allocation2 + $0x70] sm:$0xff] }
 0xb7b   :  { %v9073_v62 = vpop.eup %9072 }
 0xb7c   :  { %v6149_v53 = vadd.f32 1.0, %v9073_v62  ;;  %v6152_v29 = vmul.f32 -0.5, %v9073_v62  ;;  %v6145_v32 = vmul.f32 %v9071_v59, %v6144_v30  ;;  %v6155_v50 = vand.u32 2147483647, %v9073_v62  ;;  %v9081_v59 = vld [vmem:[#allocation2 + $0x18] sm:$0xff]  ;;  %v9082_v30 = vld [vmem:[#allocation2 + $0x60] sm:$0xff] }
 0xb7e   :  { %9076 = vlog2.f32 %v6149_v53  ;;  %v6153_v12 = vadd.f32 1.0, %v6152_v29  ;;  %vm6156_vm4 = vcmp.lt.f32.partialorder %v6155_v50, 0.0004427343 }
 0xb80   :  { %v6154_v22 = vmul.f32 %v9073_v62, %v6153_v12  ;;  %v9084_v12 = vld [vmem:[#allocation2 + $0x68] sm:$0xff] }
 0xb87   :  { %v9075_v25 = vpop.eup %9074 }
 0xb88   :  { %v6142_v26 = vmul.f32 0.6931472, %v9075_v25 }
 0xb8a   :  { %v6148_v15 = vsel %vm6147_vm2, %v6145_v32, %v6142_v26 }
 0xb8b   :  { %v9077_v33 = vpop.eup %9076  ;;  %v6158_v4 = vsel %vm6132_vm3, %v6130_v11, %v6148_v15  ;;  %v9085_v15 = vld [vmem:[#allocation2 + $0x78] sm:$0xff] }
 0xb8c   :  { %v6151_v27 = vmul.f32 0.6931472, %v9077_v33  ;;  %v7630_v3 = vadd.f32 -0.6931472, %v6158_v4  ;;  %v6237_v4 = vrot.slane %v6212_v18, %v760_v31 }
 0xb8e   :  { %v6157_v28 = vsel %vm6156_vm4, %v6154_v22, %v6151_v27  ;;  %v6613_v27 = vld [vmem:[#allocation7] sm:$0x3]  ;;  %v6233_v22 = vrot.slane %v6212_v18, %v756_v34 }
 0xb8f   :  { %v6159_v17 = vsel %vm6133_vm5, %v6131_v41, %v6157_v28  ;;  %v9089_v34 = vld [vmem:[#allocation2 + $0x88] sm:$0xff] }
 0xb90   :  { %v7631_v39 = vadd.f32 -0.6931472, %v6159_v17 }
 0xb92   :  { %v6210_v49 = vpack.c.bf16 %v7631_v39, %v7630_v3  ;;  %v9086_v39 = vld [vmem:[#allocation2 + $0x20] sm:$0xff] }
 0xb94   :  { %6517 = vmatmul.mubr.bf16.vlgmr.msra.gmra.mxu0 %v6210_v49  ;;  %6560 = vmatmul.mubr.bf16.vlgmr.msra.gmra.mxu1 %v6210_v49 }
 0xb95   :  { %6571 = vmatpush1.bf16.msra.mxu0 %v9046_v42  ;;  %6602 = vmatprep.mubr.bf16.mxu0 %v9297_v38  ;;  %v9066_v38 = vld [vmem:[#allocation10 + $0x1244] ss:$24 sps:$4 sm:$0xff]  }
 0xb96   :  { %6572 = vmatprep.subr.bf16.mxu0 %v9051_v56  ;;  %6681 = vmatprep.mubr.f32.mxu1 %v9298_v36 }
 0xb99   :  { %6573 = vmatpush1.bf16.msra.mxu0 %v9049_v13  ;;  %v9087_v13 = vld [vmem:[#allocation2 + $0x28] sm:$0xff] }
 0xb9a   :  { %6574 = vmatprep.subr.bf16.mxu0 %v9054_v0 }
 0xb9d   :  { %6575 = vmatpush1.bf16.msra.mxu0 %v9052_v44 }
 0xb9e   :  { %6576 = vmatprep.subr.bf16.mxu0 %v9057_v46  ;;  %v9088_v46 = vld [vmem:[#allocation2 + $0x80] sm:$0xff] }
 0xba1   :  { %6577 = vmatpush1.bf16.msra.mxu0 %v9055_v6 }
 0xba2   :  { %6578 = vmatprep.subr.bf16.mxu0 %v9060_v61 }
 0xba5   :  { %6579 = vmatpush1.bf16.msra.mxu0 %v9058_v10 }
 0xba6   :  { %6580 = vmatprep.subr.bf16.mxu0 %v9063_v47 }
 0xba9   :  { %6581 = vmatpush1.bf16.msra.mxu0 %v9061_v9 }
 0xbaa   :  { %6582 = vmatprep.subr.bf16.mxu0 %v9066_v38 }
 0xbad   :  { %6583 = vmatpush1.bf16.msra.mxu0 %v9064_v60 }
 0xbae   :  { %6584 = vmatprep.subr.bf16.mxu0 %v9069_v40 }
 0xbb1   :  { %6585 = vmatpush1.bf16.msra.mxu0 %v9067_v37 }
 0xbb4   :  { %6603 = vmatmul.mubr.bf16.vlgmr.msra.gmra.mxu0 %v6210_v49 }
 0xbb5   :  { %6823 = vmatprep.mubr.f32.mxu0 %v9298_v36 }
 0xc54   :  { %v6518_v48 = vpop.f32.mrf.mxu0  ;;  %v6561_v45 = vpop.f32.mrf.mxu1 }
 0xc55   :  { %v6519_v5 = vadd.f32 %v6518_v48, %v6217_v19  ;;  %v6562_v14 = vadd.f32 %v6561_v45, %v6225_v58 }
 0xc56   :  { %v6520_v11 = vpop.f32.mrf.mxu0  ;;  %v6563_v52 = vpop.f32.mrf.mxu1 }
 0xc57   :  { %v6865_v2 = vadd.f32 %v9078_v63, %v6519_v5  ;;  %v6867_v41 = vadd.f32 %v9079_v16, %v6562_v14  ;;  %v6521_v54 = vadd.f32 %v6520_v11, %v6221_v21  ;;  %v6564_v23 = vadd.f32 %v6563_v52, %v6229_v7 }
 0xc58   :  { %v6522_v55 = vpop.f32.mrf.mxu0  ;;  %v6565_v51 = vpop.f32.mrf.mxu1 }
 0xc59   :  { %6877 = vst [vmem:[#allocation14] sm:$0xff] %v6865_v2  ;;  %6879 = vst [vmem:[#allocation14 + $0x10] sm:$0xff] %v6867_v41  ;;  %v6866_v57 = vadd.f32 %v9080_v43, %v6521_v54  ;;  %v6868_v8 = vadd.f32 %v9081_v59, %v6564_v23  ;;  %v6523_v20 = vadd.f32 %v6522_v55, %v6217_v19 }
 0xc5a   :  { %v6566_v62 = vadd.f32 %v6565_v51, %v6225_v58  ;;  %v6524_v53 = vpop.f32.mrf.mxu0  ;;  %v6567_v24 = vpop.f32.mrf.mxu1 }
 0xc5b   :  { %6878 = vst [vmem:[#allocation14 + $0x8] sm:$0xff] %v6866_v57  ;;  %6880 = vst [vmem:[#allocation14 + $0x18] sm:$0xff] %v6868_v8  ;;  %v6871_v29 = vadd.f32 %v9082_v30, %v6523_v20  ;;  %v6525_v26 = vadd.f32 %v6524_v53, %v6221_v21  ;;  %v6568_v32 = vadd.f32 %v6567_v24, %v6229_v7 }
 0xc5c   :  { %v6873_v25 = vadd.f32 %v9083_v1, %v6566_v62 }
 0xc5d   :  { %6883 = vst [vmem:[#allocation14 + $0x30] sm:$0xff] %v6871_v29  ;;  %v6872_v50 = vadd.f32 %v9084_v12, %v6525_v26  ;;  %v6874_v33 = vadd.f32 %v9085_v15, %v6568_v32  ;;  %6645 = vmatprep.subr.mxu1 %v6525_v26 }
 0xc5e   :  { %6885 = vst [vmem:[#allocation14 + $0x40] sm:$0xff] %v6873_v25  ;;  %6646 = vmatpush1.msra.mxu1 %v6523_v20 }
 0xc5f   :  { %6884 = vst [vmem:[#allocation14 + $0x38] sm:$0xff] %v6872_v50  ;;  %6886 = vst [vmem:[#allocation14 + $0x48] sm:$0xff] %v6874_v33  ;;  %6647 = vmatprep.subr.mxu1 %v6521_v54 }
 0xc60   :  { %6648 = vmatpush1.msra.mxu1 %v6519_v5 }
 0xc61   :  { %6716 = vmatprep.subr.mxu1 %v6568_v32  ;;  %7680 = vmatmul.mubr.msk.f32.vlgmr.msra.gmra.mxu1 %vm4445_vm0, %v6613_v27 }
 0xc62   :  { %6717 = vmatpush1.msra.mxu1 %v6566_v62  ;;  %6752 = vmatprep.mubr.f32.mxu1 %v9298_v36 }
 0xc63   :  { %6718 = vmatprep.subr.mxu1 %v6564_v23 }
 0xc64   :  { %6719 = vmatpush1.msra.mxu1 %v6562_v14 }
 0xc65   :  { %7681 = vmatmul.mubr.msk.f32.vlgmr.msra.gmra.mxu1 %vm4445_vm0, %v6613_v27 }
 0xc74   :  { %v6604_v28 = vpop.f32.mrf.mxu0 }
 0xc75   :  { %v6605_v17 = vadd.f32 %v6604_v28, %v6233_v22 }
 0xc76   :  { %v6606_v3 = vpop.f32.mrf.mxu0 }
 0xc77   :  { %v6869_v42 = vadd.f32 %v9086_v39, %v6605_v17  ;;  %v6607_v49 = vadd.f32 %v6606_v3, %v6237_v4 }
 0xc78   :  { %v6608_v56 = vpop.f32.mrf.mxu0 }
 0xc79   :  { %6881 = vst [vmem:[#allocation14 + $0x20] sm:$0xff] %v6869_v42  ;;  %v6870_v36 = vadd.f32 %v9087_v13, %v6607_v49  ;;  %v6609_v0 = vadd.f32 %v6608_v56, %v6233_v22 }
 0xc7a   :  { %v6610_v44 = vpop.f32.mrf.mxu0 }
 0xc7b   :  { %6882 = vst [vmem:[#allocation14 + $0x28] sm:$0xff] %v6870_v36  ;;  %v6875_v6 = vadd.f32 %v9088_v46, %v6609_v0  ;;  %v6611_v61 = vadd.f32 %v6610_v44, %v6237_v4 }
 0xc7d   :  { %6887 = vst [vmem:[#allocation14 + $0x50] sm:$0xff] %v6875_v6  ;;  %v6876_v10 = vadd.f32 %v9089_v34, %v6611_v61  ;;  %6787 = vmatprep.subr.mxu0 %v6611_v61 }
 0xc7e   :  { %6788 = vmatpush1.msra.mxu0 %v6609_v0 }
 0xc7f   :  { %6888 = vst [vmem:[#allocation14 + $0x58] sm:$0xff] %v6876_v10  ;;  %6789 = vmatprep.subr.mxu0 %v6607_v49 }
 0xc80   :  { %6790 = vmatpush1.msra.mxu0 %v6605_v17 }
 0xc81   :  { %7682 = vmatmul.mubr.msk.f32.vlgmr.msra.gmra.mxu0 %vm4445_vm0, %v6613_v27 }
 0xc82   :  { %9241 = shalt.err (!%p9238_p11)
}
 0xc83   :  { %s9301_s21 = smov 768   ;;  %s9302_s22 = smov 48   ;;  %v9303_v31 = vmov 1983009808  }
 0xc84   :  { %6900 = dma.vmem_to_hbm [thread:$0]  %s6895_s6, 1536, %s9780_s7, [#allocation4], %s9301_s21, %s9301_s21, %s9302_s22   ;;  %v6839_v47 = vunpack.c.l.s4 %v9303_v31 }
 0xc85   :  { %s9304_s25 = smov [#allocation15]  }
 0xc86   :  { %v6840_v9 = vunpack.c.0.s8 %v6839_v47  ;;  %s6907_s3 = sshll.u32 %s9304_s25, 4  ;;  %s6908_s3 = int_to_ptr.vmem [resolvable:$true] %s6907_s3 }
 0xc87   :  { %s9250_s7 = scalar_lea.vmem %s6908_s3, 192  ;;  %p9255_p13 = scmp.lt.s32.totalorder %s6908_s3, %s6908_s3 }
 0xc88   :  { %v6843_v37 = vsub.s32 %v6840_v9, %v9465_v35  ;;  %p9251_p12 = scmp.ne.s32.totalorder %s6908_s3, %s9250_s7  ;;  %p9256_p0 = scmp.lt.s32.totalorder %s9250_s7, %s9250_s7 }
 0xc8a   :  { %p9257_p1 = por %p9256_p0, %p9255_p13 }
 0xc8c   :  { %p9258_p2 = pnand %p9257_p1, %p9251_p12 }
 0xd21   :  { %v6683_v38 = vpop.f32.mrf.mxu1 }
 0xd23   :  { %v6685_v60 = vpop.f32.mrf.mxu1 }
 0xd24   :  { %v6836_v40 = vcombine.low %v6683_v38, %v6685_v60 }
 0xd25   :  { %v6754_v18 = vpop.f32.mrf.mxu1 }
 0xd26   :  { %v6844_v58 = vrot.slane %v6836_v40, %v6843_v37 }
 0xd27   :  { %v6756_v19 = vpop.f32.mrf.mxu1 }
 0xd28   :  { %v6837_v21 = vcombine.low %v6754_v18, %v6756_v19 }
 0xd2a   :  { %v6851_v7 = vrot.slane %v6837_v21, %v6843_v37 }
 0xd2c   :  { %v6852_v48 = vcombine.low %v6844_v58, %v6851_v7 }
 0xd2e   :  { %6863 = vst [vmem:[#allocation15] sm:$0xff] %v6852_v48 }
 0xd41   :  { %v6825_v45 = vpop.f32.mrf.mxu0 }
 0xd43   :  { %v6827_v5 = vpop.f32.mrf.mxu0 }
 0xd44   :  { %v6853_v14 = vcombine.low %v6825_v45, %v6827_v5 }
 0xd46   :  { %7683 = vst.sshfl [vmem:[#allocation15 + $0x8] sm:$0x33 pattern:$0x76325410] %v6853_v14 }
 0xd47   :  { %9261 = shalt.err (!%p9258_p2)
}
 0xd48   :  { %6910 = dma.vmem_to_hbm [thread:$0]  %s6908_s3, 192, %s9781_s8, [#allocation16]  }
 0xd49   :  { %9278 = dma.done.wait [#allocation4], 1536  }
 0xd4a   :  { %9279 = vsyncadd [#allocation4], 4294965760 }
 0xd4b   :  { %9280 = dma.done.wait [#allocation16], 192  }
 0xd4c   :  { %9281 = vsyncadd [#allocation16], 4294967104 }
 0xd4d   :  { %6917 = vsyncpa [#allocation3], 1 }
 0xd4e   :  { %6918 = vsyncpa [#allocation6], 1 }
 0xd4f   :  { %6919 = vsyncpa [#allocation9], 1 }
 0xd50   :  { %6920 = vsyncpa [#allocation12], 1 }
 0xd51   :  { %6921 = vsyncpa [#allocation4], 1 }
 0xd52   :  { %6922 = vsyncpa [#allocation16], 1 }

</bundles_post_ra>
